<compile_context>
chip_gen: v5e
topology: v5e:2x2
jax: 0.10.0
libtpu: 0.0.40
codegen_flags: <defaults>
</compile_context>

<pallas_src>
import functools
import math

import jax
import jax.numpy as jnp
from jax.experimental import pallas as pl
from jax.experimental.pallas import tpu as pltpu


_LANE = 128  # padded channel width for every conv layer (MXU lane width)


def _rup(n, m):
    return ((n + m - 1) // m) * m


# ----------------------------------------------------------------------------
# Fused kernel: conv stack + maxpool + 2-layer GRU + fc_out
# ----------------------------------------------------------------------------
def _fused_kernel(x_ref, w1_ref, b1_ref, w2_ref, b2_ref, w3_ref, b3_ref,
                  w4_ref, b4_ref,
                  wi0_ref, wh0_ref, bi0_ref, bh0_ref,
                  wi1_ref, wh1_ref, bi1_ref, bh1_ref,
                  f1w_ref, f1b_ref, f2w_ref, f2b_ref,
                  o_ref,
                  h1_s, h2_s, h3_s,
                  *, B, L, L1, L2, L3, L4, L1s, L2s, L3s, H):
    f32 = jnp.float32
    bf16 = jnp.bfloat16

    def conv_layer(src_ref, row0, lout, k_taps, w_ref, b_ref):
        """Conv1d(stride=2, pad=0) + ReLU as ONE MXU dot.

        src_ref holds (rows, 128) activations, channels lane-dense.  The K tap
        slabs are gathered with stride-2 sublane reads, cast to bf16,
        lane-concatenated (each slab is 128-lane aligned) and contracted in a
        single (lout, K*128) x (K*128, 128) matmul with f32 accumulation.
        """
        slabs = [
            src_ref[pl.ds(row0 + k, lout, stride=2), :].astype(bf16)
            for k in range(k_taps)
        ]
        xcol = jnp.concatenate(slabs, axis=-1) if k_taps > 1 else slabs[0]
        acc = jnp.dot(xcol, w_ref[...], preferred_element_type=f32)
        return jnp.maximum(acc + b_ref[...], 0.0)          # f32 (lout, 128)

    # ---- CNN stack per sample (B tiny, static unroll).  The layer-0 GRU
    # input gates do not depend on the hidden state, so they are precomputed
    # here and only the hidden-side matmul stays inside the recurrence.
    gi0 = []
    for b in range(B):
        h1 = conv_layer(x_ref, b * L, L1, 10, w1_ref, b1_ref)      # (L1,128)
        h1_s[pl.ds(b * L1s, L1), :] = h1
        h2 = conv_layer(h1_s, b * L1s, L2, 5, w2_ref, b2_ref)      # (L2,128)
        h2_s[pl.ds(b * L2s, L2), :] = h2
        h3 = conv_layer(h2_s, b * L2s, L3, 5, w3_ref, b3_ref)      # (L3,128)
        h3_s[pl.ds(b * L3s, L3), :] = h3
        h4 = conv_layer(h3_s, b * L3s, L4, 3, w4_ref, b4_ref)      # (L4,128)
        # AdaptiveMaxPool1d(1) over the length axis.
        feat = h4 if L4 == 1 else jnp.max(h4, axis=0, keepdims=True)  # (1,128)
        gi0.append(jnp.dot(feat.astype(bf16), wi0_ref[...],
                           preferred_element_type=f32) + bi0_ref[...])

    # ---- 2-layer GRU, batch = 1, seq_len = B (PyTorch gate order r, z, n).
    def gru_cell(gi, gh, h_prev):
        r = jax.nn.sigmoid(gi[:, 0:H] + gh[:, 0:H])
        z = jax.nn.sigmoid(gi[:, H:2 * H] + gh[:, H:2 * H])
        n = jnp.tanh(gi[:, 2 * H:3 * H] + r * gh[:, 2 * H:3 * H])
        h = (1.0 - z) * n
        if h_prev is not None:           # initHidden == zeros at t == 0
            h = h + z * h_prev
        return h

    # layer 0
    h = None
    h0_out = []
    for t in range(B):
        if h is None:                    # t == 0: h == 0  =>  gh == b_hh
            gh = bh0_ref[...]
        else:
            gh = jnp.dot(h.astype(bf16), wh0_ref[...],
                         preferred_element_type=f32) + bh0_ref[...]
        h = gru_cell(gi0[t], gh, h)
        h0_out.append(h)

    # layer 1
    h = None
    for t in range(B):
        gi = jnp.dot(h0_out[t].astype(bf16), wi1_ref[...],
                     preferred_element_type=f32) + bi1_ref[...]
        if h is None:
            gh = bh1_ref[...]
        else:
            gh = jnp.dot(h.astype(bf16), wh1_ref[...],
                         preferred_element_type=f32) + bh1_ref[...]
        h = gru_cell(gi, gh, h)

    # ---- fc_out on x[-1, :, :] (top-layer hidden at the last step).
    y = jnp.maximum(jnp.dot(h.astype(bf16), f1w_ref[...],
                            preferred_element_type=f32) + f1b_ref[...], 0.0)
    o_ref[...] = jnp.dot(y.astype(bf16), f2w_ref[...],
                         preferred_element_type=f32) + f2b_ref[...]


# ----------------------------------------------------------------------------
# Forward wrapper (single pallas_call; wrapper only does layout glue on x)
# ----------------------------------------------------------------------------
def forward(x, q):
    B, Cin, L = x.shape
    assert Cin <= _LANE, "in_channels must be <= 128 for this packing"
    K1, K2, K3, K4 = 10, 5, 5, 3
    L1 = (L - K1) // 2 + 1
    L2 = (L1 - K2) // 2 + 1
    L3 = (L2 - K3) // 2 + 1
    L4 = (L3 - K4) // 2 + 1
    assert L4 >= 1, "input length too short for this conv stack"
    H = 128
    L1s, L2s, L3s = _rup(L1, 8), _rup(L2, 8), _rup(L3, 8)

    # (B, Cin, L) -> (B*L, 128): length on sublanes, channels lane-dense and
    # zero-padded to the full lane width.  Pure layout glue on the raw 2 KB
    # input (no im2col gather, no x_col HBM intermediate).
    x2 = jnp.transpose(x, (0, 2, 1)).reshape(B * L, Cin)
    x2 = jnp.pad(x2, ((0, 0), (0, _LANE - Cin))).astype(jnp.float32)

    kernel = functools.partial(_fused_kernel, B=B, L=L, L1=L1, L2=L2, L3=L3,
                               L4=L4, L1s=L1s, L2s=L2s, L3s=L3s, H=H)

    args = (x2,
            q["w1"], q["b1"], q["w2"], q["b2"], q["w3"], q["b3"],
            q["w4"], q["b4"],
            q["wi0T"], q["wh0T"], q["bi0"], q["bh0"],
            q["wi1T"], q["wh1T"], q["bi1"], q["bh1"],
            q["f1wT"], q["f1b"], q["f2wT"], q["f2b"])

    # Advisory scheduling hint for XLA around the custom call.
    macs = (B * L1 * (K1 * _LANE) * _LANE
            + B * L2 * (K2 * _LANE) * _LANE
            + B * L3 * (K3 * _LANE) * _LANE
            + B * L4 * (K4 * _LANE) * _LANE
            + 2 * B * H * 3 * H                 # input-side GRU gates (2 layers)
            + 2 * max(B - 1, 0) * H * 3 * H     # hidden-side gates (t >= 1)
            + H * 64 + 64 * 5)
    bytes_accessed = sum(int(a.size) * a.dtype.itemsize for a in args) + 4 * 5
    cost = pl.CostEstimate(flops=2 * macs, transcendentals=2 * B * 3 * H,
                           bytes_accessed=bytes_accessed)

    return pl.pallas_call(
        kernel,
        out_shape=jax.ShapeDtypeStruct((1, 5), jnp.float32),
        scratch_shapes=[
            pltpu.VMEM((B * L1s, _LANE), jnp.float32),  # conv1 acts, per-b slices
            pltpu.VMEM((B * L2s, _LANE), jnp.float32),  # conv2 acts, per-b slices
            pltpu.VMEM((B * L3s, _LANE), jnp.float32),  # conv3 acts, per-b slices
        ],
        cost_estimate=cost,
    )(*args)


# ----------------------------------------------------------------------------
# Parameters: synthetic init in PyTorch layout, then packed to kernel layout
# ----------------------------------------------------------------------------
def init_params(key, in_channels):
    H = 128
    keys = iter(jax.random.split(key, 24))

    def u(shape, fan_in):
        s = 1.0 / math.sqrt(fan_in)
        return jax.random.uniform(next(keys), shape, jnp.float32, -s, s)

    p = {}
    conv_defs = [("c1", 96, in_channels, 10), ("c2", 96, 96, 5),
                 ("c3", 96, 96, 5), ("c4", 128, 96, 3)]
    for name, cout, cin, k in conv_defs:
        p[name + "w"] = u((cout, cin, k), cin * k)        # PyTorch (Cout, Cin, K)
        p[name + "b"] = u((cout,), cin * k)
    for layer in (0, 1):                                  # GRU input size == H
        p[f"w_ih{layer}"] = u((3 * H, H), H)              # PyTorch (3H, in)
        p[f"w_hh{layer}"] = u((3 * H, H), H)
        p[f"b_ih{layer}"] = u((3 * H,), H)
        p[f"b_hh{layer}"] = u((3 * H,), H)
    p["fc1w"] = u((64, H), H)
    p["fc1b"] = u((64,), H)
    p["fc2w"] = u((5, 64), 64)
    p["fc2b"] = u((5,), 64)
    return p


def pack_params(p):
    """PyTorch layouts -> kernel layouts (128-lane padded, bf16 matmul operands)."""
    bf16 = jnp.bfloat16
    f32 = jnp.float32

    def pack_conv(w, b):
        cout, cin, k = w.shape
        wt = jnp.transpose(w, (2, 1, 0))                          # (K, Cin, Cout)
        wt = jnp.pad(wt, ((0, 0), (0, _LANE - cin), (0, _LANE - cout)))
        wk = wt.reshape(k * _LANE, _LANE).astype(bf16)            # (K*128, 128)
        bk = jnp.pad(b, (0, _LANE - cout)).reshape(1, _LANE).astype(f32)
        return wk, bk

    q = {}
    q["w1"], q["b1"] = pack_conv(p["c1w"], p["c1b"])
    q["w2"], q["b2"] = pack_conv(p["c2w"], p["c2b"])
    q["w3"], q["b3"] = pack_conv(p["c3w"], p["c3b"])
    q["w4"], q["b4"] = pack_conv(p["c4w"], p["c4b"])
    for layer in (0, 1):
        q[f"wi{layer}T"] = p[f"w_ih{layer}"].T.astype(bf16)       # (in, 3H)
        q[f"wh{layer}T"] = p[f"w_hh{layer}"].T.astype(bf16)       # (H, 3H)
        q[f"bi{layer}"] = p[f"b_ih{layer}"].reshape(1, -1).astype(f32)
        q[f"bh{layer}"] = p[f"b_hh{layer}"].reshape(1, -1).astype(f32)
    q["f1wT"] = p["fc1w"].T.astype(bf16)                          # (128, 64)
    q["f1b"] = p["fc1b"].reshape(1, -1).astype(f32)
    q["f2wT"] = p["fc2w"].T.astype(bf16)                          # (64, 5)
    q["f2b"] = p["fc2b"].reshape(1, -1).astype(f32)
    return q


if __name__ == "__main__":
    key = jax.random.PRNGKey(0)
    k_in, k_par = jax.random.split(key)
    in_channels, B, L = 4, 2, 64   # L=64 -> conv lengths 28, 12, 4, 1
    x = jax.random.normal(k_in, (B, in_channels, L), dtype=jnp.float32)
    params = pack_params(init_params(k_par, in_channels))

    fwd = jax.jit(forward)
    out = jax.block_until_ready(fwd(x, params))
    assert out.shape == (1, 5) and out.dtype == jnp.float32
    print("KERNEL_OK")
</pallas_src>

<mosaic_0001>
module attributes {stable_mosaic.version = 11 : i64} {
  func.func @_fused_kernel(%arg0: memref<128x128xf32, #tpu.memory_space<vmem>>, %arg1: memref<1280x128xbf16, #tpu.memory_space<vmem>>, %arg2: memref<1x128xf32, #tpu.memory_space<vmem>>, %arg3: memref<640x128xbf16, #tpu.memory_space<vmem>>, %arg4: memref<1x128xf32, #tpu.memory_space<vmem>>, %arg5: memref<640x128xbf16, #tpu.memory_space<vmem>>, %arg6: memref<1x128xf32, #tpu.memory_space<vmem>>, %arg7: memref<384x128xbf16, #tpu.memory_space<vmem>>, %arg8: memref<1x128xf32, #tpu.memory_space<vmem>>, %arg9: memref<128x384xbf16, #tpu.memory_space<vmem>>, %arg10: memref<128x384xbf16, #tpu.memory_space<vmem>>, %arg11: memref<1x384xf32, #tpu.memory_space<vmem>>, %arg12: memref<1x384xf32, #tpu.memory_space<vmem>>, %arg13: memref<128x384xbf16, #tpu.memory_space<vmem>>, %arg14: memref<128x384xbf16, #tpu.memory_space<vmem>>, %arg15: memref<1x384xf32, #tpu.memory_space<vmem>>, %arg16: memref<1x384xf32, #tpu.memory_space<vmem>>, %arg17: memref<128x64xbf16, #tpu.memory_space<vmem>>, %arg18: memref<1x64xf32, #tpu.memory_space<vmem>>, %arg19: memref<64x5xbf16, #tpu.memory_space<vmem>>, %arg20: memref<1x5xf32, #tpu.memory_space<vmem>>, %arg21: memref<1x5xf32, #tpu.memory_space<vmem>>, %arg22: memref<64x128xf32, #tpu.memory_space<vmem>>, %arg23: memref<32x128xf32, #tpu.memory_space<vmem>>, %arg24: memref<16x128xf32, #tpu.memory_space<vmem>>) attributes {dimension_semantics = [], scalar_prefetch = 0 : i64, scratch_operands = 3 : i64, tpu.core_type = #tpu.core_type<tc>} {
    %c0 = arith.constant 0 : index
    %c0_0 = arith.constant 0 : index
    %0 = tpu.strided_load %arg0[%c0, %c0_0] {strides = array<i32: 2, 1>} : memref<128x128xf32, #tpu.memory_space<vmem>>, vector<28x128xf32>
    %1 = arith.truncf %0 : vector<28x128xf32> to vector<28x128xbf16>
    %c1 = arith.constant 1 : index
    %c0_1 = arith.constant 0 : index
    %2 = tpu.strided_load %arg0[%c1, %c0_1] {strides = array<i32: 2, 1>} : memref<128x128xf32, #tpu.memory_space<vmem>>, vector<28x128xf32>
    %3 = arith.truncf %2 : vector<28x128xf32> to vector<28x128xbf16>
    %c2 = arith.constant 2 : index
    %c0_2 = arith.constant 0 : index
    %4 = tpu.strided_load %arg0[%c2, %c0_2] {strides = array<i32: 2, 1>} : memref<128x128xf32, #tpu.memory_space<vmem>>, vector<28x128xf32>
    %5 = arith.truncf %4 : vector<28x128xf32> to vector<28x128xbf16>
    %c3 = arith.constant 3 : index
    %c0_3 = arith.constant 0 : index
    %6 = tpu.strided_load %arg0[%c3, %c0_3] {strides = array<i32: 2, 1>} : memref<128x128xf32, #tpu.memory_space<vmem>>, vector<28x128xf32>
    %7 = arith.truncf %6 : vector<28x128xf32> to vector<28x128xbf16>
    %c4 = arith.constant 4 : index
    %c0_4 = arith.constant 0 : index
    %8 = tpu.strided_load %arg0[%c4, %c0_4] {strides = array<i32: 2, 1>} : memref<128x128xf32, #tpu.memory_space<vmem>>, vector<28x128xf32>
    %9 = arith.truncf %8 : vector<28x128xf32> to vector<28x128xbf16>
    %c5 = arith.constant 5 : index
    %c0_5 = arith.constant 0 : index
    %10 = tpu.strided_load %arg0[%c5, %c0_5] {strides = array<i32: 2, 1>} : memref<128x128xf32, #tpu.memory_space<vmem>>, vector<28x128xf32>
    %11 = arith.truncf %10 : vector<28x128xf32> to vector<28x128xbf16>
    %c6 = arith.constant 6 : index
    %c0_6 = arith.constant 0 : index
    %12 = tpu.strided_load %arg0[%c6, %c0_6] {strides = array<i32: 2, 1>} : memref<128x128xf32, #tpu.memory_space<vmem>>, vector<28x128xf32>
    %13 = arith.truncf %12 : vector<28x128xf32> to vector<28x128xbf16>
    %c7 = arith.constant 7 : index
    %c0_7 = arith.constant 0 : index
    %14 = tpu.strided_load %arg0[%c7, %c0_7] {strides = array<i32: 2, 1>} : memref<128x128xf32, #tpu.memory_space<vmem>>, vector<28x128xf32>
    %15 = arith.truncf %14 : vector<28x128xf32> to vector<28x128xbf16>
    %c8 = arith.constant 8 : index
    %c0_8 = arith.constant 0 : index
    %16 = tpu.strided_load %arg0[%c8, %c0_8] {strides = array<i32: 2, 1>} : memref<128x128xf32, #tpu.memory_space<vmem>>, vector<28x128xf32>
    %17 = arith.truncf %16 : vector<28x128xf32> to vector<28x128xbf16>
    %c9 = arith.constant 9 : index
    %c0_9 = arith.constant 0 : index
    %18 = tpu.strided_load %arg0[%c9, %c0_9] {strides = array<i32: 2, 1>} : memref<128x128xf32, #tpu.memory_space<vmem>>, vector<28x128xf32>
    %19 = arith.truncf %18 : vector<28x128xf32> to vector<28x128xbf16>
    %20 = tpu.concatenate %1, %3, %5, %7, %9, %11, %13, %15, %17, %19 in 1 : vector<28x128xbf16>, vector<28x128xbf16>, vector<28x128xbf16>, vector<28x128xbf16>, vector<28x128xbf16>, vector<28x128xbf16>, vector<28x128xbf16>, vector<28x128xbf16>, vector<28x128xbf16>, vector<28x128xbf16> -> vector<28x1280xbf16>
    %c0_10 = arith.constant 0 : index
    %c0_11 = arith.constant 0 : index
    %21 = vector.load %arg1[%c0_10, %c0_11] : memref<1280x128xbf16, #tpu.memory_space<vmem>>, vector<1280x128xbf16>
    %cst = arith.constant dense<0.000000e+00> : vector<28x128xf32>
    %22 = tpu.matmul %20, %21, %cst {dimension_numbers = #tpu.dot_dimension_numbers<[1], [0], [0], [1], [0, 0, 1, 1], [], []>} : vector<28x1280xbf16>, vector<1280x128xbf16>, vector<28x128xf32> -> vector<28x128xf32>
    %c0_12 = arith.constant 0 : index
    %c0_13 = arith.constant 0 : index
    %23 = vector.load %arg2[%c0_12, %c0_13] : memref<1x128xf32, #tpu.memory_space<vmem>>, vector<1x128xf32>
    %24 = vector.broadcast %23 : vector<1x128xf32> to vector<28x128xf32>
    %25 = arith.addf %22, %24 : vector<28x128xf32>
    %cst_14 = arith.constant 0.000000e+00 : f32
    %26 = vector.broadcast %cst_14 : f32 to vector<28x128xf32>
    %27 = arith.maximumf %25, %26 : vector<28x128xf32>
    %c0_15 = arith.constant 0 : index
    %c0_16 = arith.constant 0 : index
    %28 = vector.load %arg22[%c0_15, %c0_16] : memref<64x128xf32, #tpu.memory_space<vmem>>, vector<28x128xf32>
    tpu.vector_store %arg22[%c0_15, %c0_16], %27 {strides = array<i32>} : memref<64x128xf32, #tpu.memory_space<vmem>>, vector<28x128xf32>,
    %c0_17 = arith.constant 0 : index
    %c0_18 = arith.constant 0 : index
    %29 = tpu.strided_load %arg22[%c0_17, %c0_18] {strides = array<i32: 2, 1>} : memref<64x128xf32, #tpu.memory_space<vmem>>, vector<12x128xf32>
    %30 = arith.truncf %29 : vector<12x128xf32> to vector<12x128xbf16>
    %c1_19 = arith.constant 1 : index
    %c0_20 = arith.constant 0 : index
    %31 = tpu.strided_load %arg22[%c1_19, %c0_20] {strides = array<i32: 2, 1>} : memref<64x128xf32, #tpu.memory_space<vmem>>, vector<12x128xf32>
    %32 = arith.truncf %31 : vector<12x128xf32> to vector<12x128xbf16>
    %c2_21 = arith.constant 2 : index
    %c0_22 = arith.constant 0 : index
    %33 = tpu.strided_load %arg22[%c2_21, %c0_22] {strides = array<i32: 2, 1>} : memref<64x128xf32, #tpu.memory_space<vmem>>, vector<12x128xf32>
    %34 = arith.truncf %33 : vector<12x128xf32> to vector<12x128xbf16>
    %c3_23 = arith.constant 3 : index
    %c0_24 = arith.constant 0 : index
    %35 = tpu.strided_load %arg22[%c3_23, %c0_24] {strides = array<i32: 2, 1>} : memref<64x128xf32, #tpu.memory_space<vmem>>, vector<12x128xf32>
    %36 = arith.truncf %35 : vector<12x128xf32> to vector<12x128xbf16>
    %c4_25 = arith.constant 4 : index
    %c0_26 = arith.constant 0 : index
    %37 = tpu.strided_load %arg22[%c4_25, %c0_26] {strides = array<i32: 2, 1>} : memref<64x128xf32, #tpu.memory_space<vmem>>, vector<12x128xf32>
    %38 = arith.truncf %37 : vector<12x128xf32> to vector<12x128xbf16>
    %39 = tpu.concatenate %30, %32, %34, %36, %38 in 1 : vector<12x128xbf16>, vector<12x128xbf16>, vector<12x128xbf16>, vector<12x128xbf16>, vector<12x128xbf16> -> vector<12x640xbf16>
    %c0_27 = arith.constant 0 : index
    %c0_28 = arith.constant 0 : index
    %40 = vector.load %arg3[%c0_27, %c0_28] : memref<640x128xbf16, #tpu.memory_space<vmem>>, vector<640x128xbf16>
    %cst_29 = arith.constant dense<0.000000e+00> : vector<12x128xf32>
    %41 = tpu.matmul %39, %40, %cst_29 {dimension_numbers = #tpu.dot_dimension_numbers<[1], [0], [0], [1], [0, 0, 1, 1], [], []>} : vector<12x640xbf16>, vector<640x128xbf16>, vector<12x128xf32> -> vector<12x128xf32>
    %c0_30 = arith.constant 0 : index
    %c0_31 = arith.constant 0 : index
    %42 = vector.load %arg4[%c0_30, %c0_31] : memref<1x128xf32, #tpu.memory_space<vmem>>, vector<1x128xf32>
    %43 = vector.broadcast %42 : vector<1x128xf32> to vector<12x128xf32>
    %44 = arith.addf %41, %43 : vector<12x128xf32>
    %cst_32 = arith.constant 0.000000e+00 : f32
    %45 = vector.broadcast %cst_32 : f32 to vector<12x128xf32>
    %46 = arith.maximumf %44, %45 : vector<12x128xf32>
    %c0_33 = arith.constant 0 : index
    %c0_34 = arith.constant 0 : index
    %47 = vector.load %arg23[%c0_33, %c0_34] : memref<32x128xf32, #tpu.memory_space<vmem>>, vector<12x128xf32>
    tpu.vector_store %arg23[%c0_33, %c0_34], %46 {strides = array<i32>} : memref<32x128xf32, #tpu.memory_space<vmem>>, vector<12x128xf32>,
    %c0_35 = arith.constant 0 : index
    %c0_36 = arith.constant 0 : index
    %48 = tpu.strided_load %arg23[%c0_35, %c0_36] {strides = array<i32: 2, 1>} : memref<32x128xf32, #tpu.memory_space<vmem>>, vector<4x128xf32>
    %49 = arith.truncf %48 : vector<4x128xf32> to vector<4x128xbf16>
    %c1_37 = arith.constant 1 : index
    %c0_38 = arith.constant 0 : index
    %50 = tpu.strided_load %arg23[%c1_37, %c0_38] {strides = array<i32: 2, 1>} : memref<32x128xf32, #tpu.memory_space<vmem>>, vector<4x128xf32>
    %51 = arith.truncf %50 : vector<4x128xf32> to vector<4x128xbf16>
    %c2_39 = arith.constant 2 : index
    %c0_40 = arith.constant 0 : index
    %52 = tpu.strided_load %arg23[%c2_39, %c0_40] {strides = array<i32: 2, 1>} : memref<32x128xf32, #tpu.memory_space<vmem>>, vector<4x128xf32>
    %53 = arith.truncf %52 : vector<4x128xf32> to vector<4x128xbf16>
    %c3_41 = arith.constant 3 : index
    %c0_42 = arith.constant 0 : index
    %54 = tpu.strided_load %arg23[%c3_41, %c0_42] {strides = array<i32: 2, 1>} : memref<32x128xf32, #tpu.memory_space<vmem>>, vector<4x128xf32>
    %55 = arith.truncf %54 : vector<4x128xf32> to vector<4x128xbf16>
    %c4_43 = arith.constant 4 : index
    %c0_44 = arith.constant 0 : index
    %56 = tpu.strided_load %arg23[%c4_43, %c0_44] {strides = array<i32: 2, 1>} : memref<32x128xf32, #tpu.memory_space<vmem>>, vector<4x128xf32>
    %57 = arith.truncf %56 : vector<4x128xf32> to vector<4x128xbf16>
    %58 = tpu.concatenate %49, %51, %53, %55, %57 in 1 : vector<4x128xbf16>, vector<4x128xbf16>, vector<4x128xbf16>, vector<4x128xbf16>, vector<4x128xbf16> -> vector<4x640xbf16>
    %c0_45 = arith.constant 0 : index
    %c0_46 = arith.constant 0 : index
    %59 = vector.load %arg5[%c0_45, %c0_46] : memref<640x128xbf16, #tpu.memory_space<vmem>>, vector<640x128xbf16>
    %cst_47 = arith.constant dense<0.000000e+00> : vector<4x128xf32>
    %60 = tpu.matmul %58, %59, %cst_47 {dimension_numbers = #tpu.dot_dimension_numbers<[1], [0], [0], [1], [0, 0, 1, 1], [], []>} : vector<4x640xbf16>, vector<640x128xbf16>, vector<4x128xf32> -> vector<4x128xf32>
    %c0_48 = arith.constant 0 : index
    %c0_49 = arith.constant 0 : index
    %61 = vector.load %arg6[%c0_48, %c0_49] : memref<1x128xf32, #tpu.memory_space<vmem>>, vector<1x128xf32>
    %62 = vector.broadcast %61 : vector<1x128xf32> to vector<4x128xf32>
    %63 = arith.addf %60, %62 : vector<4x128xf32>
    %cst_50 = arith.constant 0.000000e+00 : f32
    %64 = vector.broadcast %cst_50 : f32 to vector<4x128xf32>
    %65 = arith.maximumf %63, %64 : vector<4x128xf32>
    %c0_51 = arith.constant 0 : index
    %c0_52 = arith.constant 0 : index
    %66 = vector.load %arg24[%c0_51, %c0_52] : memref<16x128xf32, #tpu.memory_space<vmem>>, vector<4x128xf32>
    tpu.vector_store %arg24[%c0_51, %c0_52], %65 {strides = array<i32>} : memref<16x128xf32, #tpu.memory_space<vmem>>, vector<4x128xf32>,
    %c0_53 = arith.constant 0 : index
    %c0_54 = arith.constant 0 : index
    %67 = tpu.strided_load %arg24[%c0_53, %c0_54] {strides = array<i32: 2, 1>} : memref<16x128xf32, #tpu.memory_space<vmem>>, vector<1x128xf32>
    %68 = arith.truncf %67 : vector<1x128xf32> to vector<1x128xbf16>
    %c1_55 = arith.constant 1 : index
    %c0_56 = arith.constant 0 : index
    %69 = tpu.strided_load %arg24[%c1_55, %c0_56] {strides = array<i32: 2, 1>} : memref<16x128xf32, #tpu.memory_space<vmem>>, vector<1x128xf32>
    %70 = arith.truncf %69 : vector<1x128xf32> to vector<1x128xbf16>
    %c2_57 = arith.constant 2 : index
    %c0_58 = arith.constant 0 : index
    %71 = tpu.strided_load %arg24[%c2_57, %c0_58] {strides = array<i32: 2, 1>} : memref<16x128xf32, #tpu.memory_space<vmem>>, vector<1x128xf32>
    %72 = arith.truncf %71 : vector<1x128xf32> to vector<1x128xbf16>
    %73 = tpu.concatenate %68, %70, %72 in 1 : vector<1x128xbf16>, vector<1x128xbf16>, vector<1x128xbf16> -> vector<1x384xbf16>
    %c0_59 = arith.constant 0 : index
    %c0_60 = arith.constant 0 : index
    %74 = vector.load %arg7[%c0_59, %c0_60] : memref<384x128xbf16, #tpu.memory_space<vmem>>, vector<384x128xbf16>
    %cst_61 = arith.constant dense<0.000000e+00> : vector<1x128xf32>
    %75 = tpu.matmul %73, %74, %cst_61 {dimension_numbers = #tpu.dot_dimension_numbers<[1], [0], [0], [1], [0, 0, 1, 1], [], []>} : vector<1x384xbf16>, vector<384x128xbf16>, vector<1x128xf32> -> vector<1x128xf32>
    %c0_62 = arith.constant 0 : index
    %c0_63 = arith.constant 0 : index
    %76 = vector.load %arg8[%c0_62, %c0_63] : memref<1x128xf32, #tpu.memory_space<vmem>>, vector<1x128xf32>
    %77 = arith.addf %75, %76 : vector<1x128xf32>
    %cst_64 = arith.constant 0.000000e+00 : f32
    %78 = vector.broadcast %cst_64 : f32 to vector<1x128xf32>
    %79 = arith.maximumf %77, %78 : vector<1x128xf32>
    %80 = arith.truncf %79 : vector<1x128xf32> to vector<1x128xbf16>
    %c0_65 = arith.constant 0 : index
    %c0_66 = arith.constant 0 : index
    %81 = vector.load %arg9[%c0_65, %c0_66] : memref<128x384xbf16, #tpu.memory_space<vmem>>, vector<128x384xbf16>
    %cst_67 = arith.constant dense<0.000000e+00> : vector<1x384xf32>
    %82 = tpu.matmul %80, %81, %cst_67 {dimension_numbers = #tpu.dot_dimension_numbers<[1], [0], [0], [1], [0, 0, 1, 1], [], []>} : vector<1x128xbf16>, vector<128x384xbf16>, vector<1x384xf32> -> vector<1x384xf32>
    %c0_68 = arith.constant 0 : index
    %c0_69 = arith.constant 0 : index
    %83 = vector.load %arg11[%c0_68, %c0_69] : memref<1x384xf32, #tpu.memory_space<vmem>>, vector<1x384xf32>
    %84 = arith.addf %82, %83 : vector<1x384xf32>
    %c64 = arith.constant 64 : index
    %c0_70 = arith.constant 0 : index
    %85 = tpu.strided_load %arg0[%c64, %c0_70] {strides = array<i32: 2, 1>} : memref<128x128xf32, #tpu.memory_space<vmem>>, vector<28x128xf32>
    %86 = arith.truncf %85 : vector<28x128xf32> to vector<28x128xbf16>
    %c65 = arith.constant 65 : index
    %c0_71 = arith.constant 0 : index
    %87 = tpu.strided_load %arg0[%c65, %c0_71] {strides = array<i32: 2, 1>} : memref<128x128xf32, #tpu.memory_space<vmem>>, vector<28x128xf32>
    %88 = arith.truncf %87 : vector<28x128xf32> to vector<28x128xbf16>
    %c66 = arith.constant 66 : index
    %c0_72 = arith.constant 0 : index
    %89 = tpu.strided_load %arg0[%c66, %c0_72] {strides = array<i32: 2, 1>} : memref<128x128xf32, #tpu.memory_space<vmem>>, vector<28x128xf32>
    %90 = arith.truncf %89 : vector<28x128xf32> to vector<28x128xbf16>
    %c67 = arith.constant 67 : index
    %c0_73 = arith.constant 0 : index
    %91 = tpu.strided_load %arg0[%c67, %c0_73] {strides = array<i32: 2, 1>} : memref<128x128xf32, #tpu.memory_space<vmem>>, vector<28x128xf32>
    %92 = arith.truncf %91 : vector<28x128xf32> to vector<28x128xbf16>
    %c68 = arith.constant 68 : index
    %c0_74 = arith.constant 0 : index
    %93 = tpu.strided_load %arg0[%c68, %c0_74] {strides = array<i32: 2, 1>} : memref<128x128xf32, #tpu.memory_space<vmem>>, vector<28x128xf32>
    %94 = arith.truncf %93 : vector<28x128xf32> to vector<28x128xbf16>
    %c69 = arith.constant 69 : index
    %c0_75 = arith.constant 0 : index
    %95 = tpu.strided_load %arg0[%c69, %c0_75] {strides = array<i32: 2, 1>} : memref<128x128xf32, #tpu.memory_space<vmem>>, vector<28x128xf32>
    %96 = arith.truncf %95 : vector<28x128xf32> to vector<28x128xbf16>
    %c70 = arith.constant 70 : index
    %c0_76 = arith.constant 0 : index
    %97 = tpu.strided_load %arg0[%c70, %c0_76] {strides = array<i32: 2, 1>} : memref<128x128xf32, #tpu.memory_space<vmem>>, vector<28x128xf32>
    %98 = arith.truncf %97 : vector<28x128xf32> to vector<28x128xbf16>
    %c71 = arith.constant 71 : index
    %c0_77 = arith.constant 0 : index
    %99 = tpu.strided_load %arg0[%c71, %c0_77] {strides = array<i32: 2, 1>} : memref<128x128xf32, #tpu.memory_space<vmem>>, vector<28x128xf32>
    %100 = arith.truncf %99 : vector<28x128xf32> to vector<28x128xbf16>
    %c72 = arith.constant 72 : index
    %c0_78 = arith.constant 0 : index
    %101 = tpu.strided_load %arg0[%c72, %c0_78] {strides = array<i32: 2, 1>} : memref<128x128xf32, #tpu.memory_space<vmem>>, vector<28x128xf32>
    %102 = arith.truncf %101 : vector<28x128xf32> to vector<28x128xbf16>
    %c73 = arith.constant 73 : index
    %c0_79 = arith.constant 0 : index
    %103 = tpu.strided_load %arg0[%c73, %c0_79] {strides = array<i32: 2, 1>} : memref<128x128xf32, #tpu.memory_space<vmem>>, vector<28x128xf32>
    %104 = arith.truncf %103 : vector<28x128xf32> to vector<28x128xbf16>
    %105 = tpu.concatenate %86, %88, %90, %92, %94, %96, %98, %100, %102, %104 in 1 : vector<28x128xbf16>, vector<28x128xbf16>, vector<28x128xbf16>, vector<28x128xbf16>, vector<28x128xbf16>, vector<28x128xbf16>, vector<28x128xbf16>, vector<28x128xbf16>, vector<28x128xbf16>, vector<28x128xbf16> -> vector<28x1280xbf16>
    %c0_80 = arith.constant 0 : index
    %c0_81 = arith.constant 0 : index
    %106 = vector.load %arg1[%c0_80, %c0_81] : memref<1280x128xbf16, #tpu.memory_space<vmem>>, vector<1280x128xbf16>
    %cst_82 = arith.constant dense<0.000000e+00> : vector<28x128xf32>
    %107 = tpu.matmul %105, %106, %cst_82 {dimension_numbers = #tpu.dot_dimension_numbers<[1], [0], [0], [1], [0, 0, 1, 1], [], []>} : vector<28x1280xbf16>, vector<1280x128xbf16>, vector<28x128xf32> -> vector<28x128xf32>
    %c0_83 = arith.constant 0 : index
    %c0_84 = arith.constant 0 : index
    %108 = vector.load %arg2[%c0_83, %c0_84] : memref<1x128xf32, #tpu.memory_space<vmem>>, vector<1x128xf32>
    %109 = vector.broadcast %108 : vector<1x128xf32> to vector<28x128xf32>
    %110 = arith.addf %107, %109 : vector<28x128xf32>
    %cst_85 = arith.constant 0.000000e+00 : f32
    %111 = vector.broadcast %cst_85 : f32 to vector<28x128xf32>
    %112 = arith.maximumf %110, %111 : vector<28x128xf32>
    %c32 = arith.constant 32 : index
    %c0_86 = arith.constant 0 : index
    %113 = vector.load %arg22[%c32, %c0_86] : memref<64x128xf32, #tpu.memory_space<vmem>>, vector<28x128xf32>
    tpu.vector_store %arg22[%c32, %c0_86], %112 {strides = array<i32>} : memref<64x128xf32, #tpu.memory_space<vmem>>, vector<28x128xf32>,
    %c32_87 = arith.constant 32 : index
    %c0_88 = arith.constant 0 : index
    %114 = tpu.strided_load %arg22[%c32_87, %c0_88] {strides = array<i32: 2, 1>} : memref<64x128xf32, #tpu.memory_space<vmem>>, vector<12x128xf32>
    %115 = arith.truncf %114 : vector<12x128xf32> to vector<12x128xbf16>
    %c33 = arith.constant 33 : index
    %c0_89 = arith.constant 0 : index
    %116 = tpu.strided_load %arg22[%c33, %c0_89] {strides = array<i32: 2, 1>} : memref<64x128xf32, #tpu.memory_space<vmem>>, vector<12x128xf32>
    %117 = arith.truncf %116 : vector<12x128xf32> to vector<12x128xbf16>
    %c34 = arith.constant 34 : index
    %c0_90 = arith.constant 0 : index
    %118 = tpu.strided_load %arg22[%c34, %c0_90] {strides = array<i32: 2, 1>} : memref<64x128xf32, #tpu.memory_space<vmem>>, vector<12x128xf32>
    %119 = arith.truncf %118 : vector<12x128xf32> to vector<12x128xbf16>
    %c35 = arith.constant 35 : index
    %c0_91 = arith.constant 0 : index
    %120 = tpu.strided_load %arg22[%c35, %c0_91] {strides = array<i32: 2, 1>} : memref<64x128xf32, #tpu.memory_space<vmem>>, vector<12x128xf32>
    %121 = arith.truncf %120 : vector<12x128xf32> to vector<12x128xbf16>
    %c36 = arith.constant 36 : index
    %c0_92 = arith.constant 0 : index
    %122 = tpu.strided_load %arg22[%c36, %c0_92] {strides = array<i32: 2, 1>} : memref<64x128xf32, #tpu.memory_space<vmem>>, vector<12x128xf32>
    %123 = arith.truncf %122 : vector<12x128xf32> to vector<12x128xbf16>
    %124 = tpu.concatenate %115, %117, %119, %121, %123 in 1 : vector<12x128xbf16>, vector<12x128xbf16>, vector<12x128xbf16>, vector<12x128xbf16>, vector<12x128xbf16> -> vector<12x640xbf16>
    %c0_93 = arith.constant 0 : index
    %c0_94 = arith.constant 0 : index
    %125 = vector.load %arg3[%c0_93, %c0_94] : memref<640x128xbf16, #tpu.memory_space<vmem>>, vector<640x128xbf16>
    %cst_95 = arith.constant dense<0.000000e+00> : vector<12x128xf32>
    %126 = tpu.matmul %124, %125, %cst_95 {dimension_numbers = #tpu.dot_dimension_numbers<[1], [0], [0], [1], [0, 0, 1, 1], [], []>} : vector<12x640xbf16>, vector<640x128xbf16>, vector<12x128xf32> -> vector<12x128xf32>
    %c0_96 = arith.constant 0 : index
    %c0_97 = arith.constant 0 : index
    %127 = vector.load %arg4[%c0_96, %c0_97] : memref<1x128xf32, #tpu.memory_space<vmem>>, vector<1x128xf32>
    %128 = vector.broadcast %127 : vector<1x128xf32> to vector<12x128xf32>
    %129 = arith.addf %126, %128 : vector<12x128xf32>
    %cst_98 = arith.constant 0.000000e+00 : f32
    %130 = vector.broadcast %cst_98 : f32 to vector<12x128xf32>
    %131 = arith.maximumf %129, %130 : vector<12x128xf32>
    %c16 = arith.constant 16 : index
    %c0_99 = arith.constant 0 : index
    %132 = vector.load %arg23[%c16, %c0_99] : memref<32x128xf32, #tpu.memory_space<vmem>>, vector<12x128xf32>
    tpu.vector_store %arg23[%c16, %c0_99], %131 {strides = array<i32>} : memref<32x128xf32, #tpu.memory_space<vmem>>, vector<12x128xf32>,
    %c16_100 = arith.constant 16 : index
    %c0_101 = arith.constant 0 : index
    %133 = tpu.strided_load %arg23[%c16_100, %c0_101] {strides = array<i32: 2, 1>} : memref<32x128xf32, #tpu.memory_space<vmem>>, vector<4x128xf32>
    %134 = arith.truncf %133 : vector<4x128xf32> to vector<4x128xbf16>
    %c17 = arith.constant 17 : index
    %c0_102 = arith.constant 0 : index
    %135 = tpu.strided_load %arg23[%c17, %c0_102] {strides = array<i32: 2, 1>} : memref<32x128xf32, #tpu.memory_space<vmem>>, vector<4x128xf32>
    %136 = arith.truncf %135 : vector<4x128xf32> to vector<4x128xbf16>
    %c18 = arith.constant 18 : index
    %c0_103 = arith.constant 0 : index
    %137 = tpu.strided_load %arg23[%c18, %c0_103] {strides = array<i32: 2, 1>} : memref<32x128xf32, #tpu.memory_space<vmem>>, vector<4x128xf32>
    %138 = arith.truncf %137 : vector<4x128xf32> to vector<4x128xbf16>
    %c19 = arith.constant 19 : index
    %c0_104 = arith.constant 0 : index
    %139 = tpu.strided_load %arg23[%c19, %c0_104] {strides = array<i32: 2, 1>} : memref<32x128xf32, #tpu.memory_space<vmem>>, vector<4x128xf32>
    %140 = arith.truncf %139 : vector<4x128xf32> to vector<4x128xbf16>
    %c20 = arith.constant 20 : index
    %c0_105 = arith.constant 0 : index
    %141 = tpu.strided_load %arg23[%c20, %c0_105] {strides = array<i32: 2, 1>} : memref<32x128xf32, #tpu.memory_space<vmem>>, vector<4x128xf32>
    %142 = arith.truncf %141 : vector<4x128xf32> to vector<4x128xbf16>
    %143 = tpu.concatenate %134, %136, %138, %140, %142 in 1 : vector<4x128xbf16>, vector<4x128xbf16>, vector<4x128xbf16>, vector<4x128xbf16>, vector<4x128xbf16> -> vector<4x640xbf16>
    %c0_106 = arith.constant 0 : index
    %c0_107 = arith.constant 0 : index
    %144 = vector.load %arg5[%c0_106, %c0_107] : memref<640x128xbf16, #tpu.memory_space<vmem>>, vector<640x128xbf16>
    %cst_108 = arith.constant dense<0.000000e+00> : vector<4x128xf32>
    %145 = tpu.matmul %143, %144, %cst_108 {dimension_numbers = #tpu.dot_dimension_numbers<[1], [0], [0], [1], [0, 0, 1, 1], [], []>} : vector<4x640xbf16>, vector<640x128xbf16>, vector<4x128xf32> -> vector<4x128xf32>
    %c0_109 = arith.constant 0 : index
    %c0_110 = arith.constant 0 : index
    %146 = vector.load %arg6[%c0_109, %c0_110] : memref<1x128xf32, #tpu.memory_space<vmem>>, vector<1x128xf32>
    %147 = vector.broadcast %146 : vector<1x128xf32> to vector<4x128xf32>
    %148 = arith.addf %145, %147 : vector<4x128xf32>
    %cst_111 = arith.constant 0.000000e+00 : f32
    %149 = vector.broadcast %cst_111 : f32 to vector<4x128xf32>
    %150 = arith.maximumf %148, %149 : vector<4x128xf32>
    %c8_112 = arith.constant 8 : index
    %c0_113 = arith.constant 0 : index
    %151 = vector.load %arg24[%c8_112, %c0_113] : memref<16x128xf32, #tpu.memory_space<vmem>>, vector<4x128xf32>
    tpu.vector_store %arg24[%c8_112, %c0_113], %150 {strides = array<i32>} : memref<16x128xf32, #tpu.memory_space<vmem>>, vector<4x128xf32>,
    %c8_114 = arith.constant 8 : index
    %c0_115 = arith.constant 0 : index
    %152 = tpu.strided_load %arg24[%c8_114, %c0_115] {strides = array<i32: 2, 1>} : memref<16x128xf32, #tpu.memory_space<vmem>>, vector<1x128xf32>
    %153 = arith.truncf %152 : vector<1x128xf32> to vector<1x128xbf16>
    %c9_116 = arith.constant 9 : index
    %c0_117 = arith.constant 0 : index
    %154 = tpu.strided_load %arg24[%c9_116, %c0_117] {strides = array<i32: 2, 1>} : memref<16x128xf32, #tpu.memory_space<vmem>>, vector<1x128xf32>
    %155 = arith.truncf %154 : vector<1x128xf32> to vector<1x128xbf16>
    %c10 = arith.constant 10 : index
    %c0_118 = arith.constant 0 : index
    %156 = tpu.strided_load %arg24[%c10, %c0_118] {strides = array<i32: 2, 1>} : memref<16x128xf32, #tpu.memory_space<vmem>>, vector<1x128xf32>
    %157 = arith.truncf %156 : vector<1x128xf32> to vector<1x128xbf16>
    %158 = tpu.concatenate %153, %155, %157 in 1 : vector<1x128xbf16>, vector<1x128xbf16>, vector<1x128xbf16> -> vector<1x384xbf16>
    %c0_119 = arith.constant 0 : index
    %c0_120 = arith.constant 0 : index
    %159 = vector.load %arg7[%c0_119, %c0_120] : memref<384x128xbf16, #tpu.memory_space<vmem>>, vector<384x128xbf16>
    %cst_121 = arith.constant dense<0.000000e+00> : vector<1x128xf32>
    %160 = tpu.matmul %158, %159, %cst_121 {dimension_numbers = #tpu.dot_dimension_numbers<[1], [0], [0], [1], [0, 0, 1, 1], [], []>} : vector<1x384xbf16>, vector<384x128xbf16>, vector<1x128xf32> -> vector<1x128xf32>
    %c0_122 = arith.constant 0 : index
    %c0_123 = arith.constant 0 : index
    %161 = vector.load %arg8[%c0_122, %c0_123] : memref<1x128xf32, #tpu.memory_space<vmem>>, vector<1x128xf32>
    %162 = arith.addf %160, %161 : vector<1x128xf32>
    %cst_124 = arith.constant 0.000000e+00 : f32
    %163 = vector.broadcast %cst_124 : f32 to vector<1x128xf32>
    %164 = arith.maximumf %162, %163 : vector<1x128xf32>
    %165 = arith.truncf %164 : vector<1x128xf32> to vector<1x128xbf16>
    %c0_125 = arith.constant 0 : index
    %c0_126 = arith.constant 0 : index
    %166 = vector.load %arg9[%c0_125, %c0_126] : memref<128x384xbf16, #tpu.memory_space<vmem>>, vector<128x384xbf16>
    %cst_127 = arith.constant dense<0.000000e+00> : vector<1x384xf32>
    %167 = tpu.matmul %165, %166, %cst_127 {dimension_numbers = #tpu.dot_dimension_numbers<[1], [0], [0], [1], [0, 0, 1, 1], [], []>} : vector<1x128xbf16>, vector<128x384xbf16>, vector<1x384xf32> -> vector<1x384xf32>
    %c0_128 = arith.constant 0 : index
    %c0_129 = arith.constant 0 : index
    %168 = vector.load %arg11[%c0_128, %c0_129] : memref<1x384xf32, #tpu.memory_space<vmem>>, vector<1x384xf32>
    %169 = arith.addf %167, %168 : vector<1x384xf32>
    %c0_130 = arith.constant 0 : index
    %c0_131 = arith.constant 0 : index
    %170 = vector.load %arg12[%c0_130, %c0_131] : memref<1x384xf32, #tpu.memory_space<vmem>>, vector<1x384xf32>
    %171 = vector.extract_strided_slice %84 {offsets = [0, 0], sizes = [1, 128], strides = [1, 1]} : vector<1x384xf32> to vector<1x128xf32>
    %172 = vector.extract_strided_slice %170 {offsets = [0, 0], sizes = [1, 128], strides = [1, 1]} : vector<1x384xf32> to vector<1x128xf32>
    %173 = arith.addf %171, %172 : vector<1x128xf32>
    %174 = arith.negf %173 : vector<1x128xf32>
    %175 = math.exp %174 : vector<1x128xf32>
    %cst_132 = arith.constant 1.000000e+00 : f32
    %176 = vector.broadcast %cst_132 : f32 to vector<1x128xf32>
    %177 = arith.addf %176, %175 : vector<1x128xf32>
    %178 = arith.divf %176, %177 : vector<1x128xf32>
    %179 = vector.extract_strided_slice %84 {offsets = [0, 128], sizes = [1, 128], strides = [1, 1]} : vector<1x384xf32> to vector<1x128xf32>
    %180 = vector.extract_strided_slice %170 {offsets = [0, 128], sizes = [1, 128], strides = [1, 1]} : vector<1x384xf32> to vector<1x128xf32>
    %181 = arith.addf %179, %180 : vector<1x128xf32>
    %182 = arith.negf %181 : vector<1x128xf32>
    %183 = math.exp %182 : vector<1x128xf32>
    %cst_133 = arith.constant 1.000000e+00 : f32
    %184 = vector.broadcast %cst_133 : f32 to vector<1x128xf32>
    %185 = arith.addf %184, %183 : vector<1x128xf32>
    %186 = arith.divf %184, %185 : vector<1x128xf32>
    %187 = vector.extract_strided_slice %84 {offsets = [0, 256], sizes = [1, 128], strides = [1, 1]} : vector<1x384xf32> to vector<1x128xf32>
    %188 = vector.extract_strided_slice %170 {offsets = [0, 256], sizes = [1, 128], strides = [1, 1]} : vector<1x384xf32> to vector<1x128xf32>
    %189 = arith.mulf %178, %188 : vector<1x128xf32>
    %190 = arith.addf %187, %189 : vector<1x128xf32>
    %191 = math.tanh %190 : vector<1x128xf32>
    %cst_134 = arith.constant 1.000000e+00 : f32
    %192 = vector.broadcast %cst_134 : f32 to vector<1x128xf32>
    %193 = arith.subf %192, %186 : vector<1x128xf32>
    %194 = arith.mulf %193, %191 : vector<1x128xf32>
    %195 = arith.truncf %194 : vector<1x128xf32> to vector<1x128xbf16>
    %c0_135 = arith.constant 0 : index
    %c0_136 = arith.constant 0 : index
    %196 = vector.load %arg10[%c0_135, %c0_136] : memref<128x384xbf16, #tpu.memory_space<vmem>>, vector<128x384xbf16>
    %cst_137 = arith.constant dense<0.000000e+00> : vector<1x384xf32>
    %197 = tpu.matmul %195, %196, %cst_137 {dimension_numbers = #tpu.dot_dimension_numbers<[1], [0], [0], [1], [0, 0, 1, 1], [], []>} : vector<1x128xbf16>, vector<128x384xbf16>, vector<1x384xf32> -> vector<1x384xf32>
    %c0_138 = arith.constant 0 : index
    %c0_139 = arith.constant 0 : index
    %198 = vector.load %arg12[%c0_138, %c0_139] : memref<1x384xf32, #tpu.memory_space<vmem>>, vector<1x384xf32>
    %199 = arith.addf %197, %198 : vector<1x384xf32>
    %200 = vector.extract_strided_slice %169 {offsets = [0, 0], sizes = [1, 128], strides = [1, 1]} : vector<1x384xf32> to vector<1x128xf32>
    %201 = vector.extract_strided_slice %199 {offsets = [0, 0], sizes = [1, 128], strides = [1, 1]} : vector<1x384xf32> to vector<1x128xf32>
    %202 = arith.addf %200, %201 : vector<1x128xf32>
    %203 = arith.negf %202 : vector<1x128xf32>
    %204 = math.exp %203 : vector<1x128xf32>
    %cst_140 = arith.constant 1.000000e+00 : f32
    %205 = vector.broadcast %cst_140 : f32 to vector<1x128xf32>
    %206 = arith.addf %205, %204 : vector<1x128xf32>
    %207 = arith.divf %205, %206 : vector<1x128xf32>
    %208 = vector.extract_strided_slice %169 {offsets = [0, 128], sizes = [1, 128], strides = [1, 1]} : vector<1x384xf32> to vector<1x128xf32>
    %209 = vector.extract_strided_slice %199 {offsets = [0, 128], sizes = [1, 128], strides = [1, 1]} : vector<1x384xf32> to vector<1x128xf32>
    %210 = arith.addf %208, %209 : vector<1x128xf32>
    %211 = arith.negf %210 : vector<1x128xf32>
    %212 = math.exp %211 : vector<1x128xf32>
    %cst_141 = arith.constant 1.000000e+00 : f32
    %213 = vector.broadcast %cst_141 : f32 to vector<1x128xf32>
    %214 = arith.addf %213, %212 : vector<1x128xf32>
    %215 = arith.divf %213, %214 : vector<1x128xf32>
    %216 = vector.extract_strided_slice %169 {offsets = [0, 256], sizes = [1, 128], strides = [1, 1]} : vector<1x384xf32> to vector<1x128xf32>
    %217 = vector.extract_strided_slice %199 {offsets = [0, 256], sizes = [1, 128], strides = [1, 1]} : vector<1x384xf32> to vector<1x128xf32>
    %218 = arith.mulf %207, %217 : vector<1x128xf32>
    %219 = arith.addf %216, %218 : vector<1x128xf32>
    %220 = math.tanh %219 : vector<1x128xf32>
    %cst_142 = arith.constant 1.000000e+00 : f32
    %221 = vector.broadcast %cst_142 : f32 to vector<1x128xf32>
    %222 = arith.subf %221, %215 : vector<1x128xf32>
    %223 = arith.mulf %222, %220 : vector<1x128xf32>
    %224 = arith.mulf %215, %194 : vector<1x128xf32>
    %225 = arith.addf %223, %224 : vector<1x128xf32>
    %226 = arith.truncf %194 : vector<1x128xf32> to vector<1x128xbf16>
    %c0_143 = arith.constant 0 : index
    %c0_144 = arith.constant 0 : index
    %227 = vector.load %arg13[%c0_143, %c0_144] : memref<128x384xbf16, #tpu.memory_space<vmem>>, vector<128x384xbf16>
    %cst_145 = arith.constant dense<0.000000e+00> : vector<1x384xf32>
    %228 = tpu.matmul %226, %227, %cst_145 {dimension_numbers = #tpu.dot_dimension_numbers<[1], [0], [0], [1], [0, 0, 1, 1], [], []>} : vector<1x128xbf16>, vector<128x384xbf16>, vector<1x384xf32> -> vector<1x384xf32>
    %c0_146 = arith.constant 0 : index
    %c0_147 = arith.constant 0 : index
    %229 = vector.load %arg15[%c0_146, %c0_147] : memref<1x384xf32, #tpu.memory_space<vmem>>, vector<1x384xf32>
    %230 = arith.addf %228, %229 : vector<1x384xf32>
    %c0_148 = arith.constant 0 : index
    %c0_149 = arith.constant 0 : index
    %231 = vector.load %arg16[%c0_148, %c0_149] : memref<1x384xf32, #tpu.memory_space<vmem>>, vector<1x384xf32>
    %232 = vector.extract_strided_slice %230 {offsets = [0, 0], sizes = [1, 128], strides = [1, 1]} : vector<1x384xf32> to vector<1x128xf32>
    %233 = vector.extract_strided_slice %231 {offsets = [0, 0], sizes = [1, 128], strides = [1, 1]} : vector<1x384xf32> to vector<1x128xf32>
    %234 = arith.addf %232, %233 : vector<1x128xf32>
    %235 = arith.negf %234 : vector<1x128xf32>
    %236 = math.exp %235 : vector<1x128xf32>
    %cst_150 = arith.constant 1.000000e+00 : f32
    %237 = vector.broadcast %cst_150 : f32 to vector<1x128xf32>
    %238 = arith.addf %237, %236 : vector<1x128xf32>
    %239 = arith.divf %237, %238 : vector<1x128xf32>
    %240 = vector.extract_strided_slice %230 {offsets = [0, 128], sizes = [1, 128], strides = [1, 1]} : vector<1x384xf32> to vector<1x128xf32>
    %241 = vector.extract_strided_slice %231 {offsets = [0, 128], sizes = [1, 128], strides = [1, 1]} : vector<1x384xf32> to vector<1x128xf32>
    %242 = arith.addf %240, %241 : vector<1x128xf32>
    %243 = arith.negf %242 : vector<1x128xf32>
    %244 = math.exp %243 : vector<1x128xf32>
    %cst_151 = arith.constant 1.000000e+00 : f32
    %245 = vector.broadcast %cst_151 : f32 to vector<1x128xf32>
    %246 = arith.addf %245, %244 : vector<1x128xf32>
    %247 = arith.divf %245, %246 : vector<1x128xf32>
    %248 = vector.extract_strided_slice %230 {offsets = [0, 256], sizes = [1, 128], strides = [1, 1]} : vector<1x384xf32> to vector<1x128xf32>
    %249 = vector.extract_strided_slice %231 {offsets = [0, 256], sizes = [1, 128], strides = [1, 1]} : vector<1x384xf32> to vector<1x128xf32>
    %250 = arith.mulf %239, %249 : vector<1x128xf32>
    %251 = arith.addf %248, %250 : vector<1x128xf32>
    %252 = math.tanh %251 : vector<1x128xf32>
    %cst_152 = arith.constant 1.000000e+00 : f32
    %253 = vector.broadcast %cst_152 : f32 to vector<1x128xf32>
    %254 = arith.subf %253, %247 : vector<1x128xf32>
    %255 = arith.mulf %254, %252 : vector<1x128xf32>
    %256 = arith.truncf %225 : vector<1x128xf32> to vector<1x128xbf16>
    %c0_153 = arith.constant 0 : index
    %c0_154 = arith.constant 0 : index
    %257 = vector.load %arg13[%c0_153, %c0_154] : memref<128x384xbf16, #tpu.memory_space<vmem>>, vector<128x384xbf16>
    %cst_155 = arith.constant dense<0.000000e+00> : vector<1x384xf32>
    %258 = tpu.matmul %256, %257, %cst_155 {dimension_numbers = #tpu.dot_dimension_numbers<[1], [0], [0], [1], [0, 0, 1, 1], [], []>} : vector<1x128xbf16>, vector<128x384xbf16>, vector<1x384xf32> -> vector<1x384xf32>
    %c0_156 = arith.constant 0 : index
    %c0_157 = arith.constant 0 : index
    %259 = vector.load %arg15[%c0_156, %c0_157] : memref<1x384xf32, #tpu.memory_space<vmem>>, vector<1x384xf32>
    %260 = arith.addf %258, %259 : vector<1x384xf32>
    %261 = arith.truncf %255 : vector<1x128xf32> to vector<1x128xbf16>
    %c0_158 = arith.constant 0 : index
    %c0_159 = arith.constant 0 : index
    %262 = vector.load %arg14[%c0_158, %c0_159] : memref<128x384xbf16, #tpu.memory_space<vmem>>, vector<128x384xbf16>
    %cst_160 = arith.constant dense<0.000000e+00> : vector<1x384xf32>
    %263 = tpu.matmul %261, %262, %cst_160 {dimension_numbers = #tpu.dot_dimension_numbers<[1], [0], [0], [1], [0, 0, 1, 1], [], []>} : vector<1x128xbf16>, vector<128x384xbf16>, vector<1x384xf32> -> vector<1x384xf32>
    %c0_161 = arith.constant 0 : index
    %c0_162 = arith.constant 0 : index
    %264 = vector.load %arg16[%c0_161, %c0_162] : memref<1x384xf32, #tpu.memory_space<vmem>>, vector<1x384xf32>
    %265 = arith.addf %263, %264 : vector<1x384xf32>
    %266 = vector.extract_strided_slice %260 {offsets = [0, 0], sizes = [1, 128], strides = [1, 1]} : vector<1x384xf32> to vector<1x128xf32>
    %267 = vector.extract_strided_slice %265 {offsets = [0, 0], sizes = [1, 128], strides = [1, 1]} : vector<1x384xf32> to vector<1x128xf32>
    %268 = arith.addf %266, %267 : vector<1x128xf32>
    %269 = arith.negf %268 : vector<1x128xf32>
    %270 = math.exp %269 : vector<1x128xf32>
    %cst_163 = arith.constant 1.000000e+00 : f32
    %271 = vector.broadcast %cst_163 : f32 to vector<1x128xf32>
    %272 = arith.addf %271, %270 : vector<1x128xf32>
    %273 = arith.divf %271, %272 : vector<1x128xf32>
    %274 = vector.extract_strided_slice %260 {offsets = [0, 128], sizes = [1, 128], strides = [1, 1]} : vector<1x384xf32> to vector<1x128xf32>
    %275 = vector.extract_strided_slice %265 {offsets = [0, 128], sizes = [1, 128], strides = [1, 1]} : vector<1x384xf32> to vector<1x128xf32>
    %276 = arith.addf %274, %275 : vector<1x128xf32>
    %277 = arith.negf %276 : vector<1x128xf32>
    %278 = math.exp %277 : vector<1x128xf32>
    %cst_164 = arith.constant 1.000000e+00 : f32
    %279 = vector.broadcast %cst_164 : f32 to vector<1x128xf32>
    %280 = arith.addf %279, %278 : vector<1x128xf32>
    %281 = arith.divf %279, %280 : vector<1x128xf32>
    %282 = vector.extract_strided_slice %260 {offsets = [0, 256], sizes = [1, 128], strides = [1, 1]} : vector<1x384xf32> to vector<1x128xf32>
    %283 = vector.extract_strided_slice %265 {offsets = [0, 256], sizes = [1, 128], strides = [1, 1]} : vector<1x384xf32> to vector<1x128xf32>
    %284 = arith.mulf %273, %283 : vector<1x128xf32>
    %285 = arith.addf %282, %284 : vector<1x128xf32>
    %286 = math.tanh %285 : vector<1x128xf32>
    %cst_165 = arith.constant 1.000000e+00 : f32
    %287 = vector.broadcast %cst_165 : f32 to vector<1x128xf32>
    %288 = arith.subf %287, %281 : vector<1x128xf32>
    %289 = arith.mulf %288, %286 : vector<1x128xf32>
    %290 = arith.mulf %281, %255 : vector<1x128xf32>
    %291 = arith.addf %289, %290 : vector<1x128xf32>
    %292 = arith.truncf %291 : vector<1x128xf32> to vector<1x128xbf16>
    %c0_166 = arith.constant 0 : index
    %c0_167 = arith.constant 0 : index
    %293 = vector.load %arg17[%c0_166, %c0_167] : memref<128x64xbf16, #tpu.memory_space<vmem>>, vector<128x64xbf16>
    %cst_168 = arith.constant dense<0.000000e+00> : vector<1x64xf32>
    %294 = tpu.matmul %292, %293, %cst_168 {dimension_numbers = #tpu.dot_dimension_numbers<[1], [0], [0], [1], [0, 0, 1, 1], [], []>} : vector<1x128xbf16>, vector<128x64xbf16>, vector<1x64xf32> -> vector<1x64xf32>
    %c0_169 = arith.constant 0 : index
    %c0_170 = arith.constant 0 : index
    %295 = vector.load %arg18[%c0_169, %c0_170] : memref<1x64xf32, #tpu.memory_space<vmem>>, vector<1x64xf32>
    %296 = arith.addf %294, %295 : vector<1x64xf32>
    %cst_171 = arith.constant 0.000000e+00 : f32
    %297 = vector.broadcast %cst_171 : f32 to vector<1x64xf32>
    %298 = arith.maximumf %296, %297 : vector<1x64xf32>
    %299 = arith.truncf %298 : vector<1x64xf32> to vector<1x64xbf16>
    %c0_172 = arith.constant 0 : index
    %c0_173 = arith.constant 0 : index
    %300 = vector.load %arg19[%c0_172, %c0_173] : memref<64x5xbf16, #tpu.memory_space<vmem>>, vector<64x5xbf16>
    %cst_174 = arith.constant dense<0.000000e+00> : vector<1x5xf32>
    %301 = tpu.matmul %299, %300, %cst_174 {dimension_numbers = #tpu.dot_dimension_numbers<[1], [0], [0], [1], [0, 0, 1, 1], [], []>} : vector<1x64xbf16>, vector<64x5xbf16>, vector<1x5xf32> -> vector<1x5xf32>
    %c0_175 = arith.constant 0 : index
    %c0_176 = arith.constant 0 : index
    %302 = vector.load %arg20[%c0_175, %c0_176] : memref<1x5xf32, #tpu.memory_space<vmem>>, vector<1x5xf32>
    %303 = arith.addf %301, %302 : vector<1x5xf32>
    %c0_177 = arith.constant 0 : index
    %c0_178 = arith.constant 0 : index
    %304 = vector.load %arg21[%c0_177, %c0_178] : memref<1x5xf32, #tpu.memory_space<vmem>>, vector<1x5xf32>
    tpu.vector_store %arg21[%c0_177, %c0_178], %303 {strides = array<i32>} : memref<1x5xf32, #tpu.memory_space<vmem>>, vector<1x5xf32>,
    return
  }
}

</mosaic_0001>

<bundles_post_ra>
// kernel: forward.1
= control target key start
LH: loop header
LB: loop body
LE: loop exit
PB: predicated region body
PF: predicated region fallthrough
CT: control target
= control target key end

     0   :  { %s10290_s0 = inlined_call_operand.vmem [shape: f32[128,128], index: 0, kind: input, shape index: {}]   ;;  %s10291_s1 = inlined_call_operand.hbm [shape: bf16[1280,128], index: 1, kind: input, shape index: {}]   ;;  %s10292_s2 = inlined_call_operand.vmem [shape: f32[1,128], index: 2, kind: input, shape index: {}]   ;;  %s10293_s3 = inlined_call_operand.vmem [shape: bf16[640,128], index: 3, kind: input, shape index: {}]   ;;  %s10294_s4 = inlined_call_operand.hbm [shape: f32[1,128], index: 4, kind: input, shape index: {}]   ;;  %s10295_s5 = inlined_call_operand.hbm [shape: bf16[640,128], index: 5, kind: input, shape index: {}]   ;;  %s10296_s6 = inlined_call_operand.hbm [shape: f32[1,128], index: 6, kind: input, shape index: {}]   ;;  %s10297_s7 = inlined_call_operand.vmem [shape: bf16[384,128], index: 7, kind: input, shape index: {}]   ;;  %s10298_s8 = inlined_call_operand.hbm [shape: f32[1,128], index: 8, kind: input, shape index: {}]   ;;  %s10299_s9 = inlined_call_operand.hbm [shape: bf16[128,384], index: 9, kind: input, shape index: {}]   ;;  %s10300_s10 = inlined_call_operand.hbm [shape: bf16[128,384], index: 10, kind: input, shape index: {}]   ;;  %s10301_s11 = inlined_call_operand.hbm [shape: f32[1,384], index: 11, kind: input, shape index: {}]   ;;  %s10302_s12 = inlined_call_operand.hbm [shape: f32[1,384], index: 12, kind: input, shape index: {}]   ;;  %s10303_s13 = inlined_call_operand.hbm [shape: bf16[128,384], index: 13, kind: input, shape index: {}]   ;;  %s10304_s14 = inlined_call_operand.hbm [shape: bf16[128,384], index: 14, kind: input, shape index: {}]   ;;  %s10305_s15 = inlined_call_operand.hbm [shape: f32[1,384], index: 15, kind: input, shape index: {}]   ;;  %s10306_s16 = inlined_call_operand.hbm [shape: f32[1,384], index: 16, kind: input, shape index: {}]   ;;  %s10307_s17 = inlined_call_operand.vmem [shape: bf16[128,64], index: 17, kind: input, shape index: {}]   ;;  %s10308_s18 = inlined_call_operand.hbm [shape: f32[1,64], index: 18, kind: input, shape index: {}]   ;;  %s10309_s19 = inlined_call_operand.vmem [shape: bf16[64,5], index: 19, kind: input, shape index: {}]   ;;  %s10310_s20 = inlined_call_operand.hbm [shape: f32[1,5], index: 20, kind: input, shape index: {}]   ;;  %s10311_s21 = inlined_call_operand.hbm [shape: f32[1,5], index: 21, kind: output, shape index: {}]  }
   0x1   :  { %10315 = sst [smem:[#allocation39_spill]] %s10290_s0 }
   0x2   :  { %10316 = sst [smem:[#allocation40_spill]] %s10291_s1 }
   0x3   :  { %10317 = sst [smem:[#allocation41_spill]] %s10292_s2 }
   0x4   :  { %10318 = sst [smem:[#allocation42_spill]] %s10293_s3 }
   0x5   :  { %10319 = sst [smem:[#allocation43_spill]] %s10294_s4 }
   0x6   :  { %10320 = sst [smem:[#allocation44_spill]] %s10295_s5 }
   0x7   :  { %26 = vsyncpa [#allocation6], 0 }
   0x8   :  { %27 = vsyncpa [#allocation9], 0 }
   0x9   :  { %28 = vsyncpa [#allocation12], 0 }
   0xa   :  { %29 = vsyncpa [#allocation15], 0 }
   0xb   :  { %30 = vsyncpa [#allocation18], 0 }
   0xc   :  { %31 = vsyncpa [#allocation21], 0 }
   0xd   :  { %32 = vsyncpa [#allocation24], 0 }
   0xe   :  { %33 = vsyncpa [#allocation27], 0  ;;  %s10321_s26 = sld [smem:[#allocation43_spill]] }
  0x14   :  { %s59_s27 = sshll.u32 %s10321_s26, 4  ;;  %s60_s27 = int_to_ptr.hbm [resolvable:$true] %s59_s27 }
  0x15   :  { %34 = vsyncpa [#allocation7], 0  ;;  %s9134_s3 = smov [#allocation8]   ;;  %s83_s4 = sshll.u32 %s10296_s6, 4  ;;  %s84_s4 = int_to_ptr.hbm [resolvable:$true] %s83_s4 }
  0x16   :  { %s61_s28 = sshll.u32 %s9134_s3, 4  ;;  %s9135_s30 = smov [#allocation11]   ;;  %s62_s28 = int_to_ptr.vmem [resolvable:$true] %s61_s28 }
  0x17   :  { %64 = dma.hbm_to_vmem [thread:$0]  %s60_s27, 16, %s62_s28, [#allocation9]  }
  0x18   :  { %s85_s5 = sshll.u32 %s9135_s30, 4  ;;  %s106_s1 = sshll.u32 %s10299_s9, 4  ;;  %s86_s5 = int_to_ptr.vmem [resolvable:$true] %s85_s5  ;;  %s107_s1 = int_to_ptr.hbm [resolvable:$true] %s106_s1 }
  0x19   :  { %88 = dma.hbm_to_vmem [thread:$0]  %s84_s4, 16, %s86_s5, [#allocation12]  }
  0x1a   :  { %s9136_s24 = smov [#allocation14]   ;;  %s133_s3 = sshll.u32 %s10301_s11, 4  ;;  %s134_s3 = int_to_ptr.hbm [resolvable:$true] %s133_s3 }
  0x1b   :  { %s108_s2 = sshll.u32 %s9136_s24, 4  ;;  %s9137_s29 = smov 192   ;;  %s109_s2 = int_to_ptr.vmem [resolvable:$true] %s108_s2 }
  0x1c   :  { %s9138_s6 = smov 12   ;;  %s9139_s27 = smov [#allocation17]  }
  0x1d   :  { %114 = dma.hbm_to_vmem [thread:$0]  %s107_s1, 3072, %s109_s2, [#allocation15], %s9137_s29, %s9137_s29, %s9138_s6  }
  0x1e   :  { %s135_s28 = sshll.u32 %s9139_s27, 4  ;;  %s154_s4 = sshll.u32 %s10303_s13, 4  ;;  %s136_s28 = int_to_ptr.vmem [resolvable:$true] %s135_s28  ;;  %s155_s4 = int_to_ptr.hbm [resolvable:$true] %s154_s4 }
  0x1f   :  { %138 = dma.hbm_to_vmem [thread:$0]  %s134_s3, 48, %s136_s28, [#allocation18]  }
  0x20   :  { %s181_s11 = sshll.u32 %s10305_s15, 4  ;;  %s9140_s22 = smov [#allocation20]   ;;  %s182_s11 = int_to_ptr.hbm [resolvable:$true] %s181_s11 }
  0x21   :  { %s156_s23 = sshll.u32 %s9140_s22, 4  ;;  %s9141_s1 = smov [#allocation23]   ;;  %s157_s23 = int_to_ptr.vmem [resolvable:$true] %s156_s23 }
  0x22   :  { %162 = dma.hbm_to_vmem [thread:$0]  %s155_s4, 3072, %s157_s23, [#allocation21], %s9137_s29, %s9137_s29, %s9138_s6  }
  0x23   :  { %s183_s24 = sshll.u32 %s9141_s1, 4  ;;  %s205_s13 = sshll.u32 %s10308_s18, 4  ;;  %s184_s24 = int_to_ptr.vmem [resolvable:$true] %s183_s24  ;;  %s206_s13 = int_to_ptr.hbm [resolvable:$true] %s205_s13 }
  0x24   :  { %186 = dma.hbm_to_vmem [thread:$0]  %s182_s11, 48, %s184_s24, [#allocation24]  }
  0x25   :  { %s10322_s15 = sld [smem:[#allocation40_spill]]  ;;  %s9142_s28 = smov [#allocation26]  }
  0x26   :  { %s207_s9 = sshll.u32 %s9142_s28, 4  ;;  %s9143_s0 = smov [#allocation5]   ;;  %s208_s9 = int_to_ptr.vmem [resolvable:$true] %s207_s9 }
  0x27   :  { %210 = dma.hbm_to_vmem [thread:$0]  %s206_s13, 16, %s208_s9, [#allocation27]  }
  0x28   :  { %s43_s4 = sshll.u32 %s9143_s0, 4  ;;  %s9144_s30 = smov 64   ;;  %s44_s4 = int_to_ptr.vmem [resolvable:$true] %s43_s4 }
  0x29   :  { %s9145_s5 = smov 4   ;;  %s10323_s23 = sld [smem:[#allocation44_spill]] }
  0x2a   :  { %s9146_s11 = smov [#allocation10]   ;;  %s96_s26 = sshll.u32 %s10298_s8, 4  ;;  %s97_s26 = int_to_ptr.hbm [resolvable:$true] %s96_s26 }
  0x2b   :  { %s41_s27 = sshll.u32 %s10322_s15, 4  ;;  %s71_s24 = sshll.u32 %s9146_s11, 4  ;;  %s42_s27 = int_to_ptr.hbm [resolvable:$true] %s41_s27  ;;  %s72_s24 = int_to_ptr.vmem [resolvable:$true] %s71_s24 }
  0x2c   :  { %49 = dma.hbm_to_vmem [thread:$0]  %s42_s27, 10240, %s44_s4, [#allocation6], %s9144_s30, %s9144_s30, %s9145_s5  }
  0x2d   :  { %s9147_s13 = smov [#allocation13]   ;;  %s119_s27 = sshll.u32 %s10300_s10, 4  ;;  %s120_s27 = int_to_ptr.hbm [resolvable:$true] %s119_s27 }
  0x2e   :  { %s98_s3 = sshll.u32 %s9147_s13, 4  ;;  %s144_s4 = sshll.u32 %s10302_s12, 4  ;;  %s99_s3 = int_to_ptr.vmem [resolvable:$true] %s98_s3  ;;  %s145_s4 = int_to_ptr.hbm [resolvable:$true] %s144_s4 }
  0x2f   :  { %s69_s1 = sshll.u32 %s10323_s23, 4  ;;  %s9148_s22 = smov [#allocation16]   ;;  %s70_s1 = int_to_ptr.hbm [resolvable:$true] %s69_s1 }
  0x30   :  { %77 = dma.hbm_to_vmem [thread:$0]  %s70_s1, 5120, %s72_s24, [#allocation9], %s9144_s30, %s9144_s30, %s9145_s5  }
  0x31   :  { %101 = dma.hbm_to_vmem [thread:$0]  %s97_s26, 16, %s99_s3, [#allocation12]  }
  0x32   :  { %s121_s18 = sshll.u32 %s9148_s22, 4  ;;  %s9149_s8 = smov [#allocation19]   ;;  %s122_s18 = int_to_ptr.vmem [resolvable:$true] %s121_s18 }
  0x33   :  { %127 = dma.hbm_to_vmem [thread:$0]  %s120_s27, 3072, %s122_s18, [#allocation15], %s9137_s29, %s9137_s29, %s9138_s6  }
  0x34   :  { %s146_s30 = sshll.u32 %s9149_s8, 4  ;;  %s167_s10 = sshll.u32 %s10304_s14, 4  ;;  %s147_s30 = int_to_ptr.vmem [resolvable:$true] %s146_s30  ;;  %s168_s10 = int_to_ptr.hbm [resolvable:$true] %s167_s10 }
  0x35   :  { %149 = dma.hbm_to_vmem [thread:$0]  %s145_s4, 48, %s147_s30, [#allocation18]  }
  0x36   :  { %s192_s12 = sshll.u32 %s10306_s16, 4  ;;  %s9150_s24 = smov [#allocation22]   ;;  %s193_s12 = int_to_ptr.hbm [resolvable:$true] %s192_s12 }
  0x37   :  { %s169_s2 = sshll.u32 %s9150_s24, 4  ;;  %s9151_s25 = smov [#allocation25]   ;;  %s170_s2 = int_to_ptr.vmem [resolvable:$true] %s169_s2 }
  0x38   :  { %175 = dma.hbm_to_vmem [thread:$0]  %s168_s10, 3072, %s170_s2, [#allocation21], %s9137_s29, %s9137_s29, %s9138_s6  }
  0x39   :  { %s194_s26 = sshll.u32 %s9151_s25, 4  ;;  %s218_s14 = sshll.u32 %s10310_s20, 4  ;;  %s195_s26 = int_to_ptr.vmem [resolvable:$true] %s194_s26  ;;  %s219_s14 = int_to_ptr.hbm [resolvable:$true] %s218_s14 }
  0x3a   :  { %197 = dma.hbm_to_vmem [thread:$0]  %s193_s12, 48, %s195_s26, [#allocation24]  }
  0x3b   :  { %s9152_s15 = smov [#allocation28]  }
  0x3c   :  { %s220_s28 = sshll.u32 %s9152_s15, 4  ;;  %s221_s28 = int_to_ptr.vmem [resolvable:$true] %s220_s28 }
  0x3d   :  { %223 = dma.hbm_to_vmem [thread:$0]  %s219_s14, 16, %s221_s28, [#allocation27]  }
  0x3e   :  { %9116 = dma.done.wait [#allocation6], 10240  }
  0x3f   :  { %9117 = vsyncadd [#allocation6], 4294957056 }
  0x40   :  { %9118 = dma.done.wait [#allocation9], 5136  }
  0x41   :  { %9119 = vsyncadd [#allocation9], 4294962160 }
  0x42   :  { %9120 = dma.done.wait [#allocation12], 32  }
  0x43   :  { %9121 = vsyncadd [#allocation12], 4294967264 }
  0x44   :  { %9122 = dma.done.wait [#allocation15], 6144  }
  0x45   :  { %9123 = vsyncadd [#allocation15], 4294961152 }
  0x46   :  { %9124 = dma.done.wait [#allocation18], 96  }
  0x47   :  { %9125 = vsyncadd [#allocation18], 4294967200 }
  0x48   :  { %9126 = dma.done.wait [#allocation21], 6144  }
  0x49   :  { %9127 = vsyncadd [#allocation21], 4294961152 }
  0x4a   :  { %9128 = dma.done.wait [#allocation24], 96  }
  0x4b   :  { %9129 = vsyncadd [#allocation24], 4294967200 }
  0x4c   :  { %9130 = dma.done.wait [#allocation27], 32  }
  0x4d   :  { %9131 = vsyncadd [#allocation27], 4294967264  ;;  %v8172_v0 = vld [vmem:[#allocation5 + $0x38] sm:$0xff]  ;;  %v8171_v4 = vld [vmem:[#allocation5 + $0x30] sm:$0xff]  ;;  %s10324_s29 = sld [smem:[#allocation39_spill]]  ;;  %s9153_s11 = smov [#allocation29]  }
  0x4e   :  { %v8180_v1 = vld [vmem:[#allocation5 + $0x78] sm:$0xff]  ;;  %1168 = vmatpush.bf16.msra.mxu0 %v8172_v0  ;;  %v8179_v5 = vld [vmem:[#allocation5 + $0x70] sm:$0xff]  ;;  %v8170_v8 = vld [vmem:[#allocation5 + $0x28] sm:$0xff]  ;;  %s10325_s9 = sld [smem:[#allocation42_spill]]  ;;  %s6058_s12 = sshll.u32 %s9153_s11, 4  ;;  %s6059_s12 = int_to_ptr.vmem [resolvable:$true] %s6058_s12 }
  0x4f   :  { %v8188_v2 = vld [vmem:[#allocation5 + $0xb8] sm:$0xff]  ;;  %1187 = vmatpush.bf16.msra.mxu1 %v8180_v1  ;;  %v8187_v6 = vld [vmem:[#allocation5 + $0xb0] sm:$0xff]  ;;  %v8178_v9 = vld [vmem:[#allocation5 + $0x68] sm:$0xff]  ;;  %s10326_s10 = sld [smem:[#allocation41_spill]]  ;;  %s6060_s25 = sshll.u32 %s10311_s21, 4  ;;  %s6061_s25 = int_to_ptr.hbm [resolvable:$true] %s6060_s25 }
  0x50   :  { %v8196_v3 = vld [vmem:[#allocation5 + $0xf8] sm:$0xff]  ;;  %1206 = vmatpush.bf16.msra.mxu2 %v8188_v2  ;;  %v8195_v7 = vld [vmem:[#allocation5 + $0xf0] sm:$0xff]  ;;  %v8186_v10 = vld [vmem:[#allocation5 + $0xa8] sm:$0xff] }
  0x51   :  { %1225 = vmatpush.bf16.msra.mxu3 %v8196_v3  ;;  %v8194_v11 = vld [vmem:[#allocation5 + $0xe8] sm:$0xff]  ;;  %v8169_v12 = vld [vmem:[#allocation5 + $0x20] sm:$0xff]  ;;  %v8168_v16 = vld [vmem:[#allocation5 + $0x18] sm:$0xff] }
  0x52   :  { %1169 = vmatpush.bf16.msra.mxu0 %v8171_v4  ;;  %v8177_v13 = vld [vmem:[#allocation5 + $0x60] sm:$0xff]  ;;  %v8176_v17 = vld [vmem:[#allocation5 + $0x58] sm:$0xff]  ;;  %v8167_v20 = vld [vmem:[#allocation5 + $0x10] sm:$0xff] }
  0x53   :  { %1188 = vmatpush.bf16.msra.mxu1 %v8179_v5  ;;  %v8185_v14 = vld [vmem:[#allocation5 + $0xa0] sm:$0xff]  ;;  %v8184_v18 = vld [vmem:[#allocation5 + $0x98] sm:$0xff]  ;;  %v8175_v21 = vld [vmem:[#allocation5 + $0x50] sm:$0xff] }
  0x54   :  { %1207 = vmatpush.bf16.msra.mxu2 %v8187_v6  ;;  %v8193_v15 = vld [vmem:[#allocation5 + $0xe0] sm:$0xff]  ;;  %v8192_v19 = vld [vmem:[#allocation5 + $0xd8] sm:$0xff]  ;;  %v8183_v22 = vld [vmem:[#allocation5 + $0x90] sm:$0xff] }
  0x55   :  { %1226 = vmatpush.bf16.msra.mxu3 %v8195_v7  ;;  %v8191_v23 = vld [vmem:[#allocation5 + $0xd0] sm:$0xff]  ;;  %v6077_v25 = vld [vmem:[%s10324_s29 + $0x10] ss:$2 sm:$0xff]  ;;  %v6081_v27 = vld [vmem:[%s10324_s29 + $0x11] ss:$2 sm:$0xff] }
  0x56   :  { %1170 = vmatpush.bf16.msra.mxu0 %v8170_v8  ;;  %v285_v24 = vld [vmem:[%s10324_s29] ss:$2 sm:$0xff]  ;;  %v6080_v26 = vld [vmem:[%s10324_s29 + $0x1] ss:$2 sm:$0xff]  ;;  %v293_v33 = vpack.c.bf16 %v6077_v25, %v6077_v25  ;;  %v305_v35 = vpack.c.bf16 %v6081_v27, %v6081_v27  ;;  %v8166_v37 = vld [vmem:[#allocation5 + $0x8] sm:$0xff] }
  0x57   :  { %1189 = vmatpush.bf16.msra.mxu1 %v8178_v9  ;;  %v6084_v28 = vld [vmem:[%s10324_s29 + $0x2] ss:$2 sm:$0xff]  ;;  %v6085_v29 = vld [vmem:[%s10324_s29 + $0x12] ss:$2 sm:$0xff]  ;;  %v6088_v30 = vld [vmem:[%s10324_s29 + $0x3] ss:$2 sm:$0xff]  ;;  %v292_v32 = vpack.c.bf16 %v285_v24, %v285_v24  ;;  %v304_v34 = vpack.c.bf16 %v6080_v26, %v6080_v26 }
  0x58   :  { %1208 = vmatpush.bf16.msra.mxu2 %v8186_v10  ;;  %v6089_v31 = vld [vmem:[%s10324_s29 + $0x13] ss:$2 sm:$0xff]  ;;  %v316_v36 = vpack.c.bf16 %v6084_v28, %v6084_v28  ;;  %v317_v39 = vpack.c.bf16 %v6085_v29, %v6085_v29  ;;  %v328_v40 = vpack.c.bf16 %v6088_v30, %v6088_v30  ;;  %v409_v47 = vunpack.c.l.b16 %v293_v33  ;;  %v8204_v56 = vld [vmem:[#allocation5 + $0x138] sm:$0xff]  ;;  %v6079_v3 = vld [vmem:[%s10324_s29 + $0x30] ss:$2 sm:$0xf] }
  0x59   :  { %1227 = vmatpush.bf16.msra.mxu3 %v8194_v11  ;;  %v8174_v38 = vld [vmem:[#allocation5 + $0x48] sm:$0xff]  ;;  %v329_v41 = vpack.c.bf16 %v6089_v31, %v6089_v31  ;;  %v8165_v44 = vld [vmem:[#allocation5] sm:$0xff]  ;;  %v408_v46 = vunpack.c.l.b16 %v292_v32  ;;  %v420_v48 = vunpack.c.l.b16 %v304_v34  ;;  %v421_v49 = vunpack.c.l.b16 %v305_v35  ;;  %v8212_v57 = vld [vmem:[#allocation5 + $0x178] sm:$0xff] }
  0x5a   :  { %1171 = vmatpush.bf16.msra.mxu0 %v8169_v12  ;;  %v8182_v42 = vld [vmem:[#allocation5 + $0x88] sm:$0xff]  ;;  %v8173_v45 = vld [vmem:[#allocation5 + $0x40] sm:$0xff]  ;;  %v432_v50 = vunpack.c.l.b16 %v316_v36  ;;  %v433_v51 = vunpack.c.l.b16 %v317_v39  ;;  %v444_v52 = vunpack.c.l.b16 %v328_v40  ;;  %v8220_v62 = vld [vmem:[#allocation5 + $0x1b8] sm:$0xff] }
  0x5b   :  { %1190 = vmatpush.bf16.msra.mxu1 %v8177_v13  ;;  %v8190_v43 = vld [vmem:[#allocation5 + $0xc8] sm:$0xff]  ;;  %v445_v53 = vunpack.c.l.b16 %v329_v41  ;;  %v8181_v54 = vld [vmem:[#allocation5 + $0x80] sm:$0xff]  ;;  %v412_v58 = vpack.c.b16 %v409_v47, %v408_v46  ;;  %v424_v59 = vpack.c.b16 %v421_v49, %v420_v48  ;;  %v8228_v63 = vld [vmem:[#allocation5 + $0x1f8] sm:$0xff] }
  0x5c   :  { %1209 = vmatpush.bf16.msra.mxu2 %v8185_v14  ;;  %v8189_v55 = vld [vmem:[#allocation5 + $0xc0] sm:$0xff]  ;;  %v436_v60 = vpack.c.b16 %v433_v51, %v432_v50  ;;  %v8203_v0 = vld [vmem:[#allocation5 + $0x130] sm:$0xff]  ;;  %v8202_v12 = vld [vmem:[#allocation5 + $0x128] sm:$0xff] }
  0x5d   :  { %1228 = vmatpush.bf16.msra.mxu3 %v8193_v15  ;;  %v448_v61 = vpack.c.b16 %v445_v53, %v444_v52  ;;  %v8211_v1 = vld [vmem:[#allocation5 + $0x170] sm:$0xff]  ;;  %v6083_v5 = vld [vmem:[%s10324_s29 + $0x31] ss:$2 sm:$0xf]  ;;  %v8210_v13 = vld [vmem:[#allocation5 + $0x168] sm:$0xff]  ;;  %v295_v15 = vpack.c.bf16 %v6079_v3, %v6079_v3 }
  0x5e   :  { %1172 = vmatpush.bf16.msra.mxu0 %v8168_v16  ;;  %v6078_v2 = vld [vmem:[%s10324_s29 + $0x20] ss:$2 sm:$0xff]  ;;  %v6082_v4 = vld [vmem:[%s10324_s29 + $0x21] ss:$2 sm:$0xff]  ;;  %v8201_v24 = vld [vmem:[#allocation5 + $0x120] sm:$0xff] }
  0x5f   :  { %1191 = vmatpush.bf16.msra.mxu1 %v8176_v17  ;;  %v8219_v6 = vld [vmem:[#allocation5 + $0x1b0] sm:$0xff]  ;;  %v6087_v8 = vld [vmem:[%s10324_s29 + $0x32] ss:$2 sm:$0xf]  ;;  %v294_v14 = vpack.c.bf16 %v6078_v2, %v6078_v2  ;;  %v306_v16 = vpack.c.bf16 %v6082_v4, %v6082_v4  ;;  %v307_v17 = vpack.c.bf16 %v6083_v5, %v6083_v5  ;;  %v411_v27 = vunpack.c.l.b16 %v295_v15  ;;  %v8200_v36 = vld [vmem:[#allocation5 + $0x118] sm:$0xff] }
  0x60   :  { %1210 = vmatpush.bf16.msra.mxu2 %v8184_v18  ;;  %v6086_v7 = vld [vmem:[%s10324_s29 + $0x22] ss:$2 sm:$0xff]  ;;  %v6090_v10 = vld [vmem:[%s10324_s29 + $0x23] ss:$2 sm:$0xff]  ;;  %v8214_v2 = vld [vmem:[#allocation5 + $0x188] sm:$0xff] }
  0x61   :  { %1229 = vmatpush.bf16.msra.mxu3 %v8192_v19  ;;  %v8227_v9 = vld [vmem:[#allocation5 + $0x1f0] sm:$0xff]  ;;  %v6091_v11 = vld [vmem:[%s10324_s29 + $0x33] ss:$2 sm:$0xf]  ;;  %v318_v18 = vpack.c.bf16 %v6086_v7, %v6086_v7  ;;  %v319_v19 = vpack.c.bf16 %v6087_v8, %v6087_v8  ;;  %v410_v26 = vunpack.c.l.b16 %v294_v14  ;;  %v422_v28 = vunpack.c.l.b16 %v306_v16 }
  0x62   :  { %1173 = vmatpush.bf16.msra.mxu0 %v8167_v20  ;;  %v330_v20 = vpack.c.bf16 %v6090_v10, %v6090_v10  ;;  %v8209_v25 = vld [vmem:[#allocation5 + $0x160] sm:$0xff]  ;;  %v423_v29 = vunpack.c.l.b16 %v307_v17  ;;  %v8215_v46 = vld [vmem:[#allocation5 + $0x190] sm:$0xff]  ;;  %v8222_v3 = vld [vmem:[#allocation5 + $0x1c8] sm:$0xff] }
  0x63   :  { %1192 = vmatpush.bf16.msra.mxu1 %v8175_v21  ;;  %v331_v21 = vpack.c.bf16 %v6091_v11, %v6091_v11  ;;  %v434_v30 = vunpack.c.l.b16 %v318_v18  ;;  %v435_v31 = vunpack.c.l.b16 %v319_v19  ;;  %v8217_v34 = vld [vmem:[#allocation5 + $0x1a0] sm:$0xff]  ;;  %v8223_v47 = vld [vmem:[#allocation5 + $0x1d0] sm:$0xff]  ;;  %v8236_v10 = vld [vmem:[#allocation5 + $0x238] sm:$0xff] }
  0x64   :  { %1211 = vmatpush.bf16.msra.mxu2 %v8183_v22  ;;  %v8218_v22 = vld [vmem:[#allocation5 + $0x1a8] sm:$0xff]  ;;  %v446_v32 = vunpack.c.l.b16 %v330_v20  ;;  %v8225_v35 = vld [vmem:[#allocation5 + $0x1e0] sm:$0xff]  ;;  %v425_v39 = vpack.c.b16 %v423_v29, %v422_v28  ;;  %v8244_v11 = vld [vmem:[#allocation5 + $0x278] sm:$0xff] }
  0x65   :  { %1230 = vmatpush.bf16.msra.mxu3 %v8191_v23  ;;  %v8226_v23 = vld [vmem:[#allocation5 + $0x1e8] sm:$0xff]  ;;  %v447_v33 = vunpack.c.l.b16 %v331_v21  ;;  %v437_v40 = vpack.c.b16 %v435_v31, %v434_v30  ;;  %v6092_v48 = vld [vmem:[%s10324_s29 + $0x4] ss:$2 sm:$0xff]  ;;  %v6096_v50 = vld [vmem:[%s10324_s29 + $0x5] ss:$2 sm:$0xff] }
  0x66   :  { %1174 = vmatpush.bf16.msra.mxu0 %v8166_v37  ;;  %v8208_v37 = vld [vmem:[#allocation5 + $0x158] sm:$0xff]  ;;  %v6093_v49 = vld [vmem:[%s10324_s29 + $0x14] ss:$2 sm:$0xff]  ;;  %v6097_v51 = vld [vmem:[%s10324_s29 + $0x15] ss:$2 sm:$0xff] }
  0x67   :  { %1193 = vmatpush.bf16.msra.mxu1 %v8174_v38  ;;  %v413_v38 = vpack.c.b16 %v411_v27, %v410_v26  ;;  %v449_v41 = vpack.c.b16 %v447_v33, %v446_v32  ;;  %v6100_v52 = vld [vmem:[%s10324_s29 + $0x6] ss:$2 sm:$0xff]  ;;  %v6101_v53 = vld [vmem:[%s10324_s29 + $0x16] ss:$2 sm:$0xff]  ;;  %v6098_v26 = vld [vmem:[%s10324_s29 + $0x25] ss:$2 sm:$0xff] }
  0x68   :  { %1212 = vmatpush.bf16.msra.mxu2 %v8182_v42  ;;  %v8216_v42 = vld [vmem:[#allocation5 + $0x198] sm:$0xff]  ;;  %v8197_v4 = vld [vmem:[#allocation5 + $0x100] sm:$0xff]  ;;  %v8234_v28 = vld [vmem:[#allocation5 + $0x228] sm:$0xff] }
  0x69   :  { %1231 = vmatpush.bf16.msra.mxu3 %v8190_v43  ;;  %v8224_v43 = vld [vmem:[#allocation5 + $0x1d8] sm:$0xff]  ;;  %v8205_v5 = vld [vmem:[#allocation5 + $0x140] sm:$0xff]  ;;  %v8242_v31 = vld [vmem:[#allocation5 + $0x268] sm:$0xff] }
  0x6a   :  { %1175 = vmatpush.bf16.msra.mxu0 %v8165_v44  ;;  %v8199_v44 = vld [vmem:[#allocation5 + $0x110] sm:$0xff]  ;;  %v8213_v16 = vld [vmem:[#allocation5 + $0x180] sm:$0xff] }
  0x6b   :  { %1194 = vmatpush.bf16.msra.mxu1 %v8173_v45  ;;  %v8207_v45 = vld [vmem:[#allocation5 + $0x150] sm:$0xff]  ;;  %v8221_v17 = vld [vmem:[#allocation5 + $0x1c0] sm:$0xff] }
  0x6c   :  { %1213 = vmatpush.bf16.msra.mxu2 %v8181_v54  ;;  %v6104_v54 = vld [vmem:[%s10324_s29 + $0x7] ss:$2 sm:$0xff]  ;;  %v6102_v29 = vld [vmem:[%s10324_s29 + $0x26] ss:$2 sm:$0xff] }
  0x6d   :  { %1232 = vmatpush.bf16.msra.mxu3 %v8189_v55  ;;  %1176 = vmatmul.bf16.vlgmr.msra.gmra.mxu0 %v412_v58  ;;  %v6105_v55 = vld [vmem:[%s10324_s29 + $0x17] ss:$2 sm:$0xff]  ;;  %v340_v58 = vpack.c.bf16 %v6092_v48, %v6092_v48  ;;  %v6103_v30 = vld [vmem:[%s10324_s29 + $0x36] ss:$2 sm:$0xf] }
  0x6e   :  { %1244 = vmatpush.bf16.msrb.mxu0 %v8204_v56  ;;  %1195 = vmatmul.bf16.vlgmr.msra.gmra.mxu1 %v424_v59  ;;  %v8198_v56 = vld [vmem:[#allocation5 + $0x108] sm:$0xff]  ;;  %v341_v59 = vpack.c.bf16 %v6093_v49, %v6093_v49  ;;  %v6106_v32 = vld [vmem:[%s10324_s29 + $0x27] ss:$2 sm:$0xff] }
  0x6f   :  { %1263 = vmatpush.bf16.msrb.mxu1 %v8212_v57  ;;  %1214 = vmatmul.bf16.vlgmr.msra.gmra.mxu2 %v436_v60  ;;  %v8206_v57 = vld [vmem:[#allocation5 + $0x148] sm:$0xff]  ;;  %v352_v60 = vpack.c.bf16 %v6096_v50, %v6096_v50 }
  0x70   :  { %1233 = vmatmul.bf16.vlgmr.msra.gmra.mxu3 %v448_v61  ;;  %1282 = vmatpush.bf16.msrb.mxu2 %v8220_v62  ;;  %v353_v61 = vpack.c.bf16 %v6097_v51, %v6097_v51  ;;  %v364_v62 = vpack.c.bf16 %v6100_v52, %v6100_v52  ;;  %v457_v7 = vunpack.c.l.b16 %v341_v59  ;;  %v6099_v27 = vld [vmem:[%s10324_s29 + $0x35] ss:$2 sm:$0xf]  ;;  %v8232_v52 = vld [vmem:[#allocation5 + $0x218] sm:$0xff]  ;;  %v8239_v59 = vld [vmem:[#allocation5 + $0x250] sm:$0xff] }
  0x71   :  { %1301 = vmatpush.bf16.msrb.mxu3 %v8228_v63  ;;  %v365_v63 = vpack.c.bf16 %v6101_v53, %v6101_v53  ;;  %v468_v8 = vunpack.c.l.b16 %v352_v60  ;;  %v6107_v33 = vld [vmem:[%s10324_s29 + $0x37] ss:$2 sm:$0xf]  ;;  %v8240_v53 = vld [vmem:[#allocation5 + $0x258] sm:$0xff] }
  0x72   :  { %1245 = vmatpush.bf16.msrb.mxu0 %v8203_v0  ;;  %v376_v0 = vpack.c.bf16 %v6104_v54, %v6104_v54  ;;  %v6108_v60 = vld [vmem:[%s10324_s29 + $0x8] ss:$2 sm:$0xff] }
  0x73   :  { %1264 = vmatpush.bf16.msrb.mxu1 %v8211_v1  ;;  %v377_v1 = vpack.c.bf16 %v6105_v55, %v6105_v55 }
  0x74   :  { %1283 = vmatpush.bf16.msrb.mxu2 %v8219_v6  ;;  %v456_v6 = vunpack.c.l.b16 %v340_v58  ;;  %v492_v14 = vunpack.c.l.b16 %v376_v0  ;;  %v8231_v58 = vld [vmem:[#allocation5 + $0x210] sm:$0xff]  ;;  %v8230_v0 = vld [vmem:[#allocation5 + $0x208] sm:$0xff] }
  0x75   :  { %1302 = vmatpush.bf16.msrb.mxu3 %v8227_v9  ;;  %v469_v9 = vunpack.c.l.b16 %v353_v61  ;;  %v493_v15 = vunpack.c.l.b16 %v377_v1  ;;  %v6109_v61 = vld [vmem:[%s10324_s29 + $0x18] ss:$2 sm:$0xff] }
  0x76   :  { %1246 = vmatpush.bf16.msrb.mxu0 %v8202_v12  ;;  %v480_v12 = vunpack.c.l.b16 %v364_v62  ;;  %v460_v18 = vpack.c.b16 %v457_v7, %v456_v6  ;;  %v6112_v62 = vld [vmem:[%s10324_s29 + $0x9] ss:$2 sm:$0xff]  ;;  %v8238_v1 = vld [vmem:[#allocation5 + $0x248] sm:$0xff] }
  0x77   :  { %1265 = vmatpush.bf16.msrb.mxu1 %v8210_v13  ;;  %v481_v13 = vunpack.c.l.b16 %v365_v63  ;;  %v472_v19 = vpack.c.b16 %v469_v9, %v468_v8  ;;  %v496_v21 = vpack.c.b16 %v493_v15, %v492_v14  ;;  %v6113_v63 = vld [vmem:[%s10324_s29 + $0x19] ss:$2 sm:$0xff]  ;;  %v8229_v6 = vld [vmem:[#allocation5 + $0x200] sm:$0xff]  ;;  %v6111_v15 = vld [vmem:[%s10324_s29 + $0x38] ss:$2 sm:$0xf] }
  0x78   :  { %1284 = vmatpush.bf16.msrb.mxu2 %v8218_v22  ;;  %v8235_v22 = vld [vmem:[#allocation5 + $0x230] sm:$0xff]  ;;  %v8237_v7 = vld [vmem:[#allocation5 + $0x240] sm:$0xff] }
  0x79   :  { %1303 = vmatpush.bf16.msrb.mxu3 %v8226_v23  ;;  %v484_v20 = vpack.c.b16 %v481_v13, %v480_v12  ;;  %v8243_v23 = vld [vmem:[#allocation5 + $0x270] sm:$0xff]  ;;  %v6110_v14 = vld [vmem:[%s10324_s29 + $0x28] ss:$2 sm:$0xff] }
  0x7a   :  { %1247 = vmatpush.bf16.msrb.mxu0 %v8201_v24  ;;  %v6094_v24 = vld [vmem:[%s10324_s29 + $0x24] ss:$2 sm:$0xff] }
  0x7b   :  { %1266 = vmatpush.bf16.msrb.mxu1 %v8209_v25  ;;  %v6095_v25 = vld [vmem:[%s10324_s29 + $0x34] ss:$2 sm:$0xf] }
  0x7c   :  { %1285 = vmatpush.bf16.msrb.mxu2 %v8217_v34  ;;  %v342_v34 = vpack.c.bf16 %v6094_v24, %v6094_v24 }
  0x7d   :  { %1304 = vmatpush.bf16.msrb.mxu3 %v8225_v35  ;;  %1181 = vmatmul.bf16.gmra.mxu0 %v413_v38  ;;  %v343_v35 = vpack.c.bf16 %v6095_v25, %v6095_v25  ;;  %v366_v38 = vpack.c.bf16 %v6102_v29, %v6102_v29 }
  0x7e   :  { %1248 = vmatpush.bf16.msrb.mxu0 %v8200_v36  ;;  %1200 = vmatmul.bf16.gmra.mxu1 %v425_v39  ;;  %v354_v36 = vpack.c.bf16 %v6098_v26, %v6098_v26  ;;  %v367_v39 = vpack.c.bf16 %v6103_v30, %v6103_v30 }
  0x7f   :  { %1267 = vmatpush.bf16.msrb.mxu1 %v8208_v37  ;;  %1219 = vmatmul.bf16.gmra.mxu2 %v437_v40  ;;  %v355_v37 = vpack.c.bf16 %v6099_v27, %v6099_v27  ;;  %v378_v40 = vpack.c.bf16 %v6106_v32, %v6106_v32  ;;  %v482_v48 = vunpack.c.l.b16 %v366_v38 }
  0x80   :  { %1238 = vmatmul.bf16.gmra.mxu3 %v449_v41  ;;  %1286 = vmatpush.bf16.msrb.mxu2 %v8216_v42  ;;  %v379_v41 = vpack.c.bf16 %v6107_v33, %v6107_v33  ;;  %v8233_v42 = vld [vmem:[#allocation5 + $0x220] sm:$0xff]  ;;  %v483_v49 = vunpack.c.l.b16 %v367_v39 }
  0x81   :  { %1305 = vmatpush.bf16.msrb.mxu3 %v8224_v43  ;;  %v8241_v43 = vld [vmem:[#allocation5 + $0x260] sm:$0xff]  ;;  %v494_v50 = vunpack.c.l.b16 %v378_v40  ;;  %v8252_v40 = vld [vmem:[%s10325_s9 + $0x38] sm:$0xff] }
  0x82   :  { %1249 = vmatpush.bf16.msrb.mxu0 %v8199_v44  ;;  %v458_v44 = vunpack.c.l.b16 %v342_v34  ;;  %v495_v51 = vunpack.c.l.b16 %v379_v41  ;;  %v8251_v41 = vld [vmem:[%s10325_s9 + $0x30] sm:$0xff] }
  0x83   :  { %1268 = vmatpush.bf16.msrb.mxu1 %v8207_v45  ;;  %v459_v45 = vunpack.c.l.b16 %v343_v35 }
  0x84   :  { %1287 = vmatpush.bf16.msrb.mxu2 %v8215_v46  ;;  %v470_v46 = vunpack.c.l.b16 %v354_v36 }
  0x85   :  { %1306 = vmatpush.bf16.msrb.mxu3 %v8223_v47  ;;  %v471_v47 = vunpack.c.l.b16 %v355_v37  ;;  %v461_v54 = vpack.c.b16 %v459_v45, %v458_v44  ;;  %v8250_v45 = vld [vmem:[%s10325_s9 + $0x28] sm:$0xff] }
  0x86   :  { %1250 = vmatpush.bf16.msrb.mxu0 %v8198_v56  ;;  %v485_v56 = vpack.c.b16 %v483_v49, %v482_v48  ;;  %v9470_v48 = vld [vmem:[%s10326_s10] ss:$0 sm:$0xff]  ;;  %v8260_v49 = vld [vmem:[%s10325_s9 + $0x78] sm:$0xff] }
  0x87   :  { %1269 = vmatpush.bf16.msrb.mxu1 %v8206_v57  ;;  %v473_v55 = vpack.c.b16 %v471_v47, %v470_v46  ;;  %v497_v57 = vpack.c.b16 %v495_v51, %v494_v50  ;;  %v8249_v47 = vld [vmem:[%s10325_s9 + $0x20] sm:$0xff] }
  0x88   :  { %1288 = vmatpush.bf16.msrb.mxu2 %v8214_v2  ;;  %v388_v2 = vpack.c.bf16 %v6108_v60, %v6108_v60  ;;  %v8268_v60 = vld [vmem:[%s10325_s9 + $0xb8] sm:$0xff] }
  0x89   :  { %1307 = vmatpush.bf16.msrb.mxu3 %v8222_v3  ;;  %v389_v3 = vpack.c.bf16 %v6109_v61, %v6109_v61  ;;  %v8276_v61 = vld [vmem:[%s10325_s9 + $0xf8] sm:$0xff] }
  0x8a   :  { %1251 = vmatpush.bf16.msrb.mxu0 %v8197_v4  ;;  %v400_v4 = vpack.c.bf16 %v6112_v62, %v6112_v62  ;;  %v504_v8 = vunpack.c.l.b16 %v388_v2 }
  0x8b   :  { %1270 = vmatpush.bf16.msrb.mxu1 %v8205_v5  ;;  %v401_v5 = vpack.c.bf16 %v6113_v63, %v6113_v63  ;;  %v505_v9 = vunpack.c.l.b16 %v389_v3 }
  0x8c   :  { %1289 = vmatpush.bf16.msrb.mxu2 %v8213_v16  ;;  %v6114_v16 = vld [vmem:[%s10324_s29 + $0x29] ss:$2 sm:$0xff] }
  0x8d   :  { %1308 = vmatpush.bf16.msrb.mxu3 %v8221_v17  ;;  %1252 = vmatmul.bf16.vlgmr.msrb.gmra.mxu0 %v460_v18  ;;  %v508_v12 = vpack.c.b16 %v505_v9, %v504_v8  ;;  %v6115_v17 = vld [vmem:[%s10324_s29 + $0x39] ss:$2 sm:$0xf]  ;;  %v390_v18 = vpack.c.bf16 %v6110_v14, %v6110_v14  ;;  %v8245_v8 = vld [vmem:[%s10325_s9] sm:$0xff]  ;;  %v8274_v14 = vld [vmem:[%s10325_s9 + $0xe8] sm:$0xff] }
  0x8e   :  { %1320 = vmatpush.bf16.msra.mxu0 %v8236_v10  ;;  %1271 = vmatmul.bf16.vlgmr.msrb.gmra.mxu1 %v472_v19  ;;  %v516_v10 = vunpack.c.l.b16 %v400_v4  ;;  %v391_v19 = vpack.c.bf16 %v6111_v15, %v6111_v15  ;;  %v8257_v4 = vld [vmem:[%s10325_s9 + $0x60] sm:$0xff]  ;;  %v8284_v15 = vld [vmem:[%s10325_s9 + $0x138] sm:$0xff] }
  0x8f   :  { %1339 = vmatpush.bf16.msra.mxu1 %v8244_v11  ;;  %1290 = vmatmul.bf16.vlgmr.msrb.gmra.mxu2 %v484_v20  ;;  %v517_v11 = vunpack.c.l.b16 %v401_v5  ;;  %v402_v20 = vpack.c.bf16 %v6114_v16, %v6114_v16  ;;  %v8267_v5 = vld [vmem:[%s10325_s9 + $0xb0] sm:$0xff] }
  0x90   :  { %1309 = vmatmul.bf16.vlgmr.msrb.gmra.mxu3 %v496_v21  ;;  %v403_v21 = vpack.c.bf16 %v6115_v17, %v6115_v17  ;;  %1749 = vmatpush.bf16.msra.mxu2 %v8252_v40  ;;  %v8263_v40 = vld [vmem:[%s10325_s9 + $0x90] sm:$0xff] }
  0x91   :  { %v520_v13 = vpack.c.b16 %v517_v11, %v516_v10  ;;  %v518_v24 = vunpack.c.l.b16 %v402_v20  ;;  %1763 = vmatpush.bf16.msra.mxu3 %v8260_v49 }
  0x92   :  { %1321 = vmatpush.bf16.msra.mxu0 %v8235_v22  ;;  %v506_v22 = vunpack.c.l.b16 %v390_v18  ;;  %v519_v25 = vunpack.c.l.b16 %v403_v21  ;;  %v8255_v21 = vld [vmem:[%s10325_s9 + $0x50] sm:$0xff] }
  0x93   :  { %1340 = vmatpush.bf16.msra.mxu1 %v8243_v23  ;;  %v507_v23 = vunpack.c.l.b16 %v391_v19 }
  0x94   :  { %v521_v27 = vpack.c.b16 %v519_v25, %v518_v24  ;;  %1750 = vmatpush.bf16.msra.mxu2 %v8251_v41  ;;  %v8283_v24 = vld [vmem:[%s10325_s9 + $0x130] sm:$0xff] }
  0x95   :  { %v509_v26 = vpack.c.b16 %v507_v23, %v506_v22  ;;  %v8265_v22 = vld [vmem:[%s10325_s9 + $0xa0] sm:$0xff] }
  0x96   :  { %1322 = vmatpush.bf16.msra.mxu0 %v8234_v28  ;;  %v8273_v23 = vld [vmem:[%s10325_s9 + $0xe0] sm:$0xff] }
  0x97   :  { %1341 = vmatpush.bf16.msra.mxu1 %v8242_v31 }
  0x98   :  { %1751 = vmatpush.bf16.msra.mxu2 %v8250_v45 }
  0x9a   :  { %1323 = vmatpush.bf16.msra.mxu0 %v8233_v42 }
  0x9b   :  { %1342 = vmatpush.bf16.msra.mxu1 %v8241_v43 }
  0x9c   :  { %1752 = vmatpush.bf16.msra.mxu2 %v8249_v47 }
  0x9d   :  { %1257 = vmatmul.bf16.gmra.mxu0 %v461_v54 }
  0x9e   :  { %1324 = vmatpush.bf16.msra.mxu0 %v8232_v52  ;;  %1276 = vmatmul.bf16.gmra.mxu1 %v473_v55  ;;  %v8259_v55 = vld [vmem:[%s10325_s9 + $0x70] sm:$0xff] }
  0x9f   :  { %1343 = vmatpush.bf16.msra.mxu1 %v8240_v53  ;;  %1295 = vmatmul.bf16.gmra.mxu2 %v485_v56  ;;  %v8248_v53 = vld [vmem:[%s10325_s9 + $0x18] sm:$0xff] }
  0xa0   :  { %1314 = vmatmul.bf16.gmra.mxu3 %v497_v57  ;;  %1753 = vmatpush.bf16.msra.mxu2 %v8248_v53  ;;  %v8247_v57 = vld [vmem:[%s10325_s9 + $0x10] sm:$0xff] }
  0xa1   :  { %1764 = vmatpush.bf16.msra.mxu3 %v8259_v55 }
  0xa2   :  { %1325 = vmatpush.bf16.msra.mxu0 %v8231_v58 }
  0xa3   :  { %1344 = vmatpush.bf16.msra.mxu1 %v8239_v59  ;;  %v8258_v59 = vld [vmem:[%s10325_s9 + $0x68] sm:$0xff] }
  0xa4   :  { %1754 = vmatpush.bf16.msra.mxu2 %v8247_v57 }
  0xa5   :  { %1765 = vmatpush.bf16.msra.mxu3 %v8258_v59 }
  0xa6   :  { %1326 = vmatpush.bf16.msra.mxu0 %v8230_v0 }
  0xa7   :  { %1345 = vmatpush.bf16.msra.mxu1 %v8238_v1  ;;  %v8246_v1 = vld [vmem:[%s10325_s9 + $0x8] sm:$0xff] }
  0xa8   :  { %1755 = vmatpush.bf16.msra.mxu2 %v8246_v1  ;;  %v8279_v1 = vld [vmem:[%s10325_s9 + $0x110] sm:$0xff] }
  0xa9   :  { %1766 = vmatpush.bf16.msra.mxu3 %v8257_v4 }
  0xaa   :  { %1327 = vmatpush.bf16.msra.mxu0 %v8229_v6  ;;  %v8275_v6 = vld [vmem:[%s10325_s9 + $0xf0] sm:$0xff] }
  0xab   :  { %1346 = vmatpush.bf16.msra.mxu1 %v8237_v7 }
  0xac   :  { %1756 = vmatpush.bf16.msra.mxu2 %v8245_v8 }
  0xad   :  { %1328 = vmatmul.bf16.vlgmr.msra.gmra.mxu0 %v508_v12  ;;  %v8256_v12 = vld [vmem:[%s10325_s9 + $0x58] sm:$0xff] }
  0xae   :  { %1347 = vmatmul.bf16.vlgmr.msra.gmra.mxu1 %v520_v13  ;;  %1777 = vmatpush.bf16.msrb.mxu0 %v8268_v60  ;;  %v8266_v13 = vld [vmem:[%s10325_s9 + $0xa8] sm:$0xff] }
  0xaf   :  { %1791 = vmatpush.bf16.msrb.mxu1 %v8276_v61  ;;  %1767 = vmatpush.bf16.msra.mxu3 %v8256_v12 }
  0xb0   :  { %1805 = vmatpush.bf16.msrb.mxu2 %v8284_v15 }
  0xb2   :  { %1778 = vmatpush.bf16.msrb.mxu0 %v8267_v5 }
  0xb3   :  { %1792 = vmatpush.bf16.msrb.mxu1 %v8275_v6  ;;  %1768 = vmatpush.bf16.msra.mxu3 %v8255_v21 }
  0xb4   :  { %1806 = vmatpush.bf16.msrb.mxu2 %v8283_v24 }
  0xb6   :  { %1779 = vmatpush.bf16.msrb.mxu0 %v8266_v13 }
  0xb7   :  { %1793 = vmatpush.bf16.msrb.mxu1 %v8274_v14 }
  0xba   :  { %1780 = vmatpush.bf16.msrb.mxu0 %v8265_v22  ;;  %v8291_v22 = vld [vmem:[#allocation10 + $0x30] sm:$0xff] }
  0xbb   :  { %1794 = vmatpush.bf16.msrb.mxu1 %v8273_v23 }
  0xbd   :  { %1333 = vmatmul.bf16.gmra.mxu0 %v509_v26 }
  0xbe   :  { %1352 = vmatmul.bf16.gmra.mxu1 %v521_v27 }
  0xea   :  { %v1177_v28 = vpop.f32.mrf.mxu0 }
  0xeb   :  { %v1196_v29 = vpop.f32.mrf.mxu1  ;;  %v1178_v54 = vadd.f32 %v9470_v48, %v1177_v28 }
  0xed   :  { %v1197_v58 = vadd.f32 %v1196_v29, %v1178_v54 }
  0xf2   :  { %v1179_v30 = vpop.f32.mrf.mxu0  ;;  %v1215_v32 = vpop.f32.mrf.mxu2 }
  0xf3   :  { %v1198_v31 = vpop.f32.mrf.mxu1  ;;  %v1234_v33 = vpop.f32.mrf.mxu3  ;;  %v1216_v62 = vadd.f32 %v1215_v32, %v1197_v58  ;;  %v1180_v2 = vadd.f32 %v9470_v48, %v1179_v30  ;;  %v8254_v30 = vld [vmem:[%s10325_s9 + $0x48] sm:$0xff]  ;;  %v8272_v32 = vld [vmem:[%s10325_s9 + $0xd8] sm:$0xff] }
  0xf4   :  { %1769 = vmatpush.bf16.msra.mxu3 %v8254_v30  ;;  %1795 = vmatpush.bf16.msrb.mxu1 %v8272_v32 }
  0xf5   :  { %v1235_v7 = vadd.f32 %v1234_v33, %v1216_v62  ;;  %v1199_v9 = vadd.f32 %v1198_v31, %v1180_v2  ;;  %v8264_v31 = vld [vmem:[%s10325_s9 + $0x98] sm:$0xff]  ;;  %v8282_v33 = vld [vmem:[%s10325_s9 + $0x128] sm:$0xff] }
  0xf6   :  { %1781 = vmatpush.bf16.msrb.mxu0 %v8264_v31  ;;  %1807 = vmatpush.bf16.msrb.mxu2 %v8282_v33 }
  0xfa   :  { %v9441_v34 = vpop.f32.mrf.mxu0  ;;  %v1217_v36 = vpop.f32.mrf.mxu2  ;;  %1782 = vmatpush.bf16.msrb.mxu0 %v8263_v40 }
  0xfb   :  { %v9443_v35 = vpop.f32.mrf.mxu1  ;;  %v9445_v37 = vpop.f32.mrf.mxu3  ;;  %v1218_v16 = vadd.f32 %v1217_v36, %v1199_v9  ;;  %v1183_v19 = vadd.f32 %v9470_v48, %v9441_v34  ;;  %v8278_v9 = vld [vmem:[%s10325_s9 + $0x108] sm:$0xff] }
  0xfd   :  { %v1237_v25 = vadd.f32 %v9445_v37, %v1218_v16  ;;  %v1202_v28 = vadd.f32 %v9443_v35, %v1183_v19  ;;  %v8253_v37 = vld [vmem:[%s10325_s9 + $0x40] sm:$0xff] }
  0xfe   :  { %1770 = vmatpush.bf16.msra.mxu3 %v8253_v37 }
 0x102   :  { %v9447_v38 = vpop.f32.mrf.mxu0  ;;  %v9457_v42 = vpop.f32.mrf.mxu2 }
 0x103   :  { %v9449_v39 = vpop.f32.mrf.mxu1  ;;  %v9462_v46 = vpop.f32.mrf.mxu3  ;;  %v1221_v34 = vadd.f32 %v9457_v42, %v1202_v28  ;;  %v8271_v42 = vld [vmem:[%s10325_s9 + $0xd0] sm:$0xff]  ;;  %v1185_v45 = vadd.f32 %v9470_v48, %v9447_v38  ;;  %v8262_v38 = vld [vmem:[%s10325_s9 + $0x88] sm:$0xff]  ;;  %v8280_v48 = vld [vmem:[%s10325_s9 + $0x118] sm:$0xff] }
 0x104   :  { %1796 = vmatpush.bf16.msrb.mxu1 %v8271_v42  ;;  %1783 = vmatpush.bf16.msrb.mxu0 %v8262_v38 }
 0x105   :  { %v1204_v55 = vadd.f32 %v9449_v39, %v1185_v45  ;;  %v8261_v39 = vld [vmem:[%s10325_s9 + $0x80] sm:$0xff] }
 0x108   :  { %1784 = vmatpush.bf16.msrb.mxu0 %v8261_v39 }
 0x10a   :  { %v1253_v43 = vpop.f32.mrf.mxu0  ;;  %v9475_v50 = vpop.f32.mrf.mxu2 }
 0x10b   :  { %v1272_v44 = vpop.f32.mrf.mxu1  ;;  %v9486_v56 = vpop.f32.mrf.mxu3  ;;  %v1254_v10 = vadd.f32 %v1253_v43, %v1235_v7 }
 0x10d   :  { %v1273_v20 = vadd.f32 %v1272_v44, %v1254_v10  ;;  %v8281_v44 = vld [vmem:[%s10325_s9 + $0x120] sm:$0xff] }
 0x10e   :  { %1808 = vmatpush.bf16.msrb.mxu2 %v8281_v44 }
 0x112   :  { %v1255_v51 = vpop.f32.mrf.mxu0  ;;  %v1291_v3 = vpop.f32.mrf.mxu2  ;;  %1809 = vmatpush.bf16.msrb.mxu2 %v8280_v48 }
 0x113   :  { %v9477_v52 = vpop.f32.mrf.mxu1  ;;  %v1310_v11 = vpop.f32.mrf.mxu3  ;;  %v1292_v26 = vadd.f32 %v1291_v3, %v1273_v20  ;;  %v1256_v29 = vadd.f32 %v1255_v51, %v1237_v25  ;;  %v1240_v51 = vadd.f32 %v9462_v46, %v1221_v34  ;;  %v8270_v46 = vld [vmem:[%s10325_s9 + $0xc8] sm:$0xff] }
 0x114   :  { %1797 = vmatpush.bf16.msrb.mxu1 %v8270_v46  ;;  %v8292_v20 = vld [vmem:[#allocation10 + $0x38] sm:$0xff] }
 0x115   :  { %v1311_v35 = vadd.f32 %v1310_v11, %v1292_v26  ;;  %v1275_v47 = vadd.f32 %v9477_v52, %v1256_v29  ;;  %v1223_v52 = vadd.f32 %v9475_v50, %v1204_v55  ;;  %2161 = vmatpush.bf16.msrb.mxu3 %v8292_v20  ;;  %v8290_v29 = vld [vmem:[#allocation10 + $0x28] sm:$0xff]  ;;  %v8323_v20 = vld [vmem:[#allocation10 + $0x130] sm:$0xff] }
 0x116   :  { %1810 = vmatpush.bf16.msrb.mxu2 %v8279_v1 }
 0x117   :  { %v1242_v4 = vadd.f32 %v9486_v56, %v1223_v52  ;;  %v8277_v56 = vld [vmem:[%s10325_s9 + $0x100] sm:$0xff] }
 0x119   :  { %2162 = vmatpush.bf16.msrb.mxu3 %v8291_v22  ;;  %v8304_v22 = vld [vmem:[#allocation10 + $0x98] sm:$0xff] }
 0x11a   :  { %v9500_v63 = vpop.f32.mrf.mxu0  ;;  %v1293_v27 = vpop.f32.mrf.mxu2  ;;  %1811 = vmatpush.bf16.msrb.mxu2 %v8278_v9  ;;  %v8286_v9 = vld [vmem:[#allocation10 + $0x8] sm:$0xff] }
 0x11b   :  { %v9502_v0 = vpop.f32.mrf.mxu1  ;;  %v1312_v36 = vpop.f32.mrf.mxu3  ;;  %v1294_v53 = vadd.f32 %v1293_v27, %v1275_v47  ;;  %v1259_v57 = vadd.f32 %v9500_v63, %v1240_v51  ;;  %v8269_v63 = vld [vmem:[%s10325_s9 + $0xc0] sm:$0xff] }
 0x11c   :  { %1798 = vmatpush.bf16.msrb.mxu1 %v8269_v63 }
 0x11d   :  { %v1313_v60 = vadd.f32 %v1312_v36, %v1294_v53  ;;  %v1278_v50 = vadd.f32 %v9502_v0, %v1259_v57  ;;  %2163 = vmatpush.bf16.msrb.mxu3 %v8290_v29  ;;  %v8289_v36 = vld [vmem:[#allocation10 + $0x20] sm:$0xff]  ;;  %v8686_v29 = vld [vmem:[#allocation8] ss:$0 sm:$0xff] }
 0x11e   :  { %1812 = vmatpush.bf16.msrb.mxu2 %v8277_v56  ;;  %v8296_v56 = vld [vmem:[#allocation10 + $0x58] sm:$0xff] }
 0x121   :  { %2164 = vmatpush.bf16.msrb.mxu3 %v8289_v36  ;;  %v8319_v36 = vld [vmem:[#allocation10 + $0x110] sm:$0xff] }
 0x122   :  { %v9532_v17 = vpop.f32.mrf.mxu0  ;;  %v1296_v58 = vpop.f32.mrf.mxu2 }
 0x123   :  { %v9534_v18 = vpop.f32.mrf.mxu1  ;;  %v1315_v3 = vpop.f32.mrf.mxu3  ;;  %v1297_v5 = vadd.f32 %v1296_v58, %v1278_v50  ;;  %v1261_v7 = vadd.f32 %v9532_v17, %v1242_v4  ;;  %v8299_v4 = vld [vmem:[#allocation10 + $0x70] sm:$0xff] }
 0x125   :  { %v1316_v10 = vadd.f32 %v1315_v3, %v1297_v5  ;;  %v1280_v13 = vadd.f32 %v9534_v18, %v1261_v7  ;;  %v8288_v3 = vld [vmem:[#allocation10 + $0x18] sm:$0xff]  ;;  %v8287_v5 = vld [vmem:[#allocation10 + $0x10] sm:$0xff] }
 0x126   :  { %2165 = vmatpush.bf16.msrb.mxu3 %v8288_v3  ;;  %v8308_v7 = vld [vmem:[#allocation10 + $0xb8] sm:$0xff] }
 0x127   :  { %2187 = vmatpush.bf16.msra.mxu1 %v8308_v7  ;;  %v8332_v7 = vld [vmem:[%s10297_s7 + $0x38] sm:$0xff] }
 0x12a   :  { %v1329_v41 = vpop.f32.mrf.mxu0  ;;  %v1298_v11 = vpop.f32.mrf.mxu2  ;;  %2166 = vmatpush.bf16.msrb.mxu3 %v8287_v5 }
 0x12b   :  { %v1348_v43 = vpop.f32.mrf.mxu1  ;;  %v1330_v49 = vadd.f32 %v1329_v41, %v1311_v35  ;;  %v1299_v15 = vadd.f32 %v1298_v11, %v1280_v13  ;;  %v1317_v17 = vpop.f32.mrf.mxu3  ;;  %v8307_v11 = vld [vmem:[#allocation10 + $0xb0] sm:$0xff]  ;;  %v8306_v13 = vld [vmem:[#allocation10 + $0xa8] sm:$0xff] }
 0x12c   :  { %2188 = vmatpush.bf16.msra.mxu1 %v8307_v11  ;;  %v8339_v11 = vld [vmem:[%s10297_s7 + $0x70] sm:$0xff] }
 0x12d   :  { %v1349_v54 = vadd.f32 %v1348_v43, %v1330_v49  ;;  %v1318_v21 = vadd.f32 %v1317_v17, %v1299_v15  ;;  %v8324_v15 = vld [vmem:[#allocation10 + $0x138] sm:$0xff]  ;;  %v8305_v17 = vld [vmem:[#allocation10 + $0xa0] sm:$0xff] }
 0x12e   :  { %2167 = vmatpush.bf16.msrb.mxu3 %v8286_v9  ;;  %v8348_v9 = vld [vmem:[%s10297_s7 + $0xb8] sm:$0xff] }
 0x12f   :  { %v1358_v59 = vmax.f32 %v1349_v54, 0.0 }
 0x130   :  { %2189 = vmatpush.bf16.msra.mxu1 %v8306_v13  ;;  %v8346_v13 = vld [vmem:[%s10297_s7 + $0xa8] sm:$0xff] }
 0x131   :  { %1362 = vst [vmem:[#allocation2] sm:$0xff] %v1358_v59 }
 0x132   :  { %v1331_v61 = vpop.f32.mrf.mxu0 }
 0x133   :  { %v1350_v62 = vpop.f32.mrf.mxu1  ;;  %v1332_v2 = vadd.f32 %v1331_v61, %v1313_v60 }
 0x134   :  { %2190 = vmatpush.bf16.msra.mxu1 %v8305_v17  ;;  %v8328_v17 = vld [vmem:[%s10297_s7 + $0x18] sm:$0xff] }
 0x135   :  { %v1351_v6 = vadd.f32 %v1350_v62, %v1332_v2  ;;  %v8300_v2 = vld [vmem:[#allocation10 + $0x78] sm:$0xff] }
 0x136   :  { %2174 = vmatpush.bf16.msra.mxu0 %v8300_v2 }
 0x137   :  { %v1359_v8 = vmax.f32 %v1351_v6, 0.0  ;;  %v8298_v6 = vld [vmem:[#allocation10 + $0x68] sm:$0xff] }
 0x138   :  { %2191 = vmatpush.bf16.msra.mxu1 %v8304_v22  ;;  %v8335_v22 = vld [vmem:[%s10297_s7 + $0x50] sm:$0xff] }
 0x139   :  { %1363 = vst [vmem:[#allocation2 + $0x8] sm:$0xff] %v1359_v8  ;;  %v8316_v8 = vld [vmem:[#allocation10 + $0xf8] sm:$0xff] }
 0x13a   :  { %v1334_v0 = vpop.f32.mrf.mxu0  ;;  %2175 = vmatpush.bf16.msra.mxu0 %v8299_v4 }
 0x13b   :  { %v1353_v12 = vpop.f32.mrf.mxu1  ;;  %v1335_v14 = vadd.f32 %v1334_v0, %v1316_v10  ;;  %v8297_v10 = vld [vmem:[#allocation10 + $0x60] sm:$0xff]  ;;  %v8315_v0 = vld [vmem:[#allocation10 + $0xf0] sm:$0xff] }
 0x13d   :  { %v1354_v16 = vadd.f32 %v1353_v12, %v1335_v14  ;;  %v8285_v12 = vld [vmem:[#allocation10] sm:$0xff]  ;;  %v8314_v14 = vld [vmem:[#allocation10 + $0xe8] sm:$0xff] }
 0x13e   :  { %2176 = vmatpush.bf16.msra.mxu0 %v8298_v6  ;;  %2168 = vmatpush.bf16.msrb.mxu3 %v8285_v12  ;;  %v8330_v12 = vld [vmem:[%s10297_s7 + $0x28] sm:$0xff] }
 0x13f   :  { %v1360_v19 = vmax.f32 %v1354_v16, 0.0  ;;  %v8295_v16 = vld [vmem:[#allocation10 + $0x50] sm:$0xff] }
 0x140   :  { %v1366_v26 = vld [vmem:[#allocation2] ss:$2 sm:$0xff]  ;;  %v1372_v27 = vld [vmem:[#allocation2 + $0x1] ss:$2 sm:$0xff] }
 0x141   :  { %1364 = vst [vmem:[#allocation2 + $0x10] sm:$0xff] %v1360_v19  ;;  %v1369_v30 = vpack.c.bf16 %v1366_v26, %v1366_v26  ;;  %v1375_v31 = vpack.c.bf16 %v1372_v27, %v1372_v27  ;;  %v8313_v19 = vld [vmem:[#allocation10 + $0xe0] sm:$0xff]  ;;  %v8303_v26 = vld [vmem:[#allocation10 + $0x90] sm:$0xff] }
 0x142   :  { %v1336_v23 = vpop.f32.mrf.mxu0  ;;  %2177 = vmatpush.bf16.msra.mxu0 %v8297_v10  ;;  %v8311_v27 = vld [vmem:[#allocation10 + $0xd0] sm:$0xff]  ;;  %2192 = vmatpush.bf16.msra.mxu1 %v8303_v26  ;;  %v8331_v10 = vld [vmem:[%s10297_s7 + $0x30] sm:$0xff] }
 0x143   :  { %v1337_v24 = vadd.f32 %v1336_v23, %v1318_v21  ;;  %v1355_v25 = vpop.f32.mrf.mxu1  ;;  %v1397_v37 = vunpack.c.l.b16 %v1369_v30  ;;  %v1403_v41 = vunpack.c.l.b16 %v1375_v31  ;;  %v8294_v21 = vld [vmem:[#allocation10 + $0x48] sm:$0xff]  ;;  %v8312_v23 = vld [vmem:[#allocation10 + $0xd8] sm:$0xff] }
 0x144   :  { %v8310_v30 = vld [vmem:[#allocation10 + $0xc8] sm:$0xff]  ;;  %v8320_v31 = vld [vmem:[#allocation10 + $0x118] sm:$0xff] }
 0x145   :  { %v1356_v28 = vadd.f32 %v1355_v25, %v1337_v24  ;;  %v8322_v24 = vld [vmem:[#allocation10 + $0x128] sm:$0xff]  ;;  %v8293_v25 = vld [vmem:[#allocation10 + $0x40] sm:$0xff]  ;;  %v8342_v26 = vld [vmem:[%s10297_s7 + $0x88] sm:$0xff] }
 0x146   :  { %2178 = vmatpush.bf16.msra.mxu0 %v8296_v56  ;;  %v8338_v56 = vld [vmem:[%s10297_s7 + $0x68] sm:$0xff] }
 0x147   :  { %v1361_v18 = vmax.f32 %v1356_v28, 0.0  ;;  %v8321_v28 = vld [vmem:[#allocation10 + $0x120] sm:$0xff] }
 0x148   :  { %v1368_v32 = vld [vmem:[#allocation2 + $0x10] ss:$2 sm:$0xf]  ;;  %v1374_v33 = vld [vmem:[#allocation2 + $0x11] ss:$2 sm:$0xf] }
 0x149   :  { %1365 = vst [vmem:[#allocation2 + $0x18] sm:$0xf] %v1361_v18  ;;  %v1370_v34 = vpack.c.bf16 %v1368_v32, %v1368_v32  ;;  %v1376_v35 = vpack.c.bf16 %v1374_v33, %v1374_v33  ;;  %v1378_v42 = vld [vmem:[#allocation2 + $0x2] ss:$2 sm:$0xff]  ;;  %v1384_v44 = vld [vmem:[#allocation2 + $0x3] ss:$2 sm:$0xff] }
 0x14a   :  { %v1381_v49 = vpack.c.bf16 %v1378_v42, %v1378_v42  ;;  %v1387_v51 = vpack.c.bf16 %v1384_v44, %v1384_v44  ;;  %v1390_v52 = vld [vmem:[#allocation2 + $0x4] ss:$2 sm:$0xff]  ;;  %2179 = vmatpush.bf16.msra.mxu0 %v8295_v16  ;;  %v8302_v18 = vld [vmem:[#allocation10 + $0x88] sm:$0xff] }
 0x14b   :  { %v1398_v40 = vunpack.c.l.b16 %v1370_v34  ;;  %v1404_v43 = vunpack.c.l.b16 %v1376_v35  ;;  %v1393_v62 = vpack.c.bf16 %v1390_v52, %v1390_v52  ;;  %2193 = vmatpush.bf16.msra.mxu1 %v8302_v18  ;;  %v8301_v33 = vld [vmem:[#allocation10 + $0x80] sm:$0xff]  ;;  %v8345_v16 = vld [vmem:[%s10297_s7 + $0xa0] sm:$0xff] }
 0x14c   :  { %v1409_v59 = vunpack.c.l.b16 %v1381_v49  ;;  %v1415_v46 = vunpack.c.l.b16 %v1387_v51  ;;  %v8309_v35 = vld [vmem:[#allocation10 + $0xc0] sm:$0xff]  ;;  %v8341_v18 = vld [vmem:[%s10297_s7 + $0x80] sm:$0xff] }
 0x14d   :  { %v1399_v45 = vpack.c.b16 %v1398_v40, %v1397_v37  ;;  %v1405_v47 = vpack.c.b16 %v1404_v43, %v1403_v41  ;;  %v1421_v1 = vunpack.c.l.b16 %v1393_v62  ;;  %v8318_v41 = vld [vmem:[#allocation10 + $0x108] sm:$0xff] }
 0x14e   :  { %2180 = vmatpush.bf16.msra.mxu0 %v8294_v21  ;;  %v8327_v21 = vld [vmem:[%s10297_s7 + $0x10] sm:$0xff] }
 0x14f   :  { %1757 = vmatmul.bf16.vlgmr.msra.gmra.mxu2 %v1399_v45  ;;  %1771 = vmatmul.bf16.vlgmr.msra.gmra.mxu3 %v1405_v47  ;;  %v8317_v47 = vld [vmem:[#allocation10 + $0x100] sm:$0xff] }
 0x150   :  { %v1380_v53 = vld [vmem:[#allocation2 + $0x12] ss:$2 sm:$0xf]  ;;  %v1386_v54 = vld [vmem:[#allocation2 + $0x13] ss:$2 sm:$0xf]  ;;  %2200 = vmatpush.bf16.msra.mxu2 %v8316_v8  ;;  %2213 = vmatpush.bf16.msra.mxu3 %v8324_v15 }
 0x151   :  { %v1382_v55 = vpack.c.bf16 %v1380_v53, %v1380_v53  ;;  %v1388_v57 = vpack.c.bf16 %v1386_v54, %v1386_v54  ;;  %v1392_v58 = vld [vmem:[#allocation2 + $0x14] ss:$2 sm:$0xf]  ;;  %2194 = vmatpush.bf16.msra.mxu1 %v8301_v33  ;;  %v8337_v15 = vld [vmem:[%s10297_s7 + $0x60] sm:$0xff]  ;;  %v8380_v33 = vld [vmem:[#allocation5 + $0x38] sm:$0xff] }
 0x152   :  { %v1394_v61 = vpack.c.bf16 %v1392_v58, %v1392_v58  ;;  %2181 = vmatpush.bf16.msra.mxu0 %v8293_v25  ;;  %v8340_v8 = vld [vmem:[%s10297_s7 + $0x78] sm:$0xff]  ;;  %v8334_v25 = vld [vmem:[%s10297_s7 + $0x48] sm:$0xff] }
 0x153   :  { %v1410_v38 = vunpack.c.l.b16 %v1382_v55  ;;  %v1416_v48 = vunpack.c.l.b16 %v1388_v57 }
 0x154   :  { %v1422_v63 = vunpack.c.l.b16 %v1394_v61  ;;  %2201 = vmatpush.bf16.msra.mxu2 %v8315_v0  ;;  %2214 = vmatpush.bf16.msra.mxu3 %v8323_v20  ;;  %v8347_v0 = vld [vmem:[%s10297_s7 + $0xb0] sm:$0xff]  ;;  %v8344_v20 = vld [vmem:[%s10297_s7 + $0x98] sm:$0xff] }
 0x155   :  { %v1411_v60 = vpack.c.b16 %v1410_v38, %v1409_v59  ;;  %v1417_v39 = vpack.c.b16 %v1416_v48, %v1415_v46 }
 0x156   :  { %v1423_v50 = vpack.c.b16 %v1422_v63, %v1421_v1 }
 0x157   :  { %1785 = vmatmul.bf16.vlgmr.msrb.gmra.mxu0 %v1411_v60  ;;  %1799 = vmatmul.bf16.vlgmr.msrb.gmra.mxu1 %v1417_v39 }
 0x158   :  { %2202 = vmatpush.bf16.msra.mxu2 %v8314_v14  ;;  %2215 = vmatpush.bf16.msra.mxu3 %v8322_v24  ;;  %v8329_v14 = vld [vmem:[%s10297_s7 + $0x20] sm:$0xff]  ;;  %v8326_v24 = vld [vmem:[%s10297_s7 + $0x8] sm:$0xff] }
 0x159   :  { %2429 = vmatpush.bf16.msrb.mxu0 %v8332_v7  ;;  %2442 = vmatpush.bf16.msrb.mxu1 %v8340_v8  ;;  %v8377_v7 = vld [vmem:[#allocation5 + $0x20] sm:$0xff] }
 0x15c   :  { %2203 = vmatpush.bf16.msra.mxu2 %v8313_v19  ;;  %2216 = vmatpush.bf16.msra.mxu3 %v8321_v28  ;;  %v8336_v19 = vld [vmem:[%s10297_s7 + $0x58] sm:$0xff]  ;;  %v8325_v28 = vld [vmem:[%s10297_s7] sm:$0xff] }
 0x15d   :  { %2430 = vmatpush.bf16.msrb.mxu0 %v8331_v10  ;;  %2443 = vmatpush.bf16.msrb.mxu1 %v8339_v11  ;;  %v6890_v10 = vld [vmem:[#allocation14 + $0x48] sm:$0xf] }
 0x15f   :  { %1813 = vmatmul.bf16.vlgmr.msrb.gmra.mxu2 %v1423_v50 }
 0x160   :  { %2204 = vmatpush.bf16.msra.mxu2 %v8312_v23  ;;  %2217 = vmatpush.bf16.msra.mxu3 %v8320_v31  ;;  %v8343_v23 = vld [vmem:[%s10297_s7 + $0x90] sm:$0xff]  ;;  %v6938_v31 = vld [vmem:[#allocation14 + $0xa8] sm:$0xf] }
 0x161   :  { %2431 = vmatpush.bf16.msrb.mxu0 %v8330_v12  ;;  %2444 = vmatpush.bf16.msrb.mxu1 %v8338_v56  ;;  %v6904_v12 = vld [vmem:[#allocation14 + $0x6c] sm:$0xf0]  ;;  %v8359_v56 = vld [vmem:[#allocation14 + $0x50] sm:$0xf0] }
 0x164   :  { %2205 = vmatpush.bf16.msra.mxu2 %v8311_v27  ;;  %2218 = vmatpush.bf16.msra.mxu3 %v8319_v36  ;;  %v6926_v36 = vld [vmem:[#allocation14 + $0x90] sm:$0xf] }
 0x165   :  { %2432 = vmatpush.bf16.msrb.mxu0 %v8329_v14  ;;  %2445 = vmatpush.bf16.msrb.mxu1 %v8337_v15  ;;  %v8363_v14 = vld [vmem:[#allocation14 + $0x70] sm:$0xf0] }
 0x168   :  { %2206 = vmatpush.bf16.msra.mxu2 %v8310_v30  ;;  %2219 = vmatpush.bf16.msra.mxu3 %v8318_v41 }
 0x169   :  { %2433 = vmatpush.bf16.msrb.mxu0 %v8328_v17  ;;  %2446 = vmatpush.bf16.msrb.mxu1 %v8336_v19 }
 0x16c   :  { %2207 = vmatpush.bf16.msra.mxu2 %v8309_v35  ;;  %2220 = vmatpush.bf16.msra.mxu3 %v8317_v47  ;;  %v6946_v47 = vld [vmem:[#allocation14 + $0xb0] sm:$0xf] }
 0x16d   :  { %2434 = vmatpush.bf16.msrb.mxu0 %v8327_v21  ;;  %2447 = vmatpush.bf16.msrb.mxu1 %v8335_v22  ;;  %v6878_v21 = vld [vmem:[#allocation14 + $0x30] sm:$0xf] }
 0x170   :  { %2455 = vmatpush.bf16.msrb.mxu2 %v8348_v9 }
 0x171   :  { %2435 = vmatpush.bf16.msrb.mxu0 %v8326_v24  ;;  %2448 = vmatpush.bf16.msrb.mxu1 %v8334_v25  ;;  %v6892_v24 = vld [vmem:[#allocation14 + $0x54] sm:$0xf0] }
 0x174   :  { %2456 = vmatpush.bf16.msrb.mxu2 %v8347_v0  ;;  %v8361_v0 = vld [vmem:[#allocation14 + $0x64] sm:$0xf] }
 0x175   :  { %2436 = vmatpush.bf16.msrb.mxu0 %v8325_v28  ;;  %v6907_v17 = vor.u32 %v8361_v0, %v6904_v12  ;;  %v6898_v28 = vld [vmem:[#allocation14 + $0x50] sm:$0xf]  ;;  %v8386_v12 = vld [vmem:[#allocation5 + $0x68] sm:$0xff] }
 0x178   :  { %2457 = vmatpush.bf16.msrb.mxu2 %v8346_v13  ;;  %v6910_v13 = vld [vmem:[#allocation14 + $0x68] sm:$0xf] }
 0x179   :  { %v6911_v22 = vor.u32 %v8363_v14, %v6910_v13  ;;  %v6862_v13 = vld [vmem:[#allocation14 + $0x8] sm:$0xf]  ;;  %v8351_v14 = vld [vmem:[#allocation14 + $0x10] sm:$0xf0] }
 0x17c   :  { %2458 = vmatpush.bf16.msrb.mxu2 %v8345_v16  ;;  %v8376_v16 = vld [vmem:[#allocation5 + $0x18] sm:$0xff] }
 0x180   :  { %2459 = vmatpush.bf16.msrb.mxu2 %v8344_v20  ;;  %v6891_v20 = vor.u32 %v8359_v56, %v6890_v10  ;;  %v8349_v10 = vld [vmem:[#allocation14 + $0x4] sm:$0xf]  ;;  %v8396_v56 = vld [vmem:[#allocation5 + $0xb8] sm:$0xff] }
 0x184   :  { %2460 = vmatpush.bf16.msrb.mxu2 %v8343_v23  ;;  %v8358_v23 = vld [vmem:[#allocation14 + $0x4c] sm:$0xf] }
 0x188   :  { %2461 = vmatpush.bf16.msrb.mxu2 %v8342_v26 }
 0x18c   :  { %2462 = vmatpush.bf16.msrb.mxu2 %v8341_v18 }
 0x1d2   :  { %v1758_v32 = vpop.f32.mrf.mxu2  ;;  %v1772_v37 = vpop.f32.mrf.mxu3 }
 0x1d3   :  { %v1759_v34 = vadd.f32 %v8686_v29, %v1758_v32  ;;  %v8371_v32 = vld [vmem:[#allocation14 + $0xb0] sm:$0xf0] }
 0x1d4   :  { %v1786_v43 = vpop.f32.mrf.mxu0  ;;  %v1800_v49 = vpop.f32.mrf.mxu1  ;;  %v6939_v35 = vor.u32 %v8371_v32, %v6938_v31  ;;  %v6866_v31 = vld [vmem:[#allocation14 + $0x18] sm:$0xf]  ;;  %v6895_v32 = vor.u32 %v8358_v23, %v6892_v24  ;;  %v8394_v24 = vld [vmem:[#allocation5 + $0xa8] sm:$0xff] }
 0x1d5   :  { %v1773_v40 = vadd.f32 %v1772_v37, %v1759_v34  ;;  %v8687_v34 = vld [vmem:[#allocation11] ss:$0 sm:$0xff]  ;;  %v8384_v23 = vld [vmem:[#allocation5 + $0x58] sm:$0xff] }
 0x1d6   :  { %v8368_v37 = vld [vmem:[#allocation14 + $0x98] sm:$0xf0] }
 0x1d7   :  { %v1787_v44 = vadd.f32 %v1786_v43, %v1773_v40  ;;  %v8379_v43 = vld [vmem:[#allocation5 + $0x30] sm:$0xff] }
 0x1d9   :  { %v1801_v53 = vadd.f32 %v1800_v49, %v1787_v44  ;;  %v6927_v44 = vor.u32 %v8368_v37, %v6926_v36  ;;  %v8372_v49 = vld [vmem:[#allocation14 + $0xb8] sm:$0xf0]  ;;  %v8355_v36 = vld [vmem:[#allocation14 + $0x34] sm:$0xf]  ;;  %v6880_v37 = vld [vmem:[#allocation14 + $0x3c] sm:$0xf0] }
 0x1da   :  { %v1760_v42 = vpop.f32.mrf.mxu2  ;;  %v1774_v51 = vpop.f32.mrf.mxu3 }
 0x1db   :  { %v1761_v45 = vadd.f32 %v8686_v29, %v1760_v42  ;;  %v8333_v29 = vld [vmem:[%s10297_s7 + $0x40] sm:$0xff] }
 0x1dc   :  { %v1788_v58 = vpop.f32.mrf.mxu0  ;;  %v1802_v46 = vpop.f32.mrf.mxu1  ;;  %2449 = vmatpush.bf16.msrb.mxu1 %v8333_v29  ;;  %v8370_v42 = vld [vmem:[#allocation14 + $0xac] sm:$0xf]  ;;  %v8360_v29 = vld [vmem:[#allocation14 + $0x58] sm:$0xf0] }
 0x1dd   :  { %v1775_v54 = vadd.f32 %v1774_v51, %v1761_v45  ;;  %v6940_v45 = vld [vmem:[#allocation14 + $0xb4] sm:$0xf0] }
 0x1de   :  { %v6914_v51 = vld [vmem:[#allocation14 + $0x78] sm:$0xf] }
 0x1df   :  { %v1789_v59 = vadd.f32 %v1788_v58, %v1775_v54  ;;  %v6943_v54 = vor.u32 %v8370_v42, %v6940_v45  ;;  %v8367_v58 = vld [vmem:[#allocation14 + $0x94] sm:$0xf]  ;;  %v8374_v42 = vld [vmem:[#allocation5 + $0x8] sm:$0xff] }
 0x1e1   :  { %v1803_v48 = vadd.f32 %v1802_v46, %v1789_v59  ;;  %v6928_v59 = vld [vmem:[#allocation14 + $0x9c] sm:$0xf0] }
 0x1e2   :  { %v1814_v55 = vpop.f32.mrf.mxu2  ;;  %v8378_v46 = vld [vmem:[#allocation5 + $0x28] sm:$0xff] }
 0x1e3   :  { %v1815_v57 = vadd.f32 %v1814_v55, %v1801_v53  ;;  %v8365_v53 = vld [vmem:[#allocation14 + $0x80] sm:$0xf0]  ;;  %v6947_v55 = vor.u32 %v8372_v49, %v6946_v47 }
 0x1e5   :  { %v1819_v38 = vmax.f32 %v1815_v57, 0.0 }
 0x1e7   :  { %1821 = vst [vmem:[#allocation3] sm:$0xff] %v1819_v38  ;;  %v6934_v38 = vld [vmem:[#allocation14 + $0x98] sm:$0xf] }
 0x1ea   :  { %v1816_v52 = vpop.f32.mrf.mxu2 }
 0x1eb   :  { %v1817_v60 = vadd.f32 %v1816_v52, %v1803_v48  ;;  %v6931_v48 = vor.u32 %v8367_v58, %v6928_v59  ;;  %v8369_v52 = vld [vmem:[#allocation14 + $0xa0] sm:$0xf0] }
 0x1ed   :  { %v1820_v39 = vmax.f32 %v1817_v60, 0.0  ;;  %v6915_v60 = vor.u32 %v8365_v53, %v6914_v51  ;;  %v6854_v51 = vld [vmem:[#allocation14] sm:$0xf]  ;;  %v8350_v53 = vld [vmem:[#allocation14 + $0x8] sm:$0xf0] }
 0x1ee   :  { %v1823_v61 = vld [vmem:[#allocation3] ss:$2 sm:$0xf]  ;;  %v1826_v62 = vld [vmem:[#allocation3 + $0x1] ss:$2 sm:$0xf] }
 0x1ef   :  { %1822 = vst [vmem:[#allocation3 + $0x8] sm:$0xf] %v1820_v39  ;;  %v1824_v63 = vpack.c.bf16 %v1823_v61, %v1823_v61  ;;  %v1827_v1 = vpack.c.bf16 %v1826_v62, %v1826_v62  ;;  %v6902_v39 = vld [vmem:[#allocation14 + $0x60] sm:$0xf]  ;;  %v6935_v61 = vor.u32 %v8369_v52, %v6934_v38  ;;  %v8364_v62 = vld [vmem:[#allocation14 + $0x7c] sm:$0xf] }
 0x1f0   :  { %v6948_v52 = vld [vmem:[%s10324_s29 + $0x40] ss:$2 sm:$0xff] }
 0x1f1   :  { %2169 = vmatmul.bf16.vlgmr.msrb.gmra.mxu3 %v1824_v63  ;;  %2182 = vmatmul.bf16.vlgmr.msra.gmra.mxu0 %v1827_v1  ;;  %v6916_v63 = vld [vmem:[#allocation14 + $0x84] sm:$0xf0] }
 0x1f2   :  { %2638 = vmatpush.bf16.msrb.mxu3 %v6939_v35  ;;  %2651 = vmatpush.bf16.msra.mxu0 %v6943_v54  ;;  %v6919_v8 = vor.u32 %v8364_v62, %v6916_v63  ;;  %v6899_v35 = vor.u32 %v8360_v29, %v6898_v28  ;;  %v8373_v62 = vld [vmem:[#allocation5] sm:$0xff]  ;;  %v8383_v29 = vld [vmem:[#allocation5 + $0x50] sm:$0xff] }
 0x1f3   :  { %v8352_v63 = vld [vmem:[#allocation14 + $0x1c] sm:$0xf] }
 0x1f6   :  { %v1829_v50 = vld [vmem:[#allocation3 + $0x2] ss:$2 sm:$0xf]  ;;  %v1832_v2 = vld [vmem:[#allocation3 + $0x3] ss:$2 sm:$0xf]  ;;  %2639 = vmatpush.bf16.msrb.mxu3 %v6927_v44  ;;  %2652 = vmatpush.bf16.msra.mxu0 %v6931_v48  ;;  %v6883_v44 = vor.u32 %v8355_v36, %v6880_v37 }
 0x1f7   :  { %v1830_v3 = vpack.c.bf16 %v1829_v50, %v1829_v50  ;;  %v1833_v4 = vpack.c.bf16 %v1832_v2, %v1832_v2  ;;  %v1835_v5 = vld [vmem:[#allocation3 + $0x4] ss:$2 sm:$0xf]  ;;  %v8382_v36 = vld [vmem:[#allocation5 + $0x48] sm:$0xff] }
 0x1f8   :  { %v1836_v6 = vpack.c.bf16 %v1835_v5, %v1835_v5  ;;  %v8362_v2 = vld [vmem:[#allocation14 + $0x68] sm:$0xf0]  ;;  %v8392_v37 = vld [vmem:[#allocation5 + $0x98] sm:$0xff] }
 0x1f9   :  { %2195 = vmatmul.bf16.vlgmr.msra.gmra.mxu1 %v1830_v3  ;;  %2208 = vmatmul.bf16.vlgmr.msra.gmra.mxu2 %v1833_v4  ;;  %v6922_v3 = vld [vmem:[#allocation14 + $0x80] sm:$0xf]  ;;  %v8366_v4 = vld [vmem:[#allocation14 + $0x88] sm:$0xf0]  ;;  %v6903_v9 = vor.u32 %v8362_v2, %v6902_v39  ;;  %v2685_v39 = vpack.c.bf16 %v6948_v52, %v6948_v52  ;;  %v8444_v52 = vld [vmem:[#allocation5 + $0x238] sm:$0xff] }
 0x1fa   :  { %3561 = vmatpush.bf16.msra.mxu2 %v8380_v33  ;;  %2664 = vmatpush.bf16.msra.mxu1 %v6947_v55  ;;  %v6923_v11 = vor.u32 %v8366_v4, %v6922_v3  ;;  %v8387_v4 = vld [vmem:[#allocation5 + $0x70] sm:$0xff] }
 0x1fb   :  { %2640 = vmatpush.bf16.msrb.mxu3 %v6915_v60  ;;  %2653 = vmatpush.bf16.msra.mxu0 %v6919_v8  ;;  %v6949_v60 = vld [vmem:[%s10324_s29 + $0x50] ss:$2 sm:$0xff]  ;;  %v2801_v2 = vunpack.c.l.b16 %v2685_v39 }
 0x1fe   :  { %3562 = vmatpush.bf16.msra.mxu2 %v8379_v43  ;;  %2665 = vmatpush.bf16.msra.mxu1 %v6935_v61  ;;  %v8357_v43 = vld [vmem:[#allocation14 + $0x40] sm:$0xf0]  ;;  %v2686_v61 = vpack.c.bf16 %v6949_v60, %v6949_v60 }
 0x1ff   :  { %2641 = vmatpush.bf16.msrb.mxu3 %v6903_v9  ;;  %2654 = vmatpush.bf16.msra.mxu0 %v6907_v17  ;;  %v8412_v9 = vld [vmem:[#allocation5 + $0x138] sm:$0xff]  ;;  %v8411_v17 = vld [vmem:[#allocation5 + $0x130] sm:$0xff] }
 0x200   :  { %v2802_v3 = vunpack.c.l.b16 %v2686_v61 }
 0x201   :  { %2221 = vmatmul.bf16.vlgmr.msra.gmra.mxu3 %v1836_v6 }
 0x202   :  { %3563 = vmatpush.bf16.msra.mxu2 %v8378_v46  ;;  %2666 = vmatpush.bf16.msra.mxu1 %v6923_v11  ;;  %v8388_v46 = vld [vmem:[#allocation5 + $0x78] sm:$0xff]  ;;  %v2805_v8 = vpack.c.b16 %v2802_v3, %v2801_v2 }
 0x203   :  { %2642 = vmatpush.bf16.msrb.mxu3 %v6891_v20  ;;  %2655 = vmatpush.bf16.msra.mxu0 %v6895_v32  ;;  %v6856_v11 = vld [vmem:[#allocation14 + $0xc] sm:$0xf0] }
 0x204   :  { %v6859_v0 = vor.u32 %v8349_v10, %v6856_v11  ;;  %v8395_v20 = vld [vmem:[#allocation5 + $0xb0] sm:$0xff]  ;;  %v8428_v10 = vld [vmem:[#allocation5 + $0x1b8] sm:$0xff] }
 0x205   :  { %v8436_v11 = vld [vmem:[#allocation5 + $0x1f8] sm:$0xff] }
 0x206   :  { %3564 = vmatpush.bf16.msra.mxu2 %v8377_v7  ;;  %2667 = vmatpush.bf16.msra.mxu1 %v6911_v22  ;;  %v8410_v22 = vld [vmem:[#allocation5 + $0x128] sm:$0xff] }
 0x207   :  { %2656 = vmatpush.bf16.msra.mxu0 %v6883_v44  ;;  %v8391_v44 = vld [vmem:[#allocation5 + $0x90] sm:$0xff] }
 0x20a   :  { %3565 = vmatpush.bf16.msra.mxu2 %v8376_v16  ;;  %2668 = vmatpush.bf16.msra.mxu1 %v6899_v35  ;;  %v8404_v16 = vld [vmem:[#allocation5 + $0xf8] sm:$0xff]  ;;  %v8401_v35 = vld [vmem:[#allocation5 + $0xe0] sm:$0xff] }
 0x26e   :  { %v2183_v27 = vpop.f32.mrf.mxu0 }
 0x274   :  { %v2170_v30 = vpop.f32.mrf.mxu3 }
 0x275   :  { %v2171_v57 = vadd.f32 %v8687_v34, %v2170_v30  ;;  %v8375_v30 = vld [vmem:[#allocation5 + $0x10] sm:$0xff] }
 0x276   :  { %v2185_v40 = vpop.f32.mrf.mxu0  ;;  %v2196_v41 = vpop.f32.mrf.mxu1  ;;  %3566 = vmatpush.bf16.msra.mxu2 %v8375_v30  ;;  %v6951_v30 = vld [vmem:[%s10324_s29 + $0x70] ss:$2 sm:$0xf] }
 0x277   :  { %v2184_v5 = vadd.f32 %v2183_v27, %v2171_v57  ;;  %v8356_v27 = vld [vmem:[#allocation14 + $0x38] sm:$0xf0]  ;;  %v8353_v40 = vld [vmem:[#allocation14 + $0x20] sm:$0xf0]  ;;  %v6855_v57 = vor.u32 %v8350_v53, %v6854_v51 }
 0x278   :  { %v6879_v34 = vor.u32 %v8356_v27, %v6878_v21  ;;  %v6867_v45 = vor.u32 %v8353_v40, %v6866_v31  ;;  %v8403_v21 = vld [vmem:[#allocation5 + $0xf0] sm:$0xff]  ;;  %v8409_v27 = vld [vmem:[#allocation5 + $0x120] sm:$0xff]  ;;  %v2688_v31 = vpack.c.bf16 %v6951_v30, %v6951_v30  ;;  %v8398_v53 = vld [vmem:[#allocation5 + $0xc8] sm:$0xff] }
 0x279   :  { %v2197_v15 = vadd.f32 %v2196_v41, %v2184_v5  ;;  %v6886_v41 = vld [vmem:[#allocation14 + $0x38] sm:$0xf]  ;;  %v6874_v5 = vld [vmem:[#allocation14 + $0x20] sm:$0xf]  ;;  %v2284_v51 = vld [vmem:[#allocation13] sm:$0x1] }
 0x27a   :  { %2643 = vmatpush.bf16.msrb.mxu3 %v6879_v34  ;;  %v6887_v47 = vor.u32 %v8357_v43, %v6886_v41  ;;  %3567 = vmatpush.bf16.msra.mxu2 %v8374_v42  ;;  %v2804_v34 = vunpack.c.l.b16 %v2688_v31  ;;  %v8407_v41 = vld [vmem:[#allocation5 + $0x110] sm:$0xff]  ;;  %v8400_v43 = vld [vmem:[#allocation5 + $0xd8] sm:$0xff]  ;;  %v8381_v42 = vld [vmem:[#allocation5 + $0x40] sm:$0xff] }
 0x27b   :  { %v8418_v30 = vld [vmem:[#allocation5 + $0x168] sm:$0xff] }
 0x27c   :  { %v2172_v1 = vpop.f32.mrf.mxu3  ;;  %v2209_v50 = vpop.f32.mrf.mxu2  ;;  %2669 = vmatpush.bf16.msra.mxu1 %v6887_v47  ;;  %v8399_v47 = vld [vmem:[#allocation5 + $0xd0] sm:$0xff] }
 0x27d   :  { %v2210_v19 = vadd.f32 %v2209_v50, %v2197_v15  ;;  %v6868_v1 = vld [vmem:[#allocation14 + $0x24] sm:$0xf0]  ;;  %v6863_v15 = vor.u32 %v8351_v14, %v6862_v13  ;;  %v6956_v13 = vld [vmem:[%s10324_s29 + $0x42] ss:$2 sm:$0xff] }
 0x27e   :  { %v2198_v6 = vpop.f32.mrf.mxu1  ;;  %2644 = vmatpush.bf16.msrb.mxu3 %v6867_v45  ;;  %v6871_v50 = vor.u32 %v8352_v63, %v6868_v1  ;;  %3568 = vmatpush.bf16.msra.mxu2 %v8373_v62  ;;  %v8406_v45 = vld [vmem:[#allocation5 + $0x108] sm:$0xff]  ;;  %v8397_v62 = vld [vmem:[#allocation5 + $0xc0] sm:$0xff]  ;;  %v8443_v63 = vld [vmem:[#allocation5 + $0x230] sm:$0xff] }
 0x27f   :  { %v8354_v6 = vld [vmem:[#allocation14 + $0x28] sm:$0xf0]  ;;  %v6957_v14 = vld [vmem:[%s10324_s29 + $0x52] ss:$2 sm:$0xff] }
 0x280   :  { %2657 = vmatpush.bf16.msra.mxu0 %v6871_v50  ;;  %v6875_v7 = vor.u32 %v8354_v6, %v6874_v5  ;;  %v8442_v6 = vld [vmem:[#allocation5 + $0x228] sm:$0xff] }
 0x282   :  { %2645 = vmatpush.bf16.msrb.mxu3 %v6855_v57  ;;  %2670 = vmatpush.bf16.msra.mxu1 %v6875_v7 }
 0x284   :  { %v2211_v25 = vpop.f32.mrf.mxu2  ;;  %v2222_v26 = vpop.f32.mrf.mxu3  ;;  %2658 = vmatpush.bf16.msra.mxu0 %v6859_v0  ;;  %v6952_v0 = vld [vmem:[%s10324_s29 + $0x41] ss:$2 sm:$0xff] }
 0x285   :  { %v2223_v18 = vadd.f32 %v2222_v26, %v2210_v19  ;;  %v8385_v19 = vld [vmem:[#allocation5 + $0x60] sm:$0xff]  ;;  %v6950_v25 = vld [vmem:[%s10324_s29 + $0x60] ss:$2 sm:$0xff]  ;;  %v8402_v26 = vld [vmem:[#allocation5 + $0xe8] sm:$0xff] }
 0x286   :  { %3580 = vmatpush.bf16.msra.mxu3 %v8388_v46  ;;  %2671 = vmatpush.bf16.msra.mxu1 %v6863_v15  ;;  %v2687_v28 = vpack.c.bf16 %v6950_v25, %v6950_v25  ;;  %v6960_v15 = vld [vmem:[%s10324_s29 + $0x43] ss:$2 sm:$0xff] }
 0x287   :  { %v2226_v33 = vmax.f32 %v2223_v18, 0.0  ;;  %v8393_v18 = vld [vmem:[#allocation5 + $0xa0] sm:$0xff]  ;;  %v2721_v31 = vpack.c.bf16 %v6960_v15, %v6960_v15  ;;  %v8430_v15 = vld [vmem:[#allocation5 + $0x1c8] sm:$0xff] }
 0x288   :  { %v2803_v32 = vunpack.c.l.b16 %v2687_v28 }
 0x289   :  { %2227 = vst [vmem:[#allocation4] sm:$0xf] %v2226_v33  ;;  %v8408_v33 = vld [vmem:[#allocation5 + $0x118] sm:$0xff] }
 0x28a   :  { %3581 = vmatpush.bf16.msra.mxu3 %v8387_v4  ;;  %v2806_v40 = vpack.c.b16 %v2804_v34, %v2803_v32 }
 0x28c   :  { %v2224_v49 = vpop.f32.mrf.mxu3 }
 0x28d   :  { %v8390_v49 = vld [vmem:[#allocation5 + $0x88] sm:$0xff] }
 0x28e   :  { %3582 = vmatpush.bf16.msra.mxu3 %v8386_v12  ;;  %v6953_v12 = vld [vmem:[%s10324_s29 + $0x51] ss:$2 sm:$0xff] }
 0x28f   :  { %v2698_v28 = vpack.c.bf16 %v6953_v12, %v6953_v12 }
 0x290   :  { %v2228_v54 = vld [vmem:[#allocation4] ss:$2 sm:$0x1]  ;;  %v2231_v55 = vld [vmem:[#allocation4 + $0x1] ss:$2 sm:$0x1] }
 0x291   :  { %v2229_v58 = vpack.c.bf16 %v2228_v54, %v2228_v54  ;;  %v2232_v59 = vpack.c.bf16 %v2231_v55, %v2231_v55  ;;  %v2234_v38 = vld [vmem:[#allocation4 + $0x2] ss:$2 sm:$0x1]  ;;  %v8405_v54 = vld [vmem:[#allocation5 + $0x100] sm:$0xff] }
 0x292   :  { %v2235_v48 = vpack.c.bf16 %v2234_v38, %v2234_v38  ;;  %3583 = vmatpush.bf16.msra.mxu3 %v8385_v19  ;;  %v6965_v38 = vld [vmem:[%s10324_s29 + $0x54] ss:$2 sm:$0xff] }
 0x293   :  { %2437 = vmatmul.bf16.vlgmr.msrb.gmra.mxu0 %v2229_v58  ;;  %2450 = vmatmul.bf16.vlgmr.msrb.gmra.mxu1 %v2232_v59  ;;  %v8389_v58 = vld [vmem:[#allocation5 + $0x80] sm:$0xff]  ;;  %v8427_v19 = vld [vmem:[#allocation5 + $0x1b0] sm:$0xff] }
 0x294   :  { %2463 = vmatmul.bf16.vlgmr.msrb.gmra.mxu2 %v2235_v48  ;;  %3599 = vmatpush.bf16.msrb.mxu0 %v8396_v56  ;;  %v6964_v59 = vld [vmem:[%s10324_s29 + $0x44] ss:$2 sm:$0xff]  ;;  %v2734_v48 = vpack.c.bf16 %v6965_v38, %v6965_v38 }
 0x295   :  { %3637 = vmatpush.bf16.msrb.mxu2 %v8412_v9  ;;  %3618 = vmatpush.bf16.msrb.mxu1 %v8404_v16  ;;  %v2733_v46 = vpack.c.bf16 %v6964_v59, %v6964_v59  ;;  %v8419_v56 = vld [vmem:[#allocation5 + $0x170] sm:$0xff]  ;;  %v8416_v59 = vld [vmem:[#allocation5 + $0x158] sm:$0xff] }
 0x296   :  { %3584 = vmatpush.bf16.msra.mxu3 %v8384_v23  ;;  %v2850_v61 = vunpack.c.l.b16 %v2734_v48  ;;  %v6967_v23 = vld [vmem:[%s10324_s29 + $0x74] ss:$2 sm:$0xf]  ;;  %v8424_v38 = vld [vmem:[#allocation5 + $0x198] sm:$0xff] }
 0x297   :  { %v2849_v39 = vunpack.c.l.b16 %v2733_v46  ;;  %v2736_v25 = vpack.c.bf16 %v6967_v23, %v6967_v23  ;;  %v8432_v46 = vld [vmem:[#allocation5 + $0x1d8] sm:$0xff] }
 0x298   :  { %3600 = vmatpush.bf16.msrb.mxu0 %v8395_v20  ;;  %v8441_v20 = vld [vmem:[#allocation5 + $0x220] sm:$0xff]  ;;  %v6954_v48 = vld [vmem:[%s10324_s29 + $0x61] ss:$2 sm:$0xff] }
 0x299   :  { %3638 = vmatpush.bf16.msrb.mxu2 %v8411_v17  ;;  %3619 = vmatpush.bf16.msrb.mxu1 %v8403_v21  ;;  %v2853_v1 = vpack.c.b16 %v2850_v61, %v2849_v39  ;;  %v6961_v17 = vld [vmem:[%s10324_s29 + $0x53] ss:$2 sm:$0xff]  ;;  %v2852_v34 = vunpack.c.l.b16 %v2736_v25  ;;  %v6959_v61 = vld [vmem:[%s10324_s29 + $0x72] ss:$2 sm:$0xf]  ;;  %v8452_v25 = vld [vmem:[#allocation5 + $0x278] sm:$0xff] }
 0x29a   :  { %3585 = vmatpush.bf16.msra.mxu3 %v8383_v29  ;;  %v8435_v21 = vld [vmem:[#allocation5 + $0x1f0] sm:$0xff]  ;;  %v2709_v29 = vpack.c.bf16 %v6956_v13, %v6956_v13  ;;  %v2722_v32 = vpack.c.bf16 %v6961_v17, %v6961_v17 }
 0x29b   :  { %v8415_v39 = vld [vmem:[#allocation5 + $0x150] sm:$0xff] }
 0x29c   :  { %3601 = vmatpush.bf16.msrb.mxu0 %v8394_v24 }
 0x29d   :  { %3639 = vmatpush.bf16.msrb.mxu2 %v8410_v22  ;;  %3620 = vmatpush.bf16.msrb.mxu1 %v8402_v26  ;;  %v6966_v22 = vld [vmem:[%s10324_s29 + $0x64] ss:$2 sm:$0xff] }
 0x29e   :  { %3586 = vmatpush.bf16.msra.mxu3 %v8382_v36  ;;  %v2735_v24 = vpack.c.bf16 %v6966_v22, %v6966_v22  ;;  %v8440_v26 = vld [vmem:[#allocation5 + $0x218] sm:$0xff]  ;;  %v8434_v36 = vld [vmem:[#allocation5 + $0x1e8] sm:$0xff] }
 0x2a0   :  { %3602 = vmatpush.bf16.msrb.mxu0 %v8393_v18  ;;  %v2710_v18 = vpack.c.bf16 %v6957_v14, %v6957_v14  ;;  %v8422_v14 = vld [vmem:[#allocation5 + $0x188] sm:$0xff] }
 0x2a1   :  { %3640 = vmatpush.bf16.msrb.mxu2 %v8409_v27  ;;  %3621 = vmatpush.bf16.msrb.mxu1 %v8401_v35  ;;  %v2697_v27 = vpack.c.bf16 %v6952_v0, %v6952_v0  ;;  %v8426_v35 = vld [vmem:[#allocation5 + $0x1a8] sm:$0xff] }
 0x2a2   :  { %3587 = vmatpush.bf16.msra.mxu3 %v8381_v42  ;;  %v2825_v42 = vunpack.c.l.b16 %v2709_v29 }
 0x2a4   :  { %3569 = vmatmul.bf16.vlgmr.msra.gmra.mxu2 %v2805_v8  ;;  %3603 = vmatpush.bf16.msrb.mxu0 %v8392_v37  ;;  %v8420_v8 = vld [vmem:[#allocation5 + $0x178] sm:$0xff] }
 0x2a5   :  { %3641 = vmatpush.bf16.msrb.mxu2 %v8408_v33  ;;  %3622 = vmatpush.bf16.msrb.mxu1 %v8400_v43  ;;  %v2851_v33 = vunpack.c.l.b16 %v2735_v24  ;;  %v2814_v43 = vunpack.c.l.b16 %v2698_v28  ;;  %v8413_v24 = vld [vmem:[#allocation5 + $0x140] sm:$0xff] }
 0x2a7   :  { %v2854_v37 = vpack.c.b16 %v2852_v34, %v2851_v33  ;;  %v6972_v33 = vld [vmem:[%s10324_s29 + $0x46] ss:$2 sm:$0xff] }
 0x2a8   :  { %3604 = vmatpush.bf16.msrb.mxu0 %v8391_v44  ;;  %v2826_v44 = vunpack.c.l.b16 %v2710_v18  ;;  %v6982_v34 = vld [vmem:[%s10324_s29 + $0x68] ss:$2 sm:$0xff] }
 0x2a9   :  { %3642 = vmatpush.bf16.msrb.mxu2 %v8407_v41  ;;  %3623 = vmatpush.bf16.msrb.mxu1 %v8399_v47  ;;  %v2813_v41 = vunpack.c.l.b16 %v2697_v27  ;;  %v2838_v47 = vunpack.c.l.b16 %v2722_v32  ;;  %v8429_v27 = vld [vmem:[#allocation5 + $0x1c0] sm:$0xff] }
 0x2aa   :  { %v6969_v32 = vld [vmem:[%s10324_s29 + $0x55] ss:$2 sm:$0xff] }
 0x2ac   :  { %3605 = vmatpush.bf16.msrb.mxu0 %v8390_v49  ;;  %v8417_v49 = vld [vmem:[#allocation5 + $0x160] sm:$0xff] }
 0x2ad   :  { %3643 = vmatpush.bf16.msrb.mxu2 %v8406_v45  ;;  %3624 = vmatpush.bf16.msrb.mxu1 %v8398_v53  ;;  %v2837_v45 = vunpack.c.l.b16 %v2721_v31  ;;  %v8433_v53 = vld [vmem:[#allocation5 + $0x1e0] sm:$0xff] }
 0x2ae   :  { %v6968_v31 = vld [vmem:[%s10324_s29 + $0x45] ss:$2 sm:$0xff] }
 0x2b0   :  { %3606 = vmatpush.bf16.msrb.mxu0 %v8389_v58  ;;  %v2841_v58 = vpack.c.b16 %v2838_v47, %v2837_v45  ;;  %v2746_v47 = vpack.c.bf16 %v6969_v32, %v6969_v32 }
 0x2b1   :  { %3644 = vmatpush.bf16.msrb.mxu2 %v8405_v54  ;;  %3625 = vmatpush.bf16.msrb.mxu1 %v8397_v62  ;;  %v8438_v54 = vld [vmem:[#allocation5 + $0x208] sm:$0xff]  ;;  %v6962_v62 = vld [vmem:[%s10324_s29 + $0x63] ss:$2 sm:$0xff] }
 0x2b2   :  { %v2723_v0 = vpack.c.bf16 %v6962_v62, %v6962_v62 }
 0x2b4   :  { %3574 = vmatmul.bf16.gmra.mxu2 %v2806_v40  ;;  %v8439_v40 = vld [vmem:[#allocation5 + $0x210] sm:$0xff]  ;;  %v2839_v22 = vunpack.c.l.b16 %v2723_v0 }
 0x2b5   :  { %3713 = vmatpush.bf16.msra.mxu2 %v8444_v52  ;;  %v6955_v52 = vld [vmem:[%s10324_s29 + $0x71] ss:$2 sm:$0xf] }
 0x2b9   :  { %3714 = vmatpush.bf16.msra.mxu2 %v8443_v63  ;;  %v6963_v63 = vld [vmem:[%s10324_s29 + $0x73] ss:$2 sm:$0xf] }
 0x2ba   :  { %v2724_v12 = vpack.c.bf16 %v6963_v63, %v6963_v63 }
 0x2bc   :  { %v2840_v23 = vunpack.c.l.b16 %v2724_v12 }
 0x2bd   :  { %3715 = vmatpush.bf16.msra.mxu2 %v8442_v6 }
 0x2be   :  { %v2842_v18 = vpack.c.b16 %v2840_v23, %v2839_v22  ;;  %v6984_v23 = vld [vmem:[%s10324_s29 + $0x49] ss:$2 sm:$0xff] }
 0x2c1   :  { %3716 = vmatpush.bf16.msra.mxu2 %v8441_v20 }
 0x2c4   :  { %3645 = vmatmul.bf16.vlgmr.msrb.gmra.mxu2 %v2853_v1  ;;  %v8423_v1 = vld [vmem:[#allocation5 + $0x190] sm:$0xff] }
 0x2c5   :  { %3717 = vmatpush.bf16.msra.mxu2 %v8440_v26  ;;  %v8421_v26 = vld [vmem:[#allocation5 + $0x180] sm:$0xff] }
 0x2c9   :  { %3718 = vmatpush.bf16.msra.mxu2 %v8439_v40  ;;  %v8450_v40 = vld [vmem:[#allocation5 + $0x268] sm:$0xff] }
 0x2cd   :  { %3719 = vmatpush.bf16.msra.mxu2 %v8438_v54 }
 0x2d4   :  { %3650 = vmatmul.bf16.gmra.mxu2 %v2854_v37  ;;  %v2783_v37 = vpack.c.bf16 %v6982_v34, %v6982_v34 }
 0x2d6   :  { %v2899_v45 = vunpack.c.l.b16 %v2783_v37 }
 0x310   :  { %v2438_v55 = vpop.f32.mrf.mxu0  ;;  %v2451_v57 = vpop.f32.mrf.mxu1 }
 0x311   :  { %v2439_v60 = vadd.f32 %v2438_v55, %v2284_v51  ;;  %v8425_v51 = vld [vmem:[#allocation5 + $0x1a0] sm:$0xff]  ;;  %v2817_v55 = vpack.c.b16 %v2814_v43, %v2813_v41 }
 0x312   :  { %v6976_v41 = vld [vmem:[%s10324_s29 + $0x47] ss:$2 sm:$0xff]  ;;  %v6977_v43 = vld [vmem:[%s10324_s29 + $0x57] ss:$2 sm:$0xff] }
 0x313   :  { %v2452_v50 = vadd.f32 %v2451_v57, %v2439_v60  ;;  %v2829_v57 = vpack.c.b16 %v2826_v44, %v2825_v42  ;;  %v6958_v60 = vld [vmem:[%s10324_s29 + $0x62] ss:$2 sm:$0xff]  ;;  %v2745_v44 = vpack.c.bf16 %v6968_v31, %v6968_v31  ;;  %v2769_v54 = vpack.c.bf16 %v6976_v41, %v6976_v41 }
 0x317   :  { %v2464_v2 = vpop.f32.mrf.mxu2 }
 0x318   :  { %v2465_v3 = vadd.f32 %v2464_v2, %v2452_v50  ;;  %v2440_v4 = vpop.f32.mrf.mxu0  ;;  %v2453_v5 = vpop.f32.mrf.mxu1  ;;  %v8437_v50 = vld [vmem:[#allocation5 + $0x200] sm:$0xff]  ;;  %v8431_v2 = vld [vmem:[#allocation5 + $0x1d0] sm:$0xff] }
 0x319   :  { %v6981_v4 = vld [vmem:[%s10324_s29 + $0x58] ss:$2 sm:$0xff]  ;;  %3720 = vmatpush.bf16.msra.mxu2 %v8437_v50  ;;  %v6970_v50 = vld [vmem:[%s10324_s29 + $0x65] ss:$2 sm:$0xff] }
 0x31a   :  { %v2468_v7 = vmax.f32 %v2465_v3, 0.0  ;;  %v6980_v3 = vld [vmem:[%s10324_s29 + $0x48] ss:$2 sm:$0xff]  ;;  %v2782_v6 = vpack.c.bf16 %v6981_v4, %v6981_v4 }
 0x31b   :  { %v2781_v5 = vpack.c.bf16 %v6980_v3, %v6980_v3  ;;  %v6974_v3 = vld [vmem:[%s10324_s29 + $0x66] ss:$2 sm:$0xff]  ;;  %v6975_v4 = vld [vmem:[%s10324_s29 + $0x76] ss:$2 sm:$0xf] }
 0x31c   :  { %v2469_v9 = vpack.c.bf16 %v2468_v7, %v2468_v7  ;;  %v2699_v7 = vpack.c.bf16 %v6954_v48, %v6954_v48  ;;  %v2898_v13 = vunpack.c.l.b16 %v2782_v6  ;;  %v6978_v6 = vld [vmem:[%s10324_s29 + $0x67] ss:$2 sm:$0xff] }
 0x31d   :  { %v2771_v0 = vpack.c.bf16 %v6978_v6, %v6978_v6 }
 0x31e   :  { %2646 = vmatmul.bf16.vlgmr.msrb.gmra.mxu3 %v2469_v9  ;;  %2659 = vmatmul.bf16.vlgmr.msra.gmra.mxu0 %v2469_v9  ;;  %v2815_v17 = vunpack.c.l.b16 %v2699_v7  ;;  %v6979_v7 = vld [vmem:[%s10324_s29 + $0x77] ss:$2 sm:$0xf] }
 0x31f   :  { %2672 = vmatmul.bf16.vlgmr.msra.gmra.mxu1 %v2469_v9  ;;  %v2466_v16 = vpop.f32.mrf.mxu2  ;;  %3656 = vmatpush.bf16.msrb.mxu3 %v8420_v8  ;;  %v2700_v8 = vpack.c.bf16 %v6955_v52, %v6955_v52  ;;  %v2711_v9 = vpack.c.bf16 %v6958_v60, %v6958_v60  ;;  %v2885_v52 = vunpack.c.l.b16 %v2769_v54  ;;  %v2772_v12 = vpack.c.bf16 %v6979_v7, %v6979_v7 }
 0x320   :  { %3675 = vmatpush.bf16.msra.mxu0 %v8428_v10  ;;  %3694 = vmatpush.bf16.msra.mxu1 %v8436_v11  ;;  %v2712_v10 = vpack.c.bf16 %v6959_v61, %v6959_v61  ;;  %v8414_v11 = vld [vmem:[#allocation5 + $0x148] sm:$0xff] }
 0x321   :  { %v2827_v20 = vunpack.c.l.b16 %v2711_v9 }
 0x323   :  { %3657 = vmatpush.bf16.msrb.mxu3 %v8419_v56  ;;  %v2897_v56 = vunpack.c.l.b16 %v2781_v5  ;;  %v8446_v5 = vld [vmem:[#allocation5 + $0x248] sm:$0xff] }
 0x324   :  { %3676 = vmatpush.bf16.msra.mxu0 %v8427_v19  ;;  %3695 = vmatpush.bf16.msra.mxu1 %v8435_v21  ;;  %v2816_v19 = vunpack.c.l.b16 %v2700_v8  ;;  %v2828_v21 = vunpack.c.l.b16 %v2712_v10  ;;  %v2747_v8 = vpack.c.bf16 %v6970_v50, %v6970_v50  ;;  %v2759_v10 = vpack.c.bf16 %v6974_v3, %v6974_v3 }
 0x325   :  { %v2901_v16 = vpack.c.b16 %v2898_v13, %v2897_v56  ;;  %v8445_v56 = vld [vmem:[#allocation5 + $0x240] sm:$0xff] }
 0x326   :  { %v2818_v28 = vpack.c.b16 %v2816_v19, %v2815_v17  ;;  %v2830_v29 = vpack.c.b16 %v2828_v21, %v2827_v20  ;;  %v2863_v13 = vunpack.c.l.b16 %v2747_v8  ;;  %v2887_v17 = vunpack.c.l.b16 %v2771_v0 }
 0x327   :  { %3658 = vmatpush.bf16.msrb.mxu3 %v8418_v30  ;;  %3721 = vmatmul.bf16.vlgmr.msra.gmra.mxu2 %v2901_v16  ;;  %v8451_v30 = vld [vmem:[#allocation5 + $0x270] sm:$0xff]  ;;  %v2888_v19 = vunpack.c.l.b16 %v2772_v12  ;;  %v9804_v37 = vpop.f32.mrf.mxu2 }
 0x328   :  { %3677 = vmatpush.bf16.msra.mxu0 %v8426_v35  ;;  %3696 = vmatpush.bf16.msra.mxu1 %v8434_v36  ;;  %v6973_v35 = vld [vmem:[%s10324_s29 + $0x56] ss:$2 sm:$0xff] }
 0x329   :  { %v6983_v36 = vld [vmem:[%s10324_s29 + $0x78] ss:$2 sm:$0xf]  ;;  %v2890_v22 = vpack.c.b16 %v2888_v19, %v2887_v17 }
 0x32a   :  { %v2784_v42 = vpack.c.bf16 %v6983_v36, %v6983_v36  ;;  %v2502_v36 = vld [vmem:[#allocation17] sm:$0x7] }
 0x32b   :  { %3659 = vmatpush.bf16.msrb.mxu3 %v8417_v49  ;;  %v2757_v49 = vpack.c.bf16 %v6972_v33, %v6972_v33  ;;  %v2633_v41 = vperm.slane %v2502_v36, 1 }
 0x32c   :  { %3678 = vmatpush.bf16.msra.mxu0 %v8425_v51  ;;  %3697 = vmatpush.bf16.msra.mxu1 %v8433_v53  ;;  %v2758_v51 = vpack.c.bf16 %v6973_v35, %v6973_v35  ;;  %v2900_v53 = vunpack.c.l.b16 %v2784_v42 }
 0x32e   :  { %3588 = vmatmul.bf16.vlgmr.msra.gmra.mxu3 %v2817_v55  ;;  %3607 = vmatmul.bf16.vlgmr.msrb.gmra.mxu0 %v2829_v57  ;;  %v2770_v55 = vpack.c.bf16 %v6977_v43, %v6977_v43  ;;  %v8449_v57 = vld [vmem:[#allocation5 + $0x260] sm:$0xff]  ;;  %v2874_v48 = vunpack.c.l.b16 %v2758_v51 }
 0x32f   :  { %3626 = vmatmul.bf16.vlgmr.msrb.gmra.mxu1 %v2841_v58  ;;  %3660 = vmatpush.bf16.msrb.mxu3 %v8416_v59  ;;  %v2902_v58 = vpack.c.b16 %v2900_v53, %v2899_v45  ;;  %v2861_v59 = vunpack.c.l.b16 %v2745_v44  ;;  %v9811_v53 = vpop.f32.mrf.mxu2 }
 0x330   :  { %3679 = vmatpush.bf16.msra.mxu0 %v8424_v38  ;;  %3698 = vmatpush.bf16.msra.mxu1 %v8432_v46  ;;  %v2862_v38 = vunpack.c.l.b16 %v2746_v47  ;;  %v2873_v46 = vunpack.c.l.b16 %v2757_v49  ;;  %v2886_v60 = vunpack.c.l.b16 %v2770_v55  ;;  %v2632_v49 = vperm.slane %v2502_v36, 0 }
 0x332   :  { %v2865_v61 = vpack.c.b16 %v2862_v38, %v2861_v59  ;;  %v2877_v62 = vpack.c.b16 %v2874_v48, %v2873_v46  ;;  %v2889_v63 = vpack.c.b16 %v2886_v60, %v2885_v52 }
 0x333   :  { %3661 = vmatpush.bf16.msrb.mxu3 %v8415_v39  ;;  %v8448_v39 = vld [vmem:[#allocation5 + $0x258] sm:$0xff] }
 0x334   :  { %3680 = vmatpush.bf16.msra.mxu0 %v8423_v1  ;;  %3699 = vmatpush.bf16.msra.mxu1 %v8431_v2  ;;  %v8447_v1 = vld [vmem:[#allocation5 + $0x250] sm:$0xff]  ;;  %v6971_v2 = vld [vmem:[%s10324_s29 + $0x75] ss:$2 sm:$0xf] }
 0x335   :  { %v2748_v9 = vpack.c.bf16 %v6971_v2, %v6971_v2 }
 0x337   :  { %3662 = vmatpush.bf16.msrb.mxu3 %v8414_v11  ;;  %3726 = vmatmul.bf16.gmra.mxu2 %v2902_v58  ;;  %v2760_v11 = vpack.c.bf16 %v6975_v4, %v6975_v4  ;;  %v9814_v60 = vpop.f32.mrf.mxu2 }
 0x338   :  { %3681 = vmatpush.bf16.msra.mxu0 %v8422_v14  ;;  %3700 = vmatpush.bf16.msra.mxu1 %v8430_v15  ;;  %v2864_v14 = vunpack.c.l.b16 %v2748_v9  ;;  %v2875_v15 = vunpack.c.l.b16 %v2759_v10 }
 0x339   :  { %v2876_v16 = vunpack.c.l.b16 %v2760_v11 }
 0x33a   :  { %v2866_v20 = vpack.c.b16 %v2864_v14, %v2863_v13 }
 0x33b   :  { %3663 = vmatpush.bf16.msrb.mxu3 %v8413_v24  ;;  %v2878_v21 = vpack.c.b16 %v2876_v16, %v2875_v15  ;;  %v6985_v24 = vld [vmem:[%s10324_s29 + $0x59] ss:$2 sm:$0xff] }
 0x33c   :  { %3682 = vmatpush.bf16.msra.mxu0 %v8421_v26  ;;  %3701 = vmatpush.bf16.msra.mxu1 %v8429_v27  ;;  %v2794_v26 = vpack.c.bf16 %v6985_v24, %v6985_v24 }
 0x33e   :  { %3593 = vmatmul.bf16.gmra.mxu3 %v2818_v28  ;;  %3612 = vmatmul.bf16.gmra.mxu0 %v2830_v29  ;;  %v2910_v28 = vunpack.c.l.b16 %v2794_v26 }
 0x33f   :  { %3732 = vmatpush.bf16.msra.mxu3 %v8452_v25  ;;  %3631 = vmatmul.bf16.gmra.mxu1 %v2842_v18  ;;  %v2793_v25 = vpack.c.bf16 %v6984_v23, %v6984_v23  ;;  %v6986_v18 = vld [vmem:[%s10324_s29 + $0x69] ss:$2 sm:$0xff]  ;;  %v9818_v50 = vpop.f32.mrf.mxu2 }
 0x340   :  { %v2795_v31 = vpack.c.bf16 %v6986_v18, %v6986_v18  ;;  %v8460_v18 = vld [vmem:[%s10325_s9 + $0x38] sm:$0xff] }
 0x341   :  { %v2909_v27 = vunpack.c.l.b16 %v2793_v25  ;;  %4143 = vmatpush.bf16.msrb.mxu0 %v8460_v18 }
 0x342   :  { %v2911_v33 = vunpack.c.l.b16 %v2795_v31 }
 0x343   :  { %3733 = vmatpush.bf16.msra.mxu3 %v8451_v30  ;;  %v2913_v29 = vpack.c.b16 %v2910_v28, %v2909_v27  ;;  %v6987_v30 = vld [vmem:[%s10324_s29 + $0x79] ss:$2 sm:$0xf] }
 0x344   :  { %v2796_v32 = vpack.c.bf16 %v6987_v30, %v6987_v30 }
 0x346   :  { %v2912_v34 = vunpack.c.l.b16 %v2796_v32 }
 0x347   :  { %3734 = vmatpush.bf16.msra.mxu3 %v8450_v40  ;;  %v9806_v40 = vld [vmem:[#allocation19] sm:$0x7]  ;;  %v9827_v15 = vpop.f32.mrf.mxu2 }
 0x348   :  { %v2914_v35 = vpack.c.b16 %v2912_v34, %v2911_v33  ;;  %v5095_v43 = vperm.slane %v9806_v40, 1  ;;  %v5117_v12 = vperm.slane %v9806_v40, 2 }
 0x34b   :  { %3735 = vmatpush.bf16.msra.mxu3 %v8449_v57 }
 0x34e   :  { %3664 = vmatmul.bf16.vlgmr.msrb.gmra.mxu3 %v2865_v61  ;;  %3683 = vmatmul.bf16.vlgmr.msra.gmra.mxu0 %v2877_v62 }
 0x34f   :  { %3736 = vmatpush.bf16.msra.mxu3 %v8448_v39  ;;  %3702 = vmatmul.bf16.vlgmr.msra.gmra.mxu1 %v2889_v63  ;;  %v9840_v31 = vpop.f32.mrf.mxu2 }
 0x353   :  { %3737 = vmatpush.bf16.msra.mxu3 %v8447_v1 }
 0x357   :  { %3738 = vmatpush.bf16.msra.mxu3 %v8446_v5 }
 0x35b   :  { %3739 = vmatpush.bf16.msra.mxu3 %v8445_v56  ;;  %v2634_v56 = vperm.slane %v2502_v36, 2 }
 0x35e   :  { %3669 = vmatmul.bf16.gmra.mxu3 %v2866_v20  ;;  %3688 = vmatmul.bf16.gmra.mxu0 %v2878_v21 }
 0x35f   :  { %3707 = vmatmul.bf16.gmra.mxu1 %v2890_v22 }
 0x36e   :  { %3740 = vmatmul.bf16.vlgmr.msra.gmra.mxu3 %v2913_v29 }
 0x37e   :  { %3745 = vmatmul.bf16.gmra.mxu3 %v2914_v35  ;;  %v8459_v35 = vld [vmem:[%s10325_s9 + $0x30] sm:$0xff] }
 0x37f   :  { %4144 = vmatpush.bf16.msrb.mxu0 %v8459_v35  ;;  %v8472_v35 = vld [vmem:[%s10325_s9 + $0x98] sm:$0xff] }
 0x39b   :  { %v2660_v42 = vpop.f32.mrf.mxu0 }
 0x39c   :  { %v2661_v44 = vadd.f32 %v2660_v42, %v2633_v41  ;;  %v2673_v45 = vpop.f32.mrf.mxu1  ;;  %v9854_v42 = vld [vmem:[%s10326_s10] ss:$0 sm:$0xff] }
 0x39d   :  { %v2674_v23 = vadd.f32 %v2673_v45, %v2634_v56  ;;  %v8458_v45 = vld [vmem:[%s10325_s9 + $0x28] sm:$0xff]  ;;  %v8453_v56 = vld [vmem:[%s10325_s9] sm:$0xff]  ;;  %v3578_v18 = vadd.f32 %v9854_v42, %v9818_v50 }
 0x39e   :  { %v5097_v47 = vadd.f32 %v5095_v43, %v2661_v44  ;;  %4145 = vmatpush.bf16.msrb.mxu0 %v8458_v45  ;;  %v8490_v45 = vld [vmem:[%s10325_s9 + $0x128] sm:$0xff] }
 0x3a0   :  { %v7821_v51 = vmul.f32 -1.442695, %v5097_v47 }
 0x3a1   :  { %v2647_v54 = vpop.f32.mrf.mxu3 }
 0x3a2   :  { %8691 = vpow2.f32 %v7821_v51  ;;  %v2648_v55 = vadd.f32 %v2647_v54, %v2632_v49  ;;  %v3571_v49 = vadd.f32 %v9854_v42, %v9804_v37  ;;  %v9863_v51 = vpop.f32.mrf.mxu2  ;;  %v8457_v54 = vld [vmem:[%s10325_s9 + $0x20] sm:$0xff]  ;;  %v8456_v37 = vld [vmem:[%s10325_s9 + $0x18] sm:$0xff] }
 0x3a3   :  { %v2662_v57 = vpop.f32.mrf.mxu0  ;;  %4146 = vmatpush.bf16.msrb.mxu0 %v8457_v54  ;;  %v8479_v54 = vld [vmem:[%s10325_s9 + $0xd0] sm:$0xff] }
 0x3a4   :  { %v5074_v58 = vadd.f32 %v9806_v40, %v2648_v55  ;;  %v2675_v59 = vpop.f32.mrf.mxu1  ;;  %v8468_v55 = vld [vmem:[%s10325_s9 + $0x78] sm:$0xff] }
 0x3a5   :  { %4157 = vmatpush.bf16.msrb.mxu1 %v8468_v55  ;;  %v8467_v59 = vld [vmem:[%s10325_s9 + $0x70] sm:$0xff] }
 0x3a6   :  { %v7820_v38 = vmul.f32 -1.442695, %v5074_v58 }
 0x3a7   :  { %4147 = vmatpush.bf16.msrb.mxu0 %v8456_v37 }
 0x3a8   :  { %v8692_v46 = vpop.eup %8691  ;;  %8693 = vpow2.f32 %v7820_v38 }
 0x3a9   :  { %v5101_v48 = vadd.f32 1.0, %v8692_v46  ;;  %v2649_v52 = vpop.f32.mrf.mxu3  ;;  %4158 = vmatpush.bf16.msrb.mxu1 %v8467_v59 }
 0x3aa   :  { %v8455_v52 = vld [vmem:[%s10325_s9 + $0x10] sm:$0xff] }
 0x3ab   :  { %8695 = vrcp.f32 %v5101_v48  ;;  %v9820_v3 = vpop.f32.mrf.mxu0  ;;  %v5113_v22 = vand.u32 2147483648, %v5101_v48  ;;  %vm5107_vm5 = vweird.f32 %v5101_v48  ;;  %v5111_v25 = vand.u32 2147483647, %v5101_v48  ;;  %4148 = vmatpush.bf16.msrb.mxu0 %v8455_v52 }
 0x3ac   :  { %v9824_v9 = vpop.f32.mrf.mxu1 }
 0x3ad   :  { %v5114_v29 = vor.u32 1.1754944e-38, %v5113_v22  ;;  %vm5112_vm7 = vcmp.eq.f32.partialorder %v5111_v25, 8.507059e+37  ;;  %v8481_v25 = vld [vmem:[%s10325_s9 + $0xe0] sm:$0xff] }
 0x3ae   :  { %v8694_v39 = vpop.eup %8693 }
 0x3af   :  { %v5078_v61 = vadd.f32 1.0, %v8694_v39  ;;  %v3573_v39 = vadd.f32 %v9854_v42, %v9811_v53  ;;  %v8454_v53 = vld [vmem:[%s10325_s9 + $0x8] sm:$0xff] }
 0x3b0   :  { %4149 = vmatpush.bf16.msrb.mxu0 %v8454_v53 }
 0x3b1   :  { %8697 = vrcp.f32 %v5078_v61  ;;  %v9816_v62 = vpop.f32.mrf.mxu3  ;;  %v8696_v63 = vpop.eup %8695  ;;  %v5090_v8 = vand.u32 2147483648, %v5078_v61  ;;  %v5088_v11 = vand.u32 2147483647, %v5078_v61  ;;  %vm5084_vm1 = vweird.f32 %v5078_v61 }
 0x3b2   :  { %v5103_v1 = vmul.f32 %v8696_v63, %v5101_v48  ;;  %vm5108_vm4 = vweird.f32 %v8696_v63  ;;  %v3590_v58 = vadd.f32 %v9816_v62, %v3571_v49  ;;  %v8466_v62 = vld [vmem:[%s10325_s9 + $0x68] sm:$0xff]  ;;  %v8461_v49 = vld [vmem:[%s10325_s9 + $0x40] sm:$0xff] }
 0x3b3   :  { %v5091_v14 = vor.u32 1.1754944e-38, %v5090_v8  ;;  %vm5089_vm3 = vcmp.eq.f32.partialorder %v5088_v11, 8.507059e+37  ;;  %v9829_v20 = vpop.f32.mrf.mxu0  ;;  %vm5109_vm6 = vmor %vm5107_vm5, %vm5108_vm4  ;;  %4159 = vmatpush.bf16.msrb.mxu1 %v8466_v62 }
 0x3b4   :  { %v5104_v5 = vsub.f32 1.0, %v5103_v1  ;;  %v9835_v28 = vpop.f32.mrf.mxu1  ;;  %v3609_v48 = vadd.f32 %v9820_v3, %v3590_v58  ;;  %v9897_v1 = vpop.f32.mrf.mxu2  ;;  %4150 = vmatpush.bf16.msrb.mxu0 %v8453_v56 }
 0x3b6   :  { %v5105_v0 = vmul.f32 %v8696_v63, %v5104_v5 }
 0x3b7   :  { %v8698_v2 = vpop.eup %8697 }
 0x3b8   :  { %v5080_v4 = vmul.f32 %v8698_v2, %v5078_v61  ;;  %vm5085_vm0 = vweird.f32 %v8698_v2  ;;  %v5106_v17 = vadd.f32 %v8696_v63, %v5105_v0  ;;  %v8476_v61 = vld [vmem:[%s10325_s9 + $0xb8] sm:$0xff] }
 0x3b9   :  { %v9822_v6 = vpop.f32.mrf.mxu3  ;;  %vm5086_vm2 = vmor %vm5084_vm1, %vm5085_vm0  ;;  %4171 = vmatpush.bf16.msrb.mxu2 %v8476_v61 }
 0x3ba   :  { %v5081_v7 = vsub.f32 1.0, %v5080_v4  ;;  %v5110_v27 = vsel %vm5109_vm6, %v8696_v63, %v5106_v17  ;;  %v8484_v63 = vld [vmem:[%s10325_s9 + $0xf8] sm:$0xff]  ;;  %v3592_v3 = vadd.f32 %v9822_v6, %v3573_v39  ;;  %v8475_v4 = vld [vmem:[%s10325_s9 + $0xb0] sm:$0xff] }
 0x3bb   :  { %v5115_v30 = vsel %vm5112_vm7, %v5114_v29, %v5110_v27  ;;  %v9844_v34 = vpop.f32.mrf.mxu0  ;;  %4185 = vmatpush.bf16.msrb.mxu3 %v8484_v63  ;;  %v8483_v6 = vld [vmem:[%s10325_s9 + $0xf0] sm:$0xff]  ;;  %v8470_v63 = vld [vmem:[%s10325_s9 + $0x88] sm:$0xff] }
 0x3bc   :  { %v5082_v10 = vmul.f32 %v8698_v2, %v5081_v7  ;;  %v5122_v33 = vsub.f32 1.0, %v5115_v30  ;;  %v9856_v44 = vpop.f32.mrf.mxu1  ;;  %v8465_v7 = vld [vmem:[%s10325_s9 + $0x60] sm:$0xff]  ;;  %v3611_v11 = vadd.f32 %v9829_v20, %v3592_v3  ;;  %v3722_v22 = vpop.f32.mrf.mxu2 }
 0x3bd   :  { %4172 = vmatpush.bf16.msrb.mxu2 %v8475_v4  ;;  %4160 = vmatpush.bf16.msrb.mxu1 %v8465_v7  ;;  %v8473_v20 = vld [vmem:[%s10325_s9 + $0xa0] sm:$0xff] }
 0x3be   :  { %v5083_v13 = vadd.f32 %v8698_v2, %v5082_v10  ;;  %v3630_v17 = vadd.f32 %v9835_v28, %v3611_v11  ;;  %v8469_v3 = vld [vmem:[%s10325_s9 + $0x80] sm:$0xff] }
 0x3bf   :  { %4186 = vmatpush.bf16.msrb.mxu3 %v8483_v6  ;;  %v8477_v4 = vld [vmem:[%s10325_s9 + $0xc0] sm:$0xff] }
 0x3c0   :  { %v5087_v16 = vsel %vm5086_vm2, %v8698_v2, %v5083_v13  ;;  %v3628_v2 = vadd.f32 %v9824_v9, %v3609_v48  ;;  %v3576_v9 = vadd.f32 %v9854_v42, %v9814_v60  ;;  %v8464_v60 = vld [vmem:[%s10325_s9 + $0x58] sm:$0xff]  ;;  %v3649_v28 = vadd.f32 %v9840_v31, %v3630_v17 }
 0x3c1   :  { %v5092_v19 = vsel %vm5089_vm3, %v5091_v14, %v5087_v16  ;;  %v9831_v21 = vpop.f32.mrf.mxu3  ;;  %v8474_v14 = vld [vmem:[%s10325_s9 + $0xa8] sm:$0xff]  ;;  %v8492_v16 = vld [vmem:[%s10325_s9 + $0x138] sm:$0xff]  ;;  %4161 = vmatpush.bf16.msrb.mxu1 %v8464_v60  ;;  %v8485_v60 = vld [vmem:[%s10325_s9 + $0x100] sm:$0xff] }
 0x3c2   :  { %v5119_v24 = vmul.f32 %v5117_v12, %v5092_v19  ;;  %v3647_v10 = vadd.f32 %v9827_v15, %v3628_v2  ;;  %v8482_v15 = vld [vmem:[%s10325_s9 + $0xe8] sm:$0xff]  ;;  %v3595_v19 = vadd.f32 %v9831_v21, %v3576_v9  ;;  %4173 = vmatpush.bf16.msrb.mxu2 %v8474_v14  ;;  %4199 = vmatpush.bf16.msra.mxu0 %v8492_v16  ;;  %v8491_v21 = vld [vmem:[%s10325_s9 + $0x130] sm:$0xff]  ;;  %v8480_v31 = vld [vmem:[%s10325_s9 + $0xd8] sm:$0xff] }
 0x3c3   :  { %v9871_v57 = vpop.f32.mrf.mxu0  ;;  %4187 = vmatpush.bf16.msrb.mxu3 %v8482_v15 }
 0x3c4   :  { %v5120_v26 = vadd.f32 %v5119_v24, %v2674_v23  ;;  %v9880_v38 = vpop.f32.mrf.mxu1  ;;  %v8463_v24 = vld [vmem:[%s10325_s9 + $0x50] sm:$0xff]  ;;  %v3614_v29 = vadd.f32 %v9844_v34, %v3595_v19  ;;  %v3724_v58 = vpop.f32.mrf.mxu2 }
 0x3c5   :  { %4162 = vmatpush.bf16.msrb.mxu1 %v8463_v24 }
 0x3c6   :  { %8699 = vtanh.f32 %v5120_v26  ;;  %4174 = vmatpush.bf16.msrb.mxu2 %v8473_v20  ;;  %4200 = vmatpush.bf16.msra.mxu0 %v8491_v21  ;;  %v3633_v50 = vadd.f32 %v9856_v44, %v3614_v29 }
 0x3c7   :  { %4188 = vmatpush.bf16.msrb.mxu3 %v8481_v25  ;;  %v8499_v25 = vld [vmem:[#allocation10 + $0x30] sm:$0xff] }
 0x3c8   :  { %v3652_v59 = vadd.f32 %v9863_v51, %v3633_v50  ;;  %v8478_v51 = vld [vmem:[%s10325_s9 + $0xc8] sm:$0xff] }
 0x3c9   :  { %v9842_v32 = vpop.f32.mrf.mxu3 }
 0x3ca   :  { %v3597_v42 = vadd.f32 %v9842_v32, %v3578_v18  ;;  %4175 = vmatpush.bf16.msrb.mxu2 %v8472_v35  ;;  %4201 = vmatpush.bf16.msra.mxu0 %v8490_v45  ;;  %v8489_v32 = vld [vmem:[%s10325_s9 + $0x120] sm:$0xff] }
 0x3cb   :  { %v3684_v5 = vpop.f32.mrf.mxu0  ;;  %4189 = vmatpush.bf16.msrb.mxu3 %v8480_v31  ;;  %v8498_v18 = vld [vmem:[#allocation10 + $0x28] sm:$0xff] }
 0x3cc   :  { %v8700_v36 = vpop.eup %8699  ;;  %v3703_v0 = vpop.f32.mrf.mxu1 }
 0x3cd   :  { %v9849_v41 = vmul.f32 %v8700_v36, %v5122_v33  ;;  %v8462_v36 = vld [vmem:[%s10325_s9 + $0x48] sm:$0xff] }
 0x3ce   :  { %4163 = vmatpush.bf16.msrb.mxu1 %v8462_v36  ;;  %4202 = vmatpush.bf16.msra.mxu0 %v8489_v32 }
 0x3cf   :  { %4190 = vmatpush.bf16.msrb.mxu3 %v8479_v54 }
 0x3d1   :  { %v3665_v47 = vpop.f32.mrf.mxu3 }
 0x3d2   :  { %v3666_v13 = vadd.f32 %v3665_v47, %v3647_v10  ;;  %v8471_v47 = vld [vmem:[%s10325_s9 + $0x90] sm:$0xff]  ;;  %4164 = vmatpush.bf16.msrb.mxu1 %v8461_v49  ;;  %v3727_v10 = vpop.f32.mrf.mxu2 }
 0x3d3   :  { %v3686_v26 = vpop.f32.mrf.mxu0  ;;  %4176 = vmatpush.bf16.msrb.mxu2 %v8471_v47  ;;  %4191 = vmatpush.bf16.msrb.mxu3 %v8478_v51 }
 0x3d4   :  { %v3685_v23 = vadd.f32 %v3684_v5, %v3666_v13  ;;  %v3705_v34 = vpop.f32.mrf.mxu1  ;;  %v8487_v5 = vld [vmem:[%s10325_s9 + $0x110] sm:$0xff]  ;;  %v8486_v13 = vld [vmem:[%s10325_s9 + $0x108] sm:$0xff] }
 0x3d6   :  { %v3704_v30 = vadd.f32 %v3703_v0, %v3685_v23  ;;  %v8500_v23 = vld [vmem:[#allocation10 + $0x38] sm:$0xff] }
 0x3d7   :  { %4177 = vmatpush.bf16.msrb.mxu2 %v8470_v63  ;;  %4192 = vmatpush.bf16.msrb.mxu3 %v8477_v4 }
 0x3d8   :  { %v3723_v44 = vadd.f32 %v3722_v22, %v3704_v30  ;;  %4556 = vmatpush.bf16.msra.mxu1 %v8500_v23  ;;  %v8503_v23 = vld [vmem:[#allocation10 + $0x50] sm:$0xff] }
 0x3d9   :  { %v3667_v46 = vpop.f32.mrf.mxu3 }
 0x3da   :  { %v3668_v33 = vadd.f32 %v3667_v46, %v3649_v28  ;;  %v3616_v46 = vadd.f32 %v9871_v57, %v3597_v42  ;;  %v8488_v57 = vld [vmem:[%s10325_s9 + $0x118] sm:$0xff]  ;;  %v3729_v24 = vpop.f32.mrf.mxu2 }
 0x3db   :  { %v3689_v52 = vpop.f32.mrf.mxu0  ;;  %4203 = vmatpush.bf16.msra.mxu0 %v8488_v57  ;;  %4178 = vmatpush.bf16.msrb.mxu2 %v8469_v3 }
 0x3dc   :  { %v3687_v55 = vadd.f32 %v3686_v26, %v3668_v33  ;;  %v3635_v2 = vadd.f32 %v9880_v38, %v3616_v46  ;;  %v3708_v53 = vpop.f32.mrf.mxu1  ;;  %4557 = vmatpush.bf16.msra.mxu1 %v8499_v25  ;;  %v8521_v25 = vld [vmem:[#allocation10 + $0xe0] sm:$0xff] }
 0x3de   :  { %v3706_v39 = vadd.f32 %v3705_v34, %v3687_v55 }
 0x3df   :  { %4204 = vmatpush.bf16.msra.mxu0 %v8487_v5 }
 0x3e0   :  { %v3725_v7 = vadd.f32 %v3724_v58, %v3706_v39  ;;  %4558 = vmatpush.bf16.msra.mxu1 %v8498_v18  ;;  %v8501_v18 = vld [vmem:[#allocation10 + $0x40] sm:$0xff] }
 0x3e1   :  { %v9913_v8 = vpop.f32.mrf.mxu3 }
 0x3e2   :  { %v3671_v61 = vadd.f32 %v9913_v8, %v3652_v59  ;;  %v3654_v8 = vadd.f32 %v9897_v1, %v3635_v2 }
 0x3e3   :  { %v3691_v14 = vpop.f32.mrf.mxu0  ;;  %4205 = vmatpush.bf16.msra.mxu0 %v8486_v13  ;;  %v8524_v13 = vld [vmem:[#allocation10 + $0xf8] sm:$0xff] }
 0x3e4   :  { %v3690_v6 = vadd.f32 %v3689_v52, %v3671_v61  ;;  %v3710_v16 = vpop.f32.mrf.mxu1 }
 0x3e6   :  { %v3709_v11 = vadd.f32 %v3708_v53, %v3690_v6 }
 0x3e7   :  { %4206 = vmatpush.bf16.msra.mxu0 %v8485_v60  ;;  %v8505_v60 = vld [vmem:[#allocation10 + $0x60] sm:$0xff] }
 0x3e8   :  { %v3728_v1 = vadd.f32 %v3727_v10, %v3709_v11  ;;  %v8507_v10 = vld [vmem:[#allocation10 + $0x70] sm:$0xff] }
 0x3e9   :  { %v3672_v27 = vpop.f32.mrf.mxu3  ;;  %v8495_v11 = vld [vmem:[#allocation10 + $0x10] sm:$0xff] }
 0x3ea   :  { %v3673_v0 = vadd.f32 %v3672_v27, %v3654_v8  ;;  %v8508_v8 = vld [vmem:[#allocation10 + $0x78] sm:$0xff] }
 0x3eb   :  { %4569 = vmatpush.bf16.msra.mxu2 %v8508_v8 }
 0x3ec   :  { %v3692_v15 = vadd.f32 %v3691_v14, %v3673_v0  ;;  %v8506_v0 = vld [vmem:[#allocation10 + $0x68] sm:$0xff] }
 0x3ed   :  { %v8494_v14 = vld [vmem:[#allocation10 + $0x8] sm:$0xff] }
 0x3ee   :  { %v3711_v20 = vadd.f32 %v3710_v16, %v3692_v15  ;;  %v8523_v15 = vld [vmem:[#allocation10 + $0xf0] sm:$0xff]  ;;  %v8493_v16 = vld [vmem:[#allocation10] sm:$0xff] }
 0x3ef   :  { %4570 = vmatpush.bf16.msra.mxu2 %v8507_v10 }
 0x3f0   :  { %v3730_v21 = vadd.f32 %v3729_v24, %v3711_v20  ;;  %v8522_v20 = vld [vmem:[#allocation10 + $0xe8] sm:$0xff]  ;;  %v8513_v24 = vld [vmem:[#allocation10 + $0xa0] sm:$0xff] }
 0x3f1   :  { %v3741_v37 = vpop.f32.mrf.mxu3 }
 0x3f2   :  { %v3742_v48 = vadd.f32 %v3741_v37, %v3723_v44 }
 0x3f3   :  { %4571 = vmatpush.bf16.msra.mxu2 %v8506_v0 }
 0x3f4   :  { %v3751_v62 = vmax.f32 %v3742_v48, 0.0 }
 0x3f6   :  { %3755 = vst [vmem:[#allocation2 + $0x20] sm:$0xff] %v3751_v62 }
 0x3f7   :  { %4572 = vmatpush.bf16.msra.mxu2 %v8505_v60  ;;  %v8551_v60 = vld [vmem:[%s10297_s7 + $0x90] sm:$0xff] }
 0x3f9   :  { %v3743_v38 = vpop.f32.mrf.mxu3 }
 0x3fa   :  { %v3744_v9 = vadd.f32 %v3743_v38, %v3725_v7  ;;  %v8497_v38 = vld [vmem:[#allocation10 + $0x20] sm:$0xff] }
 0x3fb   :  { %4559 = vmatpush.bf16.msra.mxu1 %v8497_v38 }
 0x3fc   :  { %v3752_v56 = vmax.f32 %v3744_v9, 0.0  ;;  %v8496_v9 = vld [vmem:[#allocation10 + $0x18] sm:$0xff] }
 0x3fe   :  { %3756 = vst [vmem:[#allocation2 + $0x28] sm:$0xff] %v3752_v56  ;;  %v8516_v56 = vld [vmem:[#allocation10 + $0xb8] sm:$0xff] }
 0x3ff   :  { %4560 = vmatpush.bf16.msra.mxu1 %v8496_v9  ;;  %4582 = vmatpush.bf16.msra.mxu3 %v8516_v56  ;;  %v8553_v9 = vld [vmem:[%s10297_s7 + $0xa0] sm:$0xff] }
 0x401   :  { %v3746_v17 = vpop.f32.mrf.mxu3 }
 0x402   :  { %v3747_v19 = vadd.f32 %v3746_v17, %v3728_v1  ;;  %v8515_v1 = vld [vmem:[#allocation10 + $0xb0] sm:$0xff]  ;;  %v8504_v17 = vld [vmem:[#allocation10 + $0x58] sm:$0xff] }
 0x403   :  { %4561 = vmatpush.bf16.msra.mxu1 %v8495_v11  ;;  %4583 = vmatpush.bf16.msra.mxu3 %v8515_v1 }
 0x404   :  { %v3753_v22 = vmax.f32 %v3747_v19, 0.0  ;;  %v8514_v19 = vld [vmem:[#allocation10 + $0xa8] sm:$0xff]  ;;  %4573 = vmatpush.bf16.msra.mxu2 %v8504_v17 }
 0x405   :  { %v3760_v27 = vld [vmem:[#allocation2 + $0x20] ss:$2 sm:$0xff]  ;;  %v3766_v28 = vld [vmem:[#allocation2 + $0x21] ss:$2 sm:$0xff] }
 0x406   :  { %3757 = vst [vmem:[#allocation2 + $0x30] sm:$0xff] %v3753_v22  ;;  %v3763_v33 = vpack.c.bf16 %v3760_v27, %v3760_v27  ;;  %v3769_v35 = vpack.c.bf16 %v3766_v28, %v3766_v28  ;;  %v8532_v22 = vld [vmem:[#allocation10 + $0x138] sm:$0xff] }
 0x407   :  { %4562 = vmatpush.bf16.msra.mxu1 %v8494_v14  ;;  %4584 = vmatpush.bf16.msra.mxu3 %v8514_v19  ;;  %v8512_v27 = vld [vmem:[#allocation10 + $0x98] sm:$0xff]  ;;  %v8552_v14 = vld [vmem:[%s10297_s7 + $0x98] sm:$0xff] }
 0x408   :  { %v3791_v50 = vunpack.c.l.b16 %v3763_v33  ;;  %v3797_v47 = vunpack.c.l.b16 %v3769_v35  ;;  %4574 = vmatpush.bf16.msra.mxu2 %v8503_v23  ;;  %v8520_v28 = vld [vmem:[#allocation10 + $0xd8] sm:$0xff]  ;;  %v8519_v33 = vld [vmem:[#allocation10 + $0xd0] sm:$0xff]  ;;  %v8529_v35 = vld [vmem:[#allocation10 + $0x120] sm:$0xff] }
 0x409   :  { %v3748_v26 = vpop.f32.mrf.mxu3  ;;  %v8540_v23 = vld [vmem:[%s10297_s7 + $0x38] sm:$0xff] }
 0x40a   :  { %v3749_v29 = vadd.f32 %v3748_v26, %v3730_v21  ;;  %v8531_v21 = vld [vmem:[#allocation10 + $0x130] sm:$0xff]  ;;  %v8502_v26 = vld [vmem:[#allocation10 + $0x48] sm:$0xff] }
 0x40b   :  { %4563 = vmatpush.bf16.msra.mxu1 %v8493_v16  ;;  %4585 = vmatpush.bf16.msra.mxu3 %v8513_v24  ;;  %v8548_v24 = vld [vmem:[%s10297_s7 + $0x78] sm:$0xff] }
 0x40c   :  { %v3754_v30 = vmax.f32 %v3749_v29, 0.0  ;;  %v8530_v29 = vld [vmem:[#allocation10 + $0x128] sm:$0xff]  ;;  %4575 = vmatpush.bf16.msra.mxu2 %v8502_v26  ;;  %v8603_v26 = vld [vmem:[#allocation16 + $0xb0] sm:$0xf0] }
 0x40d   :  { %v3762_v36 = vld [vmem:[#allocation2 + $0x30] ss:$2 sm:$0xf]  ;;  %v3768_v31 = vld [vmem:[#allocation2 + $0x31] ss:$2 sm:$0xf] }
 0x40e   :  { %3758 = vst [vmem:[#allocation2 + $0x38] sm:$0xf] %v3754_v30  ;;  %v3764_v34 = vpack.c.bf16 %v3762_v36, %v3762_v36  ;;  %v3770_v45 = vpack.c.bf16 %v3768_v31, %v3768_v31  ;;  %v3772_v54 = vld [vmem:[#allocation2 + $0x22] ss:$2 sm:$0xff]  ;;  %v3778_v32 = vld [vmem:[#allocation2 + $0x23] ss:$2 sm:$0xff] }
 0x40f   :  { %v3775_v58 = vpack.c.bf16 %v3772_v54, %v3772_v54  ;;  %v3781_v37 = vpack.c.bf16 %v3778_v32, %v3778_v32  ;;  %v3784_v57 = vld [vmem:[#allocation2 + $0x24] ss:$2 sm:$0xff]  ;;  %4586 = vmatpush.bf16.msra.mxu3 %v8512_v27  ;;  %v8510_v31 = vld [vmem:[#allocation10 + $0x88] sm:$0xff] }
 0x410   :  { %v3792_v42 = vunpack.c.l.b16 %v3764_v34  ;;  %v3798_v49 = vunpack.c.l.b16 %v3770_v45  ;;  %v3787_v4 = vpack.c.bf16 %v3784_v57, %v3784_v57  ;;  %v8511_v30 = vld [vmem:[#allocation10 + $0x90] sm:$0xff]  ;;  %4576 = vmatpush.bf16.msra.mxu2 %v8501_v18  ;;  %v8518_v34 = vld [vmem:[#allocation10 + $0xc8] sm:$0xff]  ;;  %v8528_v45 = vld [vmem:[#allocation10 + $0x118] sm:$0xff] }
 0x411   :  { %v3803_v61 = vunpack.c.l.b16 %v3775_v58  ;;  %v3809_v63 = vunpack.c.l.b16 %v3781_v37  ;;  %v8525_v37 = vld [vmem:[#allocation10 + $0x100] sm:$0xff]  ;;  %v7896_v18 = vld [vmem:[#allocation16 + $0x90] sm:$0xf] }
 0x412   :  { %v3793_v44 = vpack.c.b16 %v3792_v42, %v3791_v50  ;;  %v3799_v55 = vpack.c.b16 %v3798_v49, %v3797_v47  ;;  %v3815_v7 = vunpack.c.l.b16 %v3787_v4  ;;  %v8509_v50 = vld [vmem:[#allocation10 + $0x80] sm:$0xff]  ;;  %v8689_v42 = vld [vmem:[#allocation8] ss:$0 sm:$0xff]  ;;  %v8527_v49 = vld [vmem:[#allocation10 + $0x110] sm:$0xff] }
 0x413   :  { %4587 = vmatpush.bf16.msra.mxu3 %v8511_v30  ;;  %v8517_v47 = vld [vmem:[#allocation10 + $0xc0] sm:$0xff] }
 0x414   :  { %4151 = vmatmul.bf16.vlgmr.msrb.gmra.mxu0 %v3793_v44  ;;  %4165 = vmatmul.bf16.vlgmr.msrb.gmra.mxu1 %v3799_v55  ;;  %v8526_v44 = vld [vmem:[#allocation10 + $0x108] sm:$0xff]  ;;  %v8600_v30 = vld [vmem:[#allocation16 + $0x98] sm:$0xf0] }
 0x415   :  { %v3774_v59 = vld [vmem:[#allocation2 + $0x32] ss:$2 sm:$0xf]  ;;  %v3780_v46 = vld [vmem:[#allocation2 + $0x33] ss:$2 sm:$0xf]  ;;  %4595 = vmatpush.bf16.msrb.mxu0 %v8524_v13  ;;  %4608 = vmatpush.bf16.msrb.mxu1 %v8532_v22 }
 0x416   :  { %v3776_v48 = vpack.c.bf16 %v3774_v59, %v3774_v59  ;;  %v3782_v52 = vpack.c.bf16 %v3780_v46, %v3780_v46  ;;  %v3786_v39 = vld [vmem:[#allocation2 + $0x34] ss:$2 sm:$0xf]  ;;  %v8550_v22 = vld [vmem:[%s10297_s7 + $0x88] sm:$0xff] }
 0x417   :  { %v3788_v53 = vpack.c.bf16 %v3786_v39, %v3786_v39  ;;  %4588 = vmatpush.bf16.msra.mxu3 %v8510_v31  ;;  %v7884_v31 = vld [vmem:[#allocation16 + $0x78] sm:$0xf] }
 0x418   :  { %v3804_v62 = vunpack.c.l.b16 %v3776_v48  ;;  %v3810_v51 = vunpack.c.l.b16 %v3782_v52 }
 0x419   :  { %v3816_v5 = vunpack.c.l.b16 %v3788_v53  ;;  %4596 = vmatpush.bf16.msrb.mxu0 %v8523_v15  ;;  %4609 = vmatpush.bf16.msrb.mxu1 %v8531_v21  ;;  %v7908_v21 = vld [vmem:[#allocation16 + $0xa8] sm:$0xf] }
 0x41a   :  { %v3805_v2 = vpack.c.b16 %v3804_v62, %v3803_v61  ;;  %v3811_v3 = vpack.c.b16 %v3810_v51, %v3809_v63  ;;  %v8556_v62 = vld [vmem:[%s10297_s7 + $0xb8] sm:$0xff]  ;;  %v8555_v51 = vld [vmem:[%s10297_s7 + $0xb0] sm:$0xff]  ;;  %v7909_v27 = vor.u32 %v8603_v26, %v7908_v21 }
 0x41b   :  { %v3817_v6 = vpack.c.b16 %v3816_v5, %v3815_v7  ;;  %4589 = vmatpush.bf16.msra.mxu3 %v8509_v50  ;;  %v8554_v5 = vld [vmem:[%s10297_s7 + $0xa8] sm:$0xff]  ;;  %v8537_v50 = vld [vmem:[%s10297_s7 + $0x20] sm:$0xff] }
 0x41c   :  { %4179 = vmatmul.bf16.vlgmr.msrb.gmra.mxu2 %v3805_v2  ;;  %4193 = vmatmul.bf16.vlgmr.msrb.gmra.mxu3 %v3811_v3 }
 0x41d   :  { %4597 = vmatpush.bf16.msrb.mxu0 %v8522_v20  ;;  %4610 = vmatpush.bf16.msrb.mxu1 %v8530_v29  ;;  %v8547_v29 = vld [vmem:[%s10297_s7 + $0x70] sm:$0xff] }
 0x41e   :  { %4825 = vmatpush.bf16.msrb.mxu2 %v8540_v23 }
 0x41f   :  { %4838 = vmatpush.bf16.msrb.mxu3 %v8548_v24 }
 0x421   :  { %4598 = vmatpush.bf16.msrb.mxu0 %v8521_v25  ;;  %4611 = vmatpush.bf16.msrb.mxu1 %v8529_v35  ;;  %v8549_v25 = vld [vmem:[%s10297_s7 + $0x80] sm:$0xff]  ;;  %v7897_v35 = vor.u32 %v8600_v30, %v7896_v18 }
 0x422   :  { %v7996_v18 = vld [vmem:[#allocation20 + $0x9c] sm:$0xf0] }
 0x423   :  { %4839 = vmatpush.bf16.msrb.mxu3 %v8547_v29  ;;  %v8623_v29 = vld [vmem:[#allocation20 + $0x94] sm:$0xf]  ;;  %v7810_v30 = vld [vmem:[#allocation14 + $0xa8] sm:$0xf] }
 0x424   :  { %4207 = vmatmul.bf16.vlgmr.msra.gmra.mxu0 %v3817_v6 }
 0x425   :  { %4599 = vmatpush.bf16.msrb.mxu0 %v8520_v28  ;;  %4612 = vmatpush.bf16.msrb.mxu1 %v8528_v45  ;;  %v8539_v28 = vld [vmem:[%s10297_s7 + $0x30] sm:$0xff] }
 0x426   :  { %4826 = vmatpush.bf16.msrb.mxu2 %v8539_v28 }
 0x429   :  { %4600 = vmatpush.bf16.msrb.mxu0 %v8519_v33  ;;  %4613 = vmatpush.bf16.msrb.mxu1 %v8527_v49  ;;  %v8538_v33 = vld [vmem:[%s10297_s7 + $0x28] sm:$0xff]  ;;  %v8594_v49 = vld [vmem:[#allocation16 + $0x68] sm:$0xf0] }
 0x42a   :  { %4827 = vmatpush.bf16.msrb.mxu2 %v8538_v33  ;;  %v8579_v33 = vld [vmem:[#allocation14 + $0xb0] sm:$0xf0] }
 0x42d   :  { %4601 = vmatpush.bf16.msrb.mxu0 %v8518_v34  ;;  %4614 = vmatpush.bf16.msrb.mxu1 %v8526_v44  ;;  %v8597_v34 = vld [vmem:[#allocation16 + $0x80] sm:$0xf0] }
 0x42e   :  { %v7885_v45 = vor.u32 %v8597_v34, %v7884_v31  ;;  %4828 = vmatpush.bf16.msrb.mxu2 %v8537_v50  ;;  %v8544_v44 = vld [vmem:[%s10297_s7 + $0x58] sm:$0xff]  ;;  %v7811_v31 = vor.u32 %v8579_v33, %v7810_v30  ;;  %v8576_v34 = vld [vmem:[#allocation14 + $0x98] sm:$0xf0]  ;;  %v7984_v50 = vld [vmem:[#allocation20 + $0x84] sm:$0xf0] }
 0x42f   :  { %v8608_v30 = vld [vmem:[#allocation20 + $0x1c] sm:$0xf]  ;;  %v7936_v33 = vld [vmem:[#allocation20 + $0x24] sm:$0xf0] }
 0x431   :  { %4602 = vmatpush.bf16.msrb.mxu0 %v8517_v47  ;;  %4615 = vmatpush.bf16.msrb.mxu1 %v8525_v37  ;;  %v7872_v47 = vld [vmem:[#allocation16 + $0x60] sm:$0xf] }
 0x435   :  { %4851 = vmatpush.bf16.msra.mxu0 %v8556_v62  ;;  %v8542_v62 = vld [vmem:[%s10297_s7 + $0x48] sm:$0xff] }
 0x439   :  { %4852 = vmatpush.bf16.msra.mxu0 %v8555_v51  ;;  %v8585_v51 = vld [vmem:[#allocation16 + $0x20] sm:$0xf0] }
 0x43d   :  { %4853 = vmatpush.bf16.msra.mxu0 %v8554_v5  ;;  %v8582_v5 = vld [vmem:[#allocation16 + $0x8] sm:$0xf0] }
 0x441   :  { %4854 = vmatpush.bf16.msra.mxu0 %v8553_v9 }
 0x445   :  { %4855 = vmatpush.bf16.msra.mxu0 %v8552_v14 }
 0x449   :  { %4856 = vmatpush.bf16.msra.mxu0 %v8551_v60 }
 0x44d   :  { %4857 = vmatpush.bf16.msra.mxu0 %v8550_v22  ;;  %v8008_v22 = vld [vmem:[#allocation20 + $0xb4] sm:$0xf0] }
 0x451   :  { %4858 = vmatpush.bf16.msra.mxu0 %v8549_v25 }
 0x491   :  { %v4152_v36 = vpop.f32.mrf.mxu0  ;;  %v4166_v55 = vpop.f32.mrf.mxu1 }
 0x492   :  { %v4153_v32 = vadd.f32 %v8689_v42, %v4152_v36  ;;  %v8546_v36 = vld [vmem:[%s10297_s7 + $0x68] sm:$0xff] }
 0x493   :  { %4840 = vmatpush.bf16.msrb.mxu3 %v8546_v36  ;;  %v10082_v36 = vor.u32 %v8623_v29, %v7996_v18  ;;  %v8564_v29 = vld [vmem:[#allocation14 + $0x38] sm:$0xf0] }
 0x494   :  { %v4167_v58 = vadd.f32 %v4166_v55, %v4153_v32  ;;  %v8536_v32 = vld [vmem:[%s10297_s7 + $0x18] sm:$0xff] }
 0x495   :  { %4829 = vmatpush.bf16.msrb.mxu2 %v8536_v32  ;;  %v7860_v55 = vld [vmem:[#allocation16 + $0x48] sm:$0xf]  ;;  %v8580_v32 = vld [vmem:[#allocation14 + $0xb8] sm:$0xf0] }
 0x499   :  { %v4154_v54 = vpop.f32.mrf.mxu0  ;;  %v4168_v57 = vpop.f32.mrf.mxu1 }
 0x49a   :  { %v4155_v39 = vadd.f32 %v8689_v42, %v4154_v54  ;;  %v8545_v42 = vld [vmem:[%s10297_s7 + $0x60] sm:$0xff]  ;;  %v7873_v54 = vor.u32 %v8594_v49, %v7872_v47  ;;  %v7812_v49 = vld [vmem:[#allocation14 + $0xb4] sm:$0xf0] }
 0x49b   :  { %4841 = vmatpush.bf16.msrb.mxu3 %v8545_v42  ;;  %v8578_v42 = vld [vmem:[#allocation14 + $0xac] sm:$0xf] }
 0x49c   :  { %v4169_v2 = vadd.f32 %v4168_v57, %v4155_v39  ;;  %v8534_v39 = vld [vmem:[%s10297_s7 + $0x8] sm:$0xff] }
 0x49f   :  { %v4180_v59 = vpop.f32.mrf.mxu2  ;;  %v4194_v46 = vpop.f32.mrf.mxu3  ;;  %4842 = vmatpush.bf16.msrb.mxu3 %v8544_v44  ;;  %v7786_v44 = vld [vmem:[#allocation14 + $0x78] sm:$0xf] }
 0x4a0   :  { %v4181_v48 = vadd.f32 %v4180_v59, %v4167_v58  ;;  %v8591_v58 = vld [vmem:[#allocation16 + $0x50] sm:$0xf0]  ;;  %v8535_v59 = vld [vmem:[%s10297_s7 + $0x10] sm:$0xff] }
 0x4a1   :  { %v4208_v52 = vpop.f32.mrf.mxu0  ;;  %v7861_v37 = vor.u32 %v8591_v58, %v7860_v55  ;;  %4830 = vmatpush.bf16.msrb.mxu2 %v8535_v59  ;;  %v8573_v55 = vld [vmem:[#allocation14 + $0x80] sm:$0xf0]  ;;  %v7815_v58 = vor.u32 %v8578_v42, %v7812_v49  ;;  %v8575_v59 = vld [vmem:[#allocation14 + $0x94] sm:$0xf]  ;;  %v7758_v42 = vld [vmem:[#allocation14 + $0x38] sm:$0xf] }
 0x4a2   :  { %v4195_v61 = vadd.f32 %v4194_v46, %v4181_v48  ;;  %v8543_v46 = vld [vmem:[%s10297_s7 + $0x50] sm:$0xff]  ;;  %v7848_v48 = vld [vmem:[#allocation16 + $0x30] sm:$0xf] }
 0x4a3   :  { %4843 = vmatpush.bf16.msrb.mxu3 %v8543_v46  ;;  %v7738_v49 = vld [vmem:[#allocation14 + $0x18] sm:$0xf] }
 0x4a4   :  { %v4209_v63 = vadd.f32 %v4208_v52, %v4195_v61  ;;  %v8588_v52 = vld [vmem:[#allocation16 + $0x38] sm:$0xf0] }
 0x4a5   :  { %v7849_v61 = vor.u32 %v8588_v52, %v7848_v48  ;;  %4831 = vmatpush.bf16.msrb.mxu2 %v8534_v39  ;;  %v7800_v48 = vld [vmem:[#allocation14 + $0x9c] sm:$0xf0]  ;;  %v7806_v52 = vld [vmem:[#allocation14 + $0x98] sm:$0xf]  ;;  %v8577_v39 = vld [vmem:[#allocation14 + $0xa0] sm:$0xf0] }
 0x4a6   :  { %v4213_v3 = vmax.f32 %v4209_v63, 0.0  ;;  %v7836_v63 = vld [vmem:[#allocation16 + $0x18] sm:$0xf] }
 0x4a7   :  { %v4182_v53 = vpop.f32.mrf.mxu2  ;;  %v4196_v7 = vpop.f32.mrf.mxu3  ;;  %v7837_v57 = vor.u32 %v8585_v51, %v7836_v63  ;;  %4844 = vmatpush.bf16.msrb.mxu3 %v8542_v62  ;;  %v7972_v62 = vld [vmem:[#allocation20 + $0x6c] sm:$0xf0]  ;;  %v7803_v63 = vor.u32 %v8575_v59, %v7800_v48  ;;  %v7807_v51 = vor.u32 %v8577_v39, %v7806_v52  ;;  %v8560_v59 = vld [vmem:[#allocation14 + $0x1c] sm:$0xf]  ;;  %v7740_v52 = vld [vmem:[#allocation14 + $0x24] sm:$0xf0] }
 0x4a8   :  { %4215 = vst [vmem:[#allocation3 + $0x10] sm:$0xff] %v4213_v3  ;;  %v4183_v4 = vadd.f32 %v4182_v53, %v4169_v2  ;;  %v8533_v2 = vld [vmem:[%s10297_s7] sm:$0xff]  ;;  %v7746_v39 = vld [vmem:[#allocation14 + $0x20] sm:$0xf] }
 0x4a9   :  { %v4210_v38 = vpop.f32.mrf.mxu0  ;;  %v8541_v3 = vld [vmem:[%s10297_s7 + $0x40] sm:$0xff]  ;;  %4832 = vmatpush.bf16.msrb.mxu2 %v8533_v2  ;;  %v7787_v2 = vor.u32 %v8573_v55, %v7786_v44  ;;  %v7924_v55 = vld [vmem:[#allocation20 + $0xc] sm:$0xf0] }
 0x4aa   :  { %v4197_v6 = vadd.f32 %v4196_v7, %v4183_v4  ;;  %v7824_v4 = vld [vmem:[#allocation16] sm:$0xf]  ;;  %v8605_v44 = vld [vmem:[#allocation20 + $0x4] sm:$0xf] }
 0x4ab   :  { %4845 = vmatpush.bf16.msrb.mxu3 %v8541_v3  ;;  %v7825_v7 = vor.u32 %v8582_v5, %v7824_v4  ;;  %v7788_v3 = vld [vmem:[#allocation14 + $0x84] sm:$0xf0]  ;;  %v8574_v4 = vld [vmem:[#allocation14 + $0x88] sm:$0xf0]  ;;  %v7774_v5 = vld [vmem:[#allocation14 + $0x60] sm:$0xf] }
 0x4ac   :  { %v4211_v8 = vadd.f32 %v4210_v38, %v4197_v6  ;;  %v8690_v38 = vld [vmem:[#allocation11] ss:$0 sm:$0xff] }
 0x4ae   :  { %v4214_v10 = vmax.f32 %v4211_v8, 0.0 }
 0x4af   :  { %v4218_v11 = vld [vmem:[#allocation3 + $0x10] ss:$2 sm:$0xf]  ;;  %v4221_v0 = vld [vmem:[#allocation3 + $0x11] ss:$2 sm:$0xf] }
 0x4b0   :  { %4216 = vst [vmem:[#allocation3 + $0x18] sm:$0xf] %v4214_v10  ;;  %v4219_v56 = vpack.c.bf16 %v4218_v11, %v4218_v11  ;;  %v4222_v13 = vpack.c.bf16 %v4221_v0, %v4221_v0 }
 0x4b2   :  { %4564 = vmatmul.bf16.vlgmr.msra.gmra.mxu1 %v4219_v56  ;;  %4577 = vmatmul.bf16.vlgmr.msra.gmra.mxu2 %v4222_v13 }
 0x4b3   :  { %5034 = vmatpush.bf16.msra.mxu1 %v7811_v31  ;;  %5047 = vmatpush.bf16.msra.mxu2 %v7815_v58 }
 0x4b7   :  { %v4224_v1 = vld [vmem:[#allocation3 + $0x12] ss:$2 sm:$0xf]  ;;  %v4227_v15 = vld [vmem:[#allocation3 + $0x13] ss:$2 sm:$0xf]  ;;  %5048 = vmatpush.bf16.msra.mxu2 %v7803_v63 }
 0x4b8   :  { %v4225_v16 = vpack.c.bf16 %v4224_v1, %v4224_v1  ;;  %v4228_v17 = vpack.c.bf16 %v4227_v15, %v4227_v15  ;;  %v4230_v19 = vld [vmem:[#allocation3 + $0x14] ss:$2 sm:$0xf]  ;;  %v8558_v63 = vld [vmem:[#allocation14 + $0x8] sm:$0xf0] }
 0x4b9   :  { %v4231_v20 = vpack.c.bf16 %v4230_v19, %v4230_v19 }
 0x4ba   :  { %4590 = vmatmul.bf16.vlgmr.msra.gmra.mxu3 %v4225_v16  ;;  %4603 = vmatmul.bf16.vlgmr.msrb.gmra.mxu0 %v4228_v17 }
 0x4bb   :  { %5287 = vmatpush.bf16.msrb.mxu0 %v7909_v27 }
 0x4bf   :  { %5288 = vmatpush.bf16.msrb.mxu0 %v7897_v35  ;;  %v7798_v35 = vld [vmem:[#allocation14 + $0x90] sm:$0xf] }
 0x4c0   :  { %v7799_v47 = vor.u32 %v8576_v34, %v7798_v35  ;;  %v8563_v34 = vld [vmem:[#allocation14 + $0x34] sm:$0xf] }
 0x4c2   :  { %4616 = vmatmul.bf16.vlgmr.msrb.gmra.mxu1 %v4231_v20  ;;  %v8626_v20 = vld [vmem:[#allocation20 + $0xac] sm:$0xf] }
 0x4c3   :  { %5289 = vmatpush.bf16.msrb.mxu0 %v7885_v45  ;;  %v10079_v27 = vor.u32 %v8626_v20, %v8008_v22  ;;  %v8620_v45 = vld [vmem:[#allocation20 + $0x7c] sm:$0xf]  ;;  %5035 = vmatpush.bf16.msra.mxu1 %v7799_v47 }
 0x4c4   :  { %v10085_v46 = vor.u32 %v8620_v45, %v7984_v50  ;;  %v7752_v50 = vld [vmem:[#allocation14 + $0x3c] sm:$0xf0]  ;;  %v8565_v47 = vld [vmem:[#allocation14 + $0x40] sm:$0xf0] }
 0x4c5   :  { %v7755_v58 = vor.u32 %v8563_v34, %v7752_v50 }
 0x4c7   :  { %5290 = vmatpush.bf16.msrb.mxu0 %v7873_v54  ;;  %v7818_v54 = vld [vmem:[#allocation14 + $0xb0] sm:$0xf]  ;;  %5036 = vmatpush.bf16.msra.mxu1 %v7787_v2  ;;  %v7910_v2 = vld [vmem:[#allocation16 + $0xb4] sm:$0xf0] }
 0x4cb   :  { %5291 = vmatpush.bf16.msrb.mxu0 %v7861_v37  ;;  %v7819_v37 = vor.u32 %v8580_v32, %v7818_v54  ;;  %v8561_v54 = vld [vmem:[#allocation14 + $0x20] sm:$0xf0]  ;;  %v10102_v32 = vor.u32 %v8608_v30, %v7936_v33  ;;  %v7904_v33 = vld [vmem:[#allocation16 + $0x98] sm:$0xf] }
 0x4cc   :  { %v7739_v48 = vor.u32 %v8561_v54, %v7738_v49  ;;  %v7892_v54 = vld [vmem:[#allocation16 + $0x80] sm:$0xf] }
 0x4cd   :  { %5060 = vmatpush.bf16.msra.mxu3 %v7819_v37  ;;  %v7759_v37 = vor.u32 %v8565_v47, %v7758_v42  ;;  %v8587_v42 = vld [vmem:[#allocation16 + $0x34] sm:$0xf]  ;;  %v7850_v47 = vld [vmem:[#allocation16 + $0x3c] sm:$0xf0] }
 0x4ce   :  { %v7853_v49 = vor.u32 %v8587_v42, %v7850_v47  ;;  %v8583_v42 = vld [vmem:[#allocation16 + $0x10] sm:$0xf0]  ;;  %v7922_v47 = vld [vmem:[#allocation20] sm:$0xf] }
 0x4cf   :  { %5292 = vmatpush.bf16.msrb.mxu0 %v7849_v61  ;;  %v8617_v61 = vld [vmem:[#allocation20 + $0x64] sm:$0xf] }
 0x4d1   :  { %5061 = vmatpush.bf16.msra.mxu3 %v7807_v51  ;;  %v10105_v51 = vor.u32 %v8605_v44, %v7924_v55  ;;  %v8598_v44 = vld [vmem:[#allocation16 + $0x88] sm:$0xf0]  ;;  %v7982_v55 = vld [vmem:[#allocation20 + $0x78] sm:$0xf] }
 0x4d3   :  { %5293 = vmatpush.bf16.msrb.mxu0 %v7837_v57  ;;  %v8572_v57 = vld [vmem:[#allocation14 + $0x7c] sm:$0xf] }
 0x4d7   :  { %5294 = vmatpush.bf16.msrb.mxu0 %v7825_v7  ;;  %v8570_v7 = vld [vmem:[#allocation14 + $0x68] sm:$0xf0] }
 0x52f   :  { %v4565_v53 = vpop.f32.mrf.mxu1 }
 0x530   :  { %v4566_v10 = vadd.f32 %v8690_v38, %v4565_v53  ;;  %v7794_v53 = vld [vmem:[#allocation14 + $0x80] sm:$0xf]  ;;  %v8614_v38 = vld [vmem:[#allocation20 + $0x4c] sm:$0xf] }
 0x535   :  { %v4578_v6 = vpop.f32.mrf.mxu2 }
 0x536   :  { %v4579_v11 = vadd.f32 %v4578_v6, %v4566_v10  ;;  %v10088_v6 = vor.u32 %v8617_v61, %v7972_v62  ;;  %v7795_v10 = vor.u32 %v8574_v4, %v7794_v53  ;;  %v8562_v61 = vld [vmem:[#allocation14 + $0x28] sm:$0xf0]  ;;  %v7726_v62 = vld [vmem:[#allocation14] sm:$0xf] }
 0x537   :  { %v4567_v8 = vpop.f32.mrf.mxu1  ;;  %v4604_v9 = vpop.f32.mrf.mxu0  ;;  %v7747_v53 = vor.u32 %v8562_v61, %v7746_v39  ;;  %v7727_v4 = vor.u32 %v8558_v63, %v7726_v62  ;;  %v7880_v61 = vld [vmem:[#allocation16 + $0x68] sm:$0xf]  ;;  %v8595_v62 = vld [vmem:[#allocation16 + $0x70] sm:$0xf0] }
 0x538   :  { %v7960_v8 = vld [vmem:[#allocation20 + $0x54] sm:$0xf0]  ;;  %5062 = vmatpush.bf16.msra.mxu3 %v7795_v10  ;;  %v7886_v10 = vld [vmem:[#allocation16 + $0x84] sm:$0xf0] }
 0x539   :  { %v7970_v63 = vld [vmem:[#allocation20 + $0x60] sm:$0xf] }
 0x53d   :  { %v4580_v0 = vpop.f32.mrf.mxu2  ;;  %v4591_v56 = vpop.f32.mrf.mxu3 }
 0x53e   :  { %v4592_v13 = vadd.f32 %v4591_v56, %v4579_v11  ;;  %v8569_v11 = vld [vmem:[#allocation14 + $0x64] sm:$0xf]  ;;  %v7775_v0 = vor.u32 %v8570_v7, %v7774_v5  ;;  %v7776_v56 = vld [vmem:[#allocation14 + $0x6c] sm:$0xf0]  ;;  %v8599_v7 = vld [vmem:[#allocation16 + $0x94] sm:$0xf] }
 0x53f   :  { %v4606_v14 = vpop.f32.mrf.mxu0  ;;  %v4617_v60 = vpop.f32.mrf.mxu1  ;;  %v7779_v20 = vor.u32 %v8569_v11, %v7776_v56  ;;  %v7728_v56 = vld [vmem:[#allocation14 + $0xc] sm:$0xf0] }
 0x540   :  { %v4605_v1 = vadd.f32 %v4604_v9, %v4592_v13  ;;  %v7791_v9 = vor.u32 %v8572_v57, %v7788_v3  ;;  %v7782_v13 = vld [vmem:[#allocation14 + $0x68] sm:$0xf]  ;;  %v8571_v14 = vld [vmem:[#allocation14 + $0x70] sm:$0xf0]  ;;  %5037 = vmatpush.bf16.msra.mxu1 %v7775_v0  ;;  %v8602_v57 = vld [vmem:[#allocation16 + $0xac] sm:$0xf]  ;;  %v7743_v3 = vor.u32 %v8560_v59, %v7740_v52 }
 0x541   :  { %v7783_v22 = vor.u32 %v8571_v14, %v7782_v13  ;;  %v7913_v5 = vor.u32 %v8602_v57, %v7910_v2  ;;  %v8557_v0 = vld [vmem:[#allocation14 + $0x4] sm:$0xf]  ;;  %v7734_v13 = vld [vmem:[#allocation14 + $0x8] sm:$0xf]  ;;  %v7881_v57 = vor.u32 %v8595_v62, %v7880_v61  ;;  %v8618_v2 = vld [vmem:[#allocation20 + $0x68] sm:$0xf0] }
 0x542   :  { %v4618_v15 = vadd.f32 %v4617_v60, %v4605_v1  ;;  %v7762_v60 = vld [vmem:[#allocation14 + $0x48] sm:$0xf]  ;;  %v8567_v1 = vld [vmem:[#allocation14 + $0x50] sm:$0xf0]  ;;  %5049 = vmatpush.bf16.msra.mxu2 %v7791_v9  ;;  %v8596_v9 = vld [vmem:[#allocation16 + $0x7c] sm:$0xf]  ;;  %v7731_v14 = vor.u32 %v8557_v0, %v7728_v56 }
 0x543   :  { %5063 = vmatpush.bf16.msra.mxu3 %v7783_v22  ;;  %v7889_v11 = vor.u32 %v8596_v9, %v7886_v10  ;;  %v7916_v22 = vld [vmem:[#allocation16 + $0xb0] sm:$0xf]  ;;  %v7838_v52 = vld [vmem:[#allocation16 + $0x24] sm:$0xf0]  ;;  %v8615_v10 = vld [vmem:[#allocation20 + $0x50] sm:$0xf0] }
 0x544   :  { %v4621_v16 = vmax.f32 %v4618_v15, 0.0  ;;  %v10091_v15 = vor.u32 %v8614_v38, %v7960_v8  ;;  %v7898_v38 = vld [vmem:[#allocation16 + $0x9c] sm:$0xf0]  ;;  %v8628_v0 = vld [vmem:[#allocation20 + $0xb8] sm:$0xf0] }
 0x545   :  { %v4593_v17 = vpop.f32.mrf.mxu3  ;;  %v7901_v8 = vor.u32 %v8599_v7, %v7898_v38  ;;  %v7868_v7 = vld [vmem:[#allocation16 + $0x50] sm:$0xf]  ;;  %v8592_v38 = vld [vmem:[#allocation16 + $0x58] sm:$0xf0] }
 0x546   :  { %4622 = vst [vmem:[#allocation4 + $0x8] sm:$0xf] %v4621_v16  ;;  %v10095_v16 = vpack.c.bf16 %v9849_v41, %v9849_v41  ;;  %v8611_v17 = vld [vmem:[#allocation20 + $0x34] sm:$0xf]  ;;  %5050 = vmatpush.bf16.msra.mxu2 %v7779_v20  ;;  %v7869_v9 = vor.u32 %v8592_v38, %v7868_v7 }
 0x547   :  { %v4619_v19 = vpop.f32.mrf.mxu1  ;;  %v4680_v62 = vld [vmem:[#allocation13] sm:$0x1] }
 0x548   :  { %v7948_v19 = vld [vmem:[#allocation20 + $0x3c] sm:$0xf0] }
 0x549   :  { %v10099_v18 = vor.u32 %v8611_v17, %v7948_v19  ;;  %v7874_v17 = vld [vmem:[#allocation16 + $0x6c] sm:$0xf0] }
 0x54d   :  { %v4624_v23 = vld [vmem:[#allocation4 + $0x8] ss:$2 sm:$0x1]  ;;  %v4627_v24 = vld [vmem:[#allocation4 + $0x9] ss:$2 sm:$0x1] }
 0x54e   :  { %v4625_v25 = vpack.c.bf16 %v4624_v23, %v4624_v23  ;;  %v4628_v21 = vpack.c.bf16 %v4627_v24, %v4627_v24  ;;  %v4630_v26 = vld [vmem:[#allocation4 + $0xa] ss:$2 sm:$0x1]  ;;  %v8566_v23 = vld [vmem:[#allocation14 + $0x4c] sm:$0xf]  ;;  %v7763_v24 = vor.u32 %v8567_v1, %v7762_v60 }
 0x54f   :  { %v4631_v28 = vpack.c.bf16 %v4630_v26, %v4630_v26  ;;  %v8568_v26 = vld [vmem:[#allocation14 + $0x58] sm:$0xf0]  ;;  %v8559_v60 = vld [vmem:[#allocation14 + $0x10] sm:$0xf0]  ;;  %v8593_v1 = vld [vmem:[#allocation16 + $0x64] sm:$0xf] }
 0x550   :  { %4833 = vmatmul.bf16.vlgmr.msrb.gmra.mxu2 %v4625_v25  ;;  %4846 = vmatmul.bf16.vlgmr.msrb.gmra.mxu3 %v4628_v21  ;;  %v7764_v25 = vld [vmem:[#allocation14 + $0x54] sm:$0xf0]  ;;  %v7770_v21 = vld [vmem:[#allocation14 + $0x50] sm:$0xf]  ;;  %v7735_v19 = vor.u32 %v8559_v60, %v7734_v13  ;;  %v7877_v20 = vor.u32 %v8593_v1, %v7874_v17  ;;  %v8589_v60 = vld [vmem:[#allocation16 + $0x40] sm:$0xf0] }
 0x551   :  { %4859 = vmatmul.bf16.vlgmr.msra.gmra.mxu0 %v4631_v28  ;;  %v7750_v28 = vld [vmem:[#allocation14 + $0x30] sm:$0xf]  ;;  %v7767_v35 = vor.u32 %v8566_v23, %v7764_v25  ;;  %v7771_v31 = vor.u32 %v8568_v26, %v7770_v21  ;;  %5038 = vmatpush.bf16.msra.mxu1 %v7763_v24  ;;  %v8604_v23 = vld [vmem:[#allocation16 + $0xb8] sm:$0xf0]  ;;  %v8590_v26 = vld [vmem:[#allocation16 + $0x4c] sm:$0xf] }
 0x552   :  { %5554 = vmatpush.bf16.msra.mxu0 %v10079_v27  ;;  %v7751_v45 = vor.u32 %v8564_v29, %v7750_v28  ;;  %v8006_v24 = vld [vmem:[#allocation20 + $0xa8] sm:$0xf]  ;;  %v7917_v25 = vor.u32 %v8604_v23, %v7916_v22  ;;  %v8627_v21 = vld [vmem:[#allocation20 + $0xb0] sm:$0xf0]  ;;  %v7862_v28 = vld [vmem:[#allocation16 + $0x54] sm:$0xf0] }
 0x553   :  { %5051 = vmatpush.bf16.msra.mxu2 %v7767_v35  ;;  %5064 = vmatpush.bf16.msra.mxu3 %v7771_v31  ;;  %v10109_v29 = vor.u32 %v8627_v21, %v8006_v24  ;;  %v7865_v30 = vor.u32 %v8590_v26, %v7862_v28  ;;  %v8601_v35 = vld [vmem:[#allocation16 + $0xa0] sm:$0xf0]  ;;  %v7994_v31 = vld [vmem:[#allocation20 + $0x90] sm:$0xf]  ;;  %v8586_v21 = vld [vmem:[#allocation16 + $0x28] sm:$0xf0] }
 0x554   :  { %v7905_v34 = vor.u32 %v8601_v35, %v7904_v33  ;;  %v7946_v1 = vld [vmem:[#allocation20 + $0x30] sm:$0xf]  ;;  %v8612_v17 = vld [vmem:[#allocation20 + $0x38] sm:$0xf0]  ;;  %v7934_v26 = vld [vmem:[#allocation20 + $0x18] sm:$0xf] }
 0x555   :  { %5039 = vmatpush.bf16.msra.mxu1 %v7751_v45  ;;  %v8624_v45 = vld [vmem:[#allocation20 + $0x98] sm:$0xf0]  ;;  %v10127_v23 = vor.u32 %v8612_v17, %v7946_v1  ;;  %v7990_v33 = vld [vmem:[#allocation20 + $0x80] sm:$0xf]  ;;  %v8622_v35 = vld [vmem:[#allocation20 + $0x88] sm:$0xf0] }
 0x556   :  { %5555 = vmatpush.bf16.msra.mxu0 %v10082_v36  ;;  %v10112_v50 = vor.u32 %v8624_v45, %v7994_v31  ;;  %v7832_v45 = vld [vmem:[#allocation16 + $0x8] sm:$0xf]  ;;  %v7930_v17 = vld [vmem:[#allocation20 + $0x8] sm:$0xf] }
 0x557   :  { %5052 = vmatpush.bf16.msra.mxu2 %v7755_v58  ;;  %5065 = vmatpush.bf16.msra.mxu3 %v7759_v37  ;;  %v7893_v58 = vor.u32 %v8598_v44, %v7892_v54  ;;  %v8621_v37 = vld [vmem:[#allocation20 + $0x80] sm:$0xf0]  ;;  %v7978_v54 = vld [vmem:[#allocation20 + $0x68] sm:$0xf]  ;;  %v8619_v44 = vld [vmem:[#allocation20 + $0x70] sm:$0xf0] }
 0x558   :  { %v10115_v59 = vor.u32 %v8621_v37, %v7982_v55  ;;  %v7833_v55 = vor.u32 %v8583_v42, %v7832_v45  ;;  %v7979_v37 = vor.u32 %v8619_v44, %v7978_v54  ;;  %v8652_v42 = vld [vmem:[#allocation22 + $0xb8] sm:$0xf0] }
 0x559   :  { %5040 = vmatpush.bf16.msra.mxu1 %v7739_v48  ;;  %v8584_v48 = vld [vmem:[#allocation16 + $0x1c] sm:$0xf] }
 0x55a   :  { %5556 = vmatpush.bf16.msra.mxu0 %v10085_v46  ;;  %v7841_v39 = vor.u32 %v8584_v48, %v7838_v52  ;;  %v7966_v52 = vld [vmem:[#allocation20 + $0x50] sm:$0xf] }
 0x55b   :  { %5053 = vmatpush.bf16.msra.mxu2 %v7743_v3  ;;  %5066 = vmatpush.bf16.msra.mxu3 %v7747_v53  ;;  %v10118_v3 = vor.u32 %v8618_v2, %v7970_v63  ;;  %v8581_v53 = vld [vmem:[#allocation16 + $0x4] sm:$0xf]  ;;  %v7954_v63 = vld [vmem:[#allocation20 + $0x38] sm:$0xf] }
 0x55d   :  { %5041 = vmatpush.bf16.msra.mxu1 %v7727_v4  ;;  %v7826_v4 = vld [vmem:[#allocation16 + $0xc] sm:$0xf0] }
 0x55e   :  { %5557 = vmatpush.bf16.msra.mxu0 %v10088_v6 }
 0x55f   :  { %5054 = vmatpush.bf16.msra.mxu2 %v7731_v14  ;;  %5067 = vmatpush.bf16.msra.mxu3 %v7735_v19  ;;  %v7856_v14 = vld [vmem:[#allocation16 + $0x38] sm:$0xf]  ;;  %v8002_v19 = vld [vmem:[#allocation20 + $0x98] sm:$0xf] }
 0x560   :  { %v7857_v22 = vor.u32 %v8589_v60, %v7856_v14 }
 0x561   :  { %5295 = vmatmul.bf16.vlgmr.msrb.gmra.mxu0 %v10095_v16  ;;  %5300 = vmatpush.bf16.msrb.mxu1 %v7913_v5  ;;  %v7829_v5 = vor.u32 %v8581_v53, %v7826_v4 }
 0x562   :  { %5558 = vmatpush.bf16.msra.mxu0 %v10091_v15 }
 0x563   :  { %5313 = vmatpush.bf16.msrb.mxu2 %v7917_v25  ;;  %5541 = vmatpush.bf16.msrb.mxu3 %v10109_v29  ;;  %v7844_v25 = vld [vmem:[#allocation16 + $0x20] sm:$0xf] }
 0x564   :  { %v7845_v28 = vor.u32 %v8586_v21, %v7844_v25 }
 0x565   :  { %5301 = vmatpush.bf16.msrb.mxu1 %v7901_v8  ;;  %v7958_v8 = vld [vmem:[#allocation20 + $0x48] sm:$0xf] }
 0x566   :  { %5559 = vmatpush.bf16.msra.mxu0 %v10099_v18  ;;  %v10121_v56 = vor.u32 %v8615_v10, %v7958_v8  ;;  %v7942_v8 = vld [vmem:[#allocation20 + $0x20] sm:$0xf] }
 0x567   :  { %5314 = vmatpush.bf16.msrb.mxu2 %v7905_v34  ;;  %5542 = vmatpush.bf16.msrb.mxu3 %v10112_v50  ;;  %v7991_v34 = vor.u32 %v8622_v35, %v7990_v33  ;;  %v8650_v35 = vld [vmem:[#allocation22 + $0xac] sm:$0xf] }
 0x569   :  { %5302 = vmatpush.bf16.msrb.mxu1 %v7889_v11  ;;  %v8014_v11 = vld [vmem:[#allocation20 + $0xb0] sm:$0xf] }
 0x56a   :  { %5560 = vmatpush.bf16.msra.mxu0 %v10102_v32  ;;  %v10123_v13 = vor.u32 %v8628_v0, %v8014_v11 }
 0x56b   :  { %5315 = vmatpush.bf16.msrb.mxu2 %v7893_v58  ;;  %5543 = vmatpush.bf16.msrb.mxu3 %v10115_v59 }
 0x56d   :  { %5303 = vmatpush.bf16.msrb.mxu1 %v7877_v20  ;;  %v8625_v20 = vld [vmem:[#allocation20 + $0xa0] sm:$0xf0] }
 0x56e   :  { %5561 = vmatpush.bf16.msra.mxu0 %v10105_v51  ;;  %v8003_v24 = vor.u32 %v8625_v20, %v8002_v19  ;;  %v8607_v19 = vld [vmem:[#allocation20 + $0x10] sm:$0xf0] }
 0x56f   :  { %5316 = vmatpush.bf16.msrb.mxu2 %v7881_v57  ;;  %5544 = vmatpush.bf16.msrb.mxu3 %v10118_v3  ;;  %v8613_v57 = vld [vmem:[#allocation20 + $0x40] sm:$0xf0] }
 0x571   :  { %5562 = vmatmul.bf16.vlgmr.msra.gmra.mxu0 %v10095_v16  ;;  %5304 = vmatpush.bf16.msrb.mxu1 %v7865_v30  ;;  %v8609_v30 = vld [vmem:[#allocation20 + $0x20] sm:$0xf0] }
 0x572   :  { %5658 = vmatpush.bf16.msrb.mxu0 %v10123_v13  ;;  %v10130_v31 = vor.u32 %v8609_v30, %v7934_v26 }
 0x573   :  { %5317 = vmatpush.bf16.msrb.mxu2 %v7869_v9  ;;  %5545 = vmatpush.bf16.msrb.mxu3 %v10121_v56  ;;  %v8610_v9 = vld [vmem:[#allocation20 + $0x28] sm:$0xf0] }
 0x574   :  { %v7943_v11 = vor.u32 %v8610_v9, %v7942_v8 }
 0x575   :  { %5305 = vmatpush.bf16.msrb.mxu1 %v7853_v49  ;;  %v8606_v49 = vld [vmem:[#allocation20 + $0x8] sm:$0xf0] }
 0x576   :  { %5659 = vmatpush.bf16.msrb.mxu0 %v8003_v24  ;;  %v10133_v58 = vor.u32 %v8606_v49, %v7922_v47  ;;  %v8092_v47 = vld [vmem:[#allocation22 + $0x90] sm:$0xf]  ;;  %v8648_v49 = vld [vmem:[#allocation22 + $0x98] sm:$0xf0] }
 0x577   :  { %5318 = vmatpush.bf16.msrb.mxu2 %v7857_v22  ;;  %5546 = vmatpush.bf16.msrb.mxu3 %v10127_v23  ;;  %v7931_v22 = vor.u32 %v8607_v19, %v7930_v17  ;;  %v8093_v44 = vor.u32 %v8648_v49, %v8092_v47  ;;  %v8068_v17 = vld [vmem:[#allocation22 + $0x60] sm:$0xf]  ;;  %v8064_v47 = vld [vmem:[#allocation22 + $0x50] sm:$0xf]  ;;  %v8640_v49 = vld [vmem:[#allocation22 + $0x58] sm:$0xf0] }
 0x579   :  { %5306 = vmatpush.bf16.msrb.mxu1 %v7841_v39  ;;  %v8616_v39 = vld [vmem:[#allocation20 + $0x58] sm:$0xf0] }
 0x57a   :  { %5660 = vmatpush.bf16.msrb.mxu0 %v7991_v34  ;;  %v7967_v61 = vor.u32 %v8616_v39, %v7966_v52  ;;  %v8094_v52 = vld [vmem:[#allocation22 + $0x9c] sm:$0xf0]  ;;  %v8100_v39 = vld [vmem:[#allocation22 + $0x98] sm:$0xf] }
 0x57b   :  { %5319 = vmatpush.bf16.msrb.mxu2 %v7845_v28  ;;  %5547 = vmatpush.bf16.msrb.mxu3 %v10130_v31 }
 0x57d   :  { %5307 = vmatpush.bf16.msrb.mxu1 %v7829_v5  ;;  %v7955_v5 = vor.u32 %v8613_v57, %v7954_v63  ;;  %v8649_v57 = vld [vmem:[#allocation22 + $0xa0] sm:$0xf0] }
 0x57e   :  { %5661 = vmatpush.bf16.msrb.mxu0 %v7979_v37 }
 0x57f   :  { %5320 = vmatpush.bf16.msrb.mxu2 %v7833_v55  ;;  %5548 = vmatpush.bf16.msrb.mxu3 %v10133_v58 }
 0x582   :  { %5662 = vmatpush.bf16.msrb.mxu0 %v7967_v61 }
 0x586   :  { %5663 = vmatpush.bf16.msrb.mxu0 %v7955_v5 }
 0x58a   :  { %5664 = vmatpush.bf16.msrb.mxu0 %v7943_v11 }
 0x58e   :  { %5665 = vmatpush.bf16.msrb.mxu0 %v7931_v22 }
 0x5ce   :  { %v4860_v48 = vpop.f32.mrf.mxu0 }
 0x5d3   :  { %v4834_v2 = vpop.f32.mrf.mxu2  ;;  %v4847_v53 = vpop.f32.mrf.mxu3 }
 0x5d4   :  { %v4835_v4 = vadd.f32 %v4834_v2, %v4680_v62  ;;  %v8080_v2 = vld [vmem:[#allocation22 + $0x78] sm:$0xf] }
 0x5d6   :  { %v4848_v7 = vadd.f32 %v4847_v53, %v4835_v4  ;;  %v4862_v38 = vpop.f32.mrf.mxu0  ;;  %v8101_v4 = vor.u32 %v8649_v57, %v8100_v39 }
 0x5d8   :  { %v4861_v10 = vadd.f32 %v4860_v48, %v4848_v7  ;;  %v8647_v48 = vld [vmem:[#allocation22 + $0x94] sm:$0xf] }
 0x5d9   :  { %v8097_v63 = vor.u32 %v8647_v48, %v8094_v52  ;;  %v8636_v48 = vld [vmem:[#allocation22 + $0x38] sm:$0xf0] }
 0x5da   :  { %v4864_v0 = vmax.f32 %v4861_v10, 0.0 }
 0x5db   :  { %v4836_v14 = vpop.f32.mrf.mxu2  ;;  %v4849_v60 = vpop.f32.mrf.mxu3 }
 0x5dc   :  { %v4865_v1 = vpack.c.bf16 %v4864_v0, %v4864_v0  ;;  %v8082_v0 = vld [vmem:[#allocation22 + $0x84] sm:$0xf0]  ;;  %v8088_v14 = vld [vmem:[#allocation22 + $0x80] sm:$0xf] }
 0x5de   :  { %v5296_v20 = vpop.f32.mrf.mxu0  ;;  %5042 = vmatmul.bf16.vlgmr.msra.gmra.mxu1 %v4865_v1  ;;  %5055 = vmatmul.bf16.vlgmr.msra.gmra.mxu2 %v4865_v1 }
 0x5df   :  { %5068 = vmatmul.bf16.vlgmr.msra.gmra.mxu3 %v4865_v1  ;;  %5567 = vmatpush.bf16.msra.mxu1 %v10123_v13  ;;  %v10163_v13 = vld [vmem:[#allocation25] sm:$0x7]  ;;  %v8646_v1 = vld [vmem:[#allocation22 + $0x88] sm:$0xf0] }
 0x5e0   :  { %5632 = vmatpush.bf16.msra.mxu2 %v10109_v29  ;;  %5645 = vmatpush.bf16.msra.mxu3 %v10079_v27  ;;  %v5602_v30 = vperm.slane %v10163_v13, 1 }
 0x5e3   :  { %5568 = vmatpush.bf16.msra.mxu1 %v8003_v24  ;;  %v8104_v24 = vld [vmem:[#allocation22 + $0xa8] sm:$0xf] }
 0x5e4   :  { %5633 = vmatpush.bf16.msra.mxu2 %v10112_v50  ;;  %5646 = vmatpush.bf16.msra.mxu3 %v10082_v36  ;;  %v10157_v36 = vld [vmem:[#allocation17] sm:$0x7] }
 0x5e6   :  { %v5298_v25 = vpop.f32.mrf.mxu0 }
 0x5e7   :  { %5569 = vmatpush.bf16.msra.mxu1 %v7991_v34  ;;  %v8112_v34 = vld [vmem:[#allocation22 + $0xb0] sm:$0xf] }
 0x5e8   :  { %5634 = vmatpush.bf16.msra.mxu2 %v10115_v59  ;;  %5647 = vmatpush.bf16.msra.mxu3 %v10085_v46  ;;  %v8731_v46 = vld [vmem:[#allocation19] sm:$0x7]  ;;  %v10160_v59 = vld [vmem:[#allocation23] sm:$0x7]  ;;  %v8113_v54 = vor.u32 %v8652_v42, %v8112_v34  ;;  %v8058_v34 = vld [vmem:[#allocation22 + $0x54] sm:$0xf0] }
 0x5e9   :  { %v5535_v25 = vperm.slane %v10160_v59, 0 }
 0x5eb   :  { %5570 = vmatpush.bf16.msra.mxu1 %v7979_v37 }
 0x5ec   :  { %5635 = vmatpush.bf16.msra.mxu2 %v10118_v3  ;;  %5648 = vmatpush.bf16.msra.mxu3 %v10088_v6  ;;  %v5285_v6 = vperm.slane %v8731_v46, 0  ;;  %v8070_v46 = vld [vmem:[#allocation22 + $0x6c] sm:$0xf0] }
 0x5ee   :  { %v5563_v29 = vpop.f32.mrf.mxu0  ;;  %5308 = vmatmul.bf16.vlgmr.msrb.gmra.mxu1 %v10095_v16  ;;  %5321 = vmatmul.bf16.vlgmr.msrb.gmra.mxu2 %v10095_v16  ;;  %v5297_v50 = vadd.f32 %v5296_v20, %v5285_v6  ;;  %v8089_v20 = vor.u32 %v8646_v1, %v8088_v14  ;;  %v8633_v1 = vld [vmem:[#allocation22 + $0x20] sm:$0xf0] }
 0x5ef   :  { %5549 = vmatmul.bf16.vlgmr.msrb.gmra.mxu3 %v10095_v16  ;;  %5571 = vmatpush.bf16.msra.mxu1 %v7967_v61 }
 0x5f0   :  { %5636 = vmatpush.bf16.msra.mxu2 %v10121_v56  ;;  %5649 = vmatpush.bf16.msra.mxu3 %v10091_v15  ;;  %v5028_v15 = vperm.slane %v10157_v36, 0 }
 0x5f3   :  { %5572 = vmatpush.bf16.msra.mxu1 %v7955_v5  ;;  %v8645_v5 = vld [vmem:[#allocation22 + $0x80] sm:$0xf0] }
 0x5f4   :  { %5637 = vmatpush.bf16.msra.mxu2 %v10127_v23  ;;  %5650 = vmatpush.bf16.msra.mxu3 %v10099_v18  ;;  %v8081_v10 = vor.u32 %v8645_v5, %v8080_v2  ;;  %v8635_v2 = vld [vmem:[#allocation22 + $0x34] sm:$0xf] }
 0x5f6   :  { %v5565_v27 = vpop.f32.mrf.mxu0 }
 0x5f7   :  { %5573 = vmatpush.bf16.msra.mxu1 %v7943_v11  ;;  %v8644_v11 = vld [vmem:[#allocation22 + $0x7c] sm:$0xf] }
 0x5f8   :  { %5638 = vmatpush.bf16.msra.mxu2 %v10130_v31  ;;  %5651 = vmatpush.bf16.msra.mxu3 %v10102_v32  ;;  %v5536_v32 = vperm.slane %v10160_v59, 1  ;;  %v8106_v31 = vld [vmem:[#allocation22 + $0xb4] sm:$0xf0]  ;;  %v8085_v60 = vor.u32 %v8644_v11, %v8082_v0 }
 0x5f9   :  { %v8109_v45 = vor.u32 %v8650_v35, %v8106_v31  ;;  %v8638_v31 = vld [vmem:[#allocation22 + $0x4c] sm:$0xf]  ;;  %v8032_v11 = vld [vmem:[#allocation22 + $0x18] sm:$0xf] }
 0x5fa   :  { %v5564_v28 = vadd.f32 %v5563_v29, %v5536_v32  ;;  %v8061_v42 = vor.u32 %v8638_v31, %v8058_v34 }
 0x5fb   :  { %5574 = vmatpush.bf16.msra.mxu1 %v7931_v22  ;;  %v8642_v22 = vld [vmem:[#allocation22 + $0x68] sm:$0xf0] }
 0x5fc   :  { %5639 = vmatpush.bf16.msra.mxu2 %v10133_v58  ;;  %5652 = vmatpush.bf16.msra.mxu3 %v10105_v51  ;;  %v5604_v55 = vadd.f32 %v5602_v30, %v5564_v28  ;;  %v5029_v58 = vperm.slane %v10157_v36, 1  ;;  %v8069_v29 = vor.u32 %v8642_v22, %v8068_v17  ;;  %v8632_v22 = vld [vmem:[#allocation22 + $0x1c] sm:$0xf] }
 0x5fe   :  { %5575 = vmatmul.bf16.vlgmr.msra.gmra.mxu1 %v10095_v16  ;;  %v8651_v16 = vld [vmem:[#allocation22 + $0xb0] sm:$0xf0]  ;;  %v8017_v7 = vmul.f32 -1.442695, %v5604_v55 }
 0x5ff   :  { %v8105_v26 = vor.u32 %v8651_v16, %v8104_v24  ;;  %v8639_v24 = vld [vmem:[#allocation22 + $0x50] sm:$0xf0] }
 0x600   :  { %5847 = vmatpush.bf16.msrb.mxu2 %v8109_v45  ;;  %5860 = vmatpush.bf16.msrb.mxu3 %v8113_v54  ;;  %v8044_v54 = vld [vmem:[#allocation22 + $0x30] sm:$0xf] }
 0x601   :  { %5834 = vmatpush.bf16.msrb.mxu1 %v8105_v26 }
 0x604   :  { %5848 = vmatpush.bf16.msrb.mxu2 %v8097_v63  ;;  %5861 = vmatpush.bf16.msrb.mxu3 %v8101_v4  ;;  %v8052_v4 = vld [vmem:[#allocation22 + $0x38] sm:$0xf] }
 0x605   :  { %5835 = vmatpush.bf16.msrb.mxu1 %v8093_v44 }
 0x608   :  { %5849 = vmatpush.bf16.msrb.mxu2 %v8085_v60  ;;  %5862 = vmatpush.bf16.msrb.mxu3 %v8089_v20  ;;  %v8033_v20 = vor.u32 %v8633_v1, %v8032_v11 }
 0x609   :  { %5836 = vmatpush.bf16.msrb.mxu1 %v8081_v10  ;;  %v8637_v10 = vld [vmem:[#allocation22 + $0x40] sm:$0xf0] }
 0x60a   :  { %v8053_v60 = vor.u32 %v8637_v10, %v8052_v4 }
 0x60d   :  { %5837 = vmatpush.bf16.msrb.mxu1 %v8069_v29  ;;  %v8034_v29 = vld [vmem:[#allocation22 + $0x24] sm:$0xf0] }
 0x65b   :  { %v5043_v18 = vpop.f32.mrf.mxu1 }
 0x65c   :  { %v5044_v3 = vadd.f32 %v5043_v18, %v5028_v15 }
 0x65e   :  { %v5326_v56 = vadd.f32 %v5297_v50, %v5044_v3  ;;  %v8076_v50 = vld [vmem:[#allocation22 + $0x68] sm:$0xf]  ;;  %v8643_v3 = vld [vmem:[#allocation22 + $0x70] sm:$0xf0] }
 0x65f   :  { %v8077_v28 = vor.u32 %v8643_v3, %v8076_v50  ;;  %v8020_v3 = vld [vmem:[#allocation22] sm:$0xf] }
 0x660   :  { %v7918_v23 = vmul.f32 -1.442695, %v5326_v56  ;;  %v8056_v56 = vld [vmem:[#allocation22 + $0x48] sm:$0xf] }
 0x661   :  { %v5056_v51 = vpop.f32.mrf.mxu2  ;;  %5863 = vmatpush.bf16.msrb.mxu3 %v8077_v28  ;;  %v8022_v28 = vld [vmem:[#allocation22 + $0xc] sm:$0xf0] }
 0x662   :  { %8701 = vpow2.f32 %v7918_v23  ;;  %v10165_v21 = vpop.f32.mrf.mxu3  ;;  %v5057_v8 = vadd.f32 %v5056_v51, %v5029_v58 }
 0x663   :  { %v5045_v33 = vpop.f32.mrf.mxu1 }
 0x664   :  { %v8057_v33 = vor.u32 %v8639_v24, %v8056_v56  ;;  %v8630_v56 = vld [vmem:[#allocation22 + $0x8] sm:$0xf0] }
 0x665   :  { %v8021_v24 = vor.u32 %v8630_v56, %v8020_v3 }
 0x666   :  { %5838 = vmatpush.bf16.msrb.mxu1 %v8057_v33  ;;  %v8631_v33 = vld [vmem:[#allocation22 + $0x10] sm:$0xf0] }
 0x668   :  { %v8702_v37 = vpop.eup %8701 }
 0x669   :  { %v10173_v61 = vadd.f32 1.0, %v8702_v37  ;;  %v5058_v62 = vpop.f32.mrf.mxu2  ;;  %v8065_v37 = vor.u32 %v8640_v49, %v8064_v47 }
 0x66a   :  { %v5071_v53 = vpop.f32.mrf.mxu3  ;;  %v8045_v62 = vor.u32 %v8636_v48, %v8044_v54 }
 0x66b   :  { %8703 = vrcp.f32 %v10173_v61  ;;  %v5309_v38 = vpop.f32.mrf.mxu1  ;;  %v5342_v58 = vand.u32 2147483648, %v10173_v61  ;;  %v5340_v52 = vand.u32 2147483647, %v10173_v61  ;;  %vm5336_vm9 = vweird.f32 %v10173_v61  ;;  %v8046_v53 = vld [vmem:[#allocation22 + $0x3c] sm:$0xf0]  ;;  %5864 = vmatpush.bf16.msrb.mxu3 %v8065_v37 }
 0x66c   :  { %v5310_v9 = vadd.f32 %v5309_v38, %v5095_v43  ;;  %8705 = vpow2.f32 %v8017_v7  ;;  %v8641_v43 = vld [vmem:[#allocation22 + $0x64] sm:$0xf]  ;;  %5839 = vmatpush.bf16.msrb.mxu1 %v8045_v62 }
 0x66d   :  { %v8073_v18 = vor.u32 %v8641_v43, %v8070_v46  ;;  %v5343_v0 = vor.u32 1.1754944e-38, %v5342_v58  ;;  %vm5341_vm11 = vcmp.eq.f32.partialorder %v5340_v52, 8.507059e+37  ;;  %v8037_v46 = vor.u32 %v8632_v22, %v8034_v29 }
 0x66e   :  { %v5346_v19 = vadd.f32 %v5310_v9, %v5057_v8  ;;  %v8049_v9 = vor.u32 %v8635_v2, %v8046_v53 }
 0x66f   :  { %5850 = vmatpush.bf16.msrb.mxu2 %v8073_v18  ;;  %5865 = vmatpush.bf16.msrb.mxu3 %v8053_v60  ;;  %v8634_v18 = vld [vmem:[#allocation22 + $0x28] sm:$0xf0] }
 0x670   :  { %v7919_v27 = vmul.f32 -1.442695, %v5346_v19  ;;  %5840 = vmatpush.bf16.msrb.mxu1 %v8033_v20 }
 0x671   :  { %v10179_v6 = vpop.eup %8703  ;;  %v10181_v15 = vpop.f32.mrf.mxu2 }
 0x672   :  { %8707 = vpow2.f32 %v7919_v27  ;;  %v5332_v23 = vmul.f32 %v10179_v6, %v10173_v61  ;;  %v5550_v51 = vpop.f32.mrf.mxu3  ;;  %v8706_v44 = vpop.eup %8705  ;;  %vm5337_vm8 = vweird.f32 %v10179_v6  ;;  %v5030_v27 = vperm.slane %v10157_v36, 2 }
 0x673   :  { %v5551_v16 = vadd.f32 %v5550_v51, %v5535_v25  ;;  %v5311_v26 = vpop.f32.mrf.mxu1  ;;  %5851 = vmatpush.bf16.msrb.mxu2 %v8061_v42  ;;  %v10194_v5 = vadd.f32 1.0, %v8706_v44  ;;  %vm10200_vm10 = vmor %vm5336_vm9, %vm5337_vm8  ;;  %v5323_v43 = vadd.f32 %v10181_v15, %v5117_v12  ;;  %v8028_v15 = vld [vmem:[#allocation22 + $0x8] sm:$0xf] }
 0x674   :  { %v5333_v35 = vsub.f32 1.0, %v5332_v23  ;;  %v8629_v26 = vld [vmem:[#allocation22 + $0x4] sm:$0xf]  ;;  %v5070_v40 = vadd.f32 %v10165_v21, %v5030_v27  ;;  %5841 = vmatpush.bf16.msrb.mxu1 %v8021_v24  ;;  %v8029_v42 = vor.u32 %v8631_v33, %v8028_v15 }
 0x675   :  { %v5581_v45 = vadd.f32 %v10163_v13, %v5551_v16  ;;  %v8025_v12 = vor.u32 %v8629_v26, %v8022_v28  ;;  %vm5614_vm5 = vweird.f32 %v10194_v5  ;;  %v5618_v27 = vand.u32 2147483647, %v10194_v5  ;;  %v8658_v26 = vld [vmem:[%s10307_s17 + $0x28] sm:$0xff] }
 0x676   :  { %v5334_v55 = vmul.f32 %v10179_v6, %v5333_v35 }
 0x677   :  { %v8016_v39 = vmul.f32 -1.442695, %v5581_v45  ;;  %5852 = vmatpush.bf16.msrb.mxu2 %v8049_v9  ;;  %vm5619_vm7 = vcmp.eq.f32.partialorder %v5618_v27, 8.507059e+37 }
 0x678   :  { %v8708_v63 = vpop.eup %8707  ;;  %v5335_v57 = vadd.f32 %v10179_v6, %v5334_v55 }
 0x679   :  { %v10196_v7 = vadd.f32 1.0, %v8708_v63  ;;  %8709 = vpow2.f32 %v8016_v39  ;;  %v5324_v8 = vpop.f32.mrf.mxu2 }
 0x67a   :  { %v5339_v61 = vsel %vm10200_vm10, %v10179_v6, %v5335_v57  ;;  %v5552_v14 = vpop.f32.mrf.mxu3  ;;  %v8040_v6 = vld [vmem:[#allocation22 + $0x20] sm:$0xf] }
 0x67b   :  { %8711 = vrcp.f32 %v10196_v7  ;;  %v10208_v17 = vpop.f32.mrf.mxu1  ;;  %v5344_v19 = vsel %vm5341_vm11, %v5343_v0, %v5339_v61  ;;  %v8041_v50 = vor.u32 %v8634_v18, %v8040_v6  ;;  %5853 = vmatpush.bf16.msrb.mxu2 %v8037_v46  ;;  %v5362_v49 = vand.u32 2147483648, %v10196_v7 }
 0x67c   :  { %8713 = vrcp.f32 %v10194_v5  ;;  %v5366_v51 = vmul.f32 %v5344_v19, %v5323_v43  ;;  %v5360_v44 = vand.u32 2147483647, %v10196_v7  ;;  %vm5356_vm13 = vweird.f32 %v10196_v7 }
 0x67d   :  { %5866 = vmatpush.bf16.msrb.mxu3 %v8041_v50  ;;  %v5363_v37 = vor.u32 1.1754944e-38, %v5362_v49  ;;  %v5624_v61 = vperm.slane %v10163_v13, 2 }
 0x67e   :  { %v5367_v34 = vadd.f32 %v5366_v51, %v5070_v40  ;;  %vm5361_vm15 = vcmp.eq.f32.partialorder %v5360_v44, 8.507059e+37  ;;  %v8659_v51 = vld [vmem:[%s10307_s17 + $0x30] sm:$0xff]  ;;  %v8657_v40 = vld [vmem:[%s10307_s17 + $0x20] sm:$0xff] }
 0x67f   :  { %v8710_v23 = vpop.eup %8709  ;;  %5854 = vmatpush.bf16.msrb.mxu2 %v8025_v12 }
 0x680   :  { %v5585_v16 = vadd.f32 1.0, %v8710_v23 }
 0x681   :  { %v8712_v36 = vpop.eup %8711  ;;  %5867 = vmatpush.bf16.msrb.mxu3 %v8029_v42 }
 0x682   :  { %v5352_v35 = vmul.f32 %v8712_v36, %v10196_v7  ;;  %8715 = vrcp.f32 %v5585_v16  ;;  %v8714_v31 = vpop.eup %8713  ;;  %vm5357_vm12 = vweird.f32 %v8712_v36  ;;  %v5597_v2 = vand.u32 2147483648, %v5585_v16 }
 0x683   :  { %v5578_v45 = vpop.f32.mrf.mxu1  ;;  %v5610_v54 = vmul.f32 %v8714_v31, %v10194_v5  ;;  %8717 = vtanh.f32 %v5367_v34  ;;  %vm5358_vm14 = vmor %vm5356_vm13, %vm5357_vm12  ;;  %v5595_v38 = vand.u32 2147483647, %v5585_v16  ;;  %v5537_v7 = vperm.slane %v10160_v59, 2  ;;  %v8656_v34 = vld [vmem:[%s10307_s17 + $0x18] sm:$0xff] }
 0x684   :  { %v5353_v47 = vsub.f32 1.0, %v5352_v35  ;;  %vm5591_vm1 = vweird.f32 %v5585_v16  ;;  %v5598_v0 = vor.u32 1.1754944e-38, %v5597_v2  ;;  %vm5615_vm4 = vweird.f32 %v8714_v31 }
 0x685   :  { %v5611_v52 = vsub.f32 1.0, %v5610_v54  ;;  %vm5596_vm3 = vcmp.eq.f32.partialorder %v5595_v38, 8.507059e+37  ;;  %v5577_v22 = vadd.f32 %v10208_v17, %v5537_v7  ;;  %vm5616_vm6 = vmor %vm5614_vm5, %vm5615_vm4  ;;  %v8662_v38 = vld [vmem:[%s10309_s19 + $0x8] sm:$0xff] }
 0x686   :  { %v5354_v21 = vmul.f32 %v8712_v36, %v5353_v47  ;;  %v8655_v47 = vld [vmem:[%s10307_s17 + $0x10] sm:$0xff] }
 0x687   :  { %v5612_v8 = vmul.f32 %v8714_v31, %v5611_v52 }
 0x688   :  { %v8716_v55 = vpop.eup %8715  ;;  %v5355_v58 = vadd.f32 %v8712_v36, %v5354_v21 }
 0x689   :  { %v5587_v48 = vmul.f32 %v8716_v55, %v5585_v16  ;;  %v8718_v53 = vpop.eup %8717  ;;  %vm5592_vm0 = vweird.f32 %v8716_v55  ;;  %v5613_v19 = vadd.f32 %v8714_v31, %v5612_v8 }
 0x68a   :  { %v5359_v39 = vsel %vm5358_vm14, %v8712_v36, %v5355_v58  ;;  %vm5593_vm2 = vmor %vm5591_vm1, %vm5592_vm0  ;;  %v5832_v36 = vperm.slane %v10163_v13, 0  ;;  %vm6034_vm0 = vcmask 523264   ;;  %vm6051_vm1 = vcmask 32768  }
 0x68b   :  { %v5364_v62 = vsel %vm5361_vm15, %v5363_v37, %v5359_v39  ;;  %v5588_v63 = vsub.f32 1.0, %v5587_v48  ;;  %v5617_v46 = vsel %vm5616_vm6, %v8714_v31, %v5613_v19  ;;  %v8653_v37 = vld [vmem:[%s10307_s17] sm:$0xff] }
 0x68c   :  { %v5369_v57 = vsub.f32 1.0, %v5364_v62  ;;  %v5371_v10 = vmul.f32 %v5364_v62, %v9849_v41  ;;  %v5620_v41 = vand.u32 2147483648, %v10194_v5  ;;  %v8660_v5 = vld [vmem:[%s10307_s17 + $0x38] sm:$0xff] }
 0x68d   :  { %v5589_v4 = vmul.f32 %v8716_v55, %v5588_v63  ;;  %5986 = vmatpush.bf16.msra.mxu0 %v8660_v5  ;;  %v8663_v63 = vld [vmem:[%s10309_s19 + $0x10] sm:$0xff] }
 0x68e   :  { %v5370_v9 = vmul.f32 %v8718_v53, %v5369_v57  ;;  %v5621_v6 = vor.u32 1.1754944e-38, %v5620_v41 }
 0x68f   :  { %v5590_v11 = vadd.f32 %v8716_v55, %v5589_v4 }
 0x690   :  { %v5372_v14 = vadd.f32 %v5371_v10, %v5370_v9  ;;  %v5622_v18 = vsel %vm5619_vm7, %v5621_v6, %v5617_v46 }
 0x691   :  { %v5594_v60 = vsel %vm5593_vm2, %v8716_v55, %v5590_v11  ;;  %v5629_v17 = vsub.f32 1.0, %v5622_v18  ;;  %5987 = vmatpush.bf16.msra.mxu0 %v8659_v51  ;;  %v8654_v55 = vld [vmem:[%s10307_s17 + $0x8] sm:$0xff] }
 0x692   :  { %v5599_v1 = vsel %vm5596_vm3, %v5598_v0, %v5594_v60  ;;  %v5631_v20 = vpack.c.bf16 %v5372_v14, %v5372_v14 }
 0x693   :  { %v5626_v29 = vmul.f32 %v5624_v61, %v5599_v1 }
 0x694   :  { %5640 = vmatmul.bf16.vlgmr.msra.gmra.mxu2 %v5631_v20  ;;  %5653 = vmatmul.bf16.vlgmr.msra.gmra.mxu3 %v5631_v20 }
 0x695   :  { %v5627_v43 = vadd.f32 %v5626_v29, %v5577_v22  ;;  %5666 = vmatmul.bf16.vlgmr.msrb.gmra.mxu0 %v5631_v20 }
 0x696   :  { %5988 = vmatpush.bf16.msra.mxu0 %v8658_v26 }
 0x697   :  { %8719 = vtanh.f32 %v5627_v43 }
 0x69a   :  { %5989 = vmatpush.bf16.msra.mxu0 %v8657_v40 }
 0x69d   :  { %v8720_v50 = vpop.eup %8719 }
 0x69e   :  { %v10232_v3 = vmul.f32 %v8720_v50, %v5629_v17  ;;  %5990 = vmatpush.bf16.msra.mxu0 %v8656_v34 }
 0x6a0   :  { %v5671_v56 = vpack.c.bf16 %v10232_v3, %v10232_v3 }
 0x6a2   :  { %5842 = vmatmul.bf16.vlgmr.msrb.gmra.mxu1 %v5671_v56  ;;  %5991 = vmatpush.bf16.msra.mxu0 %v8655_v47 }
 0x6a4   :  { %5855 = vmatmul.bf16.vlgmr.msrb.gmra.mxu2 %v5671_v56  ;;  %5868 = vmatmul.bf16.vlgmr.msrb.gmra.mxu3 %v5671_v56 }
 0x6a6   :  { %5992 = vmatpush.bf16.msra.mxu0 %v8654_v55 }
 0x6aa   :  { %5993 = vmatpush.bf16.msra.mxu0 %v8653_v37 }
 0x712   :  { %v10239_v23 = vpop.f32.mrf.mxu0 }
 0x713   :  { %v5668_v41 = vadd.f32 %v10239_v23, %v5537_v7 }
 0x717   :  { %v5641_v24 = vpop.f32.mrf.mxu2  ;;  %v5654_v16 = vpop.f32.mrf.mxu3 }
 0x718   :  { %v5642_v33 = vadd.f32 %v5641_v24, %v5535_v25  ;;  %v5655_v25 = vadd.f32 %v5654_v16, %v5536_v32  ;;  %v8661_v24 = vld [vmem:[%s10309_s19] sm:$0xff] }
 0x719   :  { %v5937_v16 = vld [vmem:[#allocation26] sm:$0x1] }
 0x71a   :  { %v5669_v28 = vpop.f32.mrf.mxu0 }
 0x71f   :  { %v5843_v12 = vpop.f32.mrf.mxu1  ;;  %v5643_v15 = vpop.f32.mrf.mxu2 }
 0x720   :  { %v5844_v35 = vadd.f32 %v5843_v12, %v5832_v36  ;;  %v5656_v31 = vpop.f32.mrf.mxu3  ;;  %v6009_v15 = vld [vmem:[#allocation28] sm:$0x1] }
 0x722   :  { %v5873_v45 = vadd.f32 %v5844_v35, %v5642_v33 }
 0x724   :  { %v8114_v42 = vmul.f32 -1.442695, %v5873_v45 }
 0x726   :  { %8721 = vpow2.f32 %v8114_v42 }
 0x727   :  { %v5845_v49 = vpop.f32.mrf.mxu1  ;;  %v5856_v54 = vpop.f32.mrf.mxu2 }
 0x728   :  { %v5857_v21 = vadd.f32 %v5856_v54, %v5602_v30  ;;  %v5869_v44 = vpop.f32.mrf.mxu3  ;;  %v8664_v30 = vld [vmem:[%s10309_s19 + $0x18] sm:$0xff] }
 0x729   :  { %6042 = vmatpush.bf16.msra.mxu1 %v8664_v30  ;;  %v5870_v19 = vadd.f32 %v5869_v44, %v5624_v61 }
 0x72a   :  { %v5893_v58 = vadd.f32 %v5857_v21, %v5655_v25 }
 0x72c   :  { %v8722_v48 = vpop.eup %8721  ;;  %v8115_v52 = vmul.f32 -1.442695, %v5893_v58 }
 0x72d   :  { %v5877_v39 = vadd.f32 1.0, %v8722_v48  ;;  %6043 = vmatpush.bf16.msra.mxu1 %v8663_v63 }
 0x72e   :  { %8723 = vpow2.f32 %v8115_v52 }
 0x72f   :  { %8725 = vrcp.f32 %v5877_v39  ;;  %v5858_v32 = vpop.f32.mrf.mxu2  ;;  %v5889_v9 = vand.u32 2147483648, %v5877_v39  ;;  %v5887_v11 = vand.u32 2147483647, %v5877_v39  ;;  %vm5883_vm9 = vweird.f32 %v5877_v39 }
 0x730   :  { %v5871_v62 = vpop.f32.mrf.mxu3 }
 0x731   :  { %6044 = vmatpush.bf16.msra.mxu1 %v8662_v38  ;;  %v5890_v60 = vor.u32 1.1754944e-38, %v5889_v9  ;;  %vm5888_vm11 = vcmp.eq.f32.partialorder %v5887_v11, 8.507059e+37 }
 0x734   :  { %v8724_v57 = vpop.eup %8723 }
 0x735   :  { %v8726_v2 = vpop.eup %8725  ;;  %v5897_v53 = vadd.f32 1.0, %v8724_v57  ;;  %6045 = vmatpush.bf16.msra.mxu1 %v8661_v24 }
 0x736   :  { %v5879_v4 = vmul.f32 %v8726_v2, %v5877_v39  ;;  %vm5884_vm8 = vweird.f32 %v8726_v2 }
 0x737   :  { %8727 = vrcp.f32 %v5897_v53  ;;  %vm5885_vm10 = vmor %vm5883_vm9, %vm5884_vm8  ;;  %v5909_v43 = vand.u32 2147483648, %v5897_v53  ;;  %v5907_v6 = vand.u32 2147483647, %v5897_v53  ;;  %vm5903_vm13 = vweird.f32 %v5897_v53 }
 0x738   :  { %v5880_v8 = vsub.f32 1.0, %v5879_v4 }
 0x739   :  { %v5910_v13 = vor.u32 1.1754944e-38, %v5909_v43  ;;  %vm5908_vm15 = vcmp.eq.f32.partialorder %v5907_v6, 8.507059e+37 }
 0x73a   :  { %v5881_v10 = vmul.f32 %v8726_v2, %v5880_v8 }
 0x73c   :  { %v5882_v0 = vadd.f32 %v8726_v2, %v5881_v10 }
 0x73d   :  { %v8728_v14 = vpop.eup %8727 }
 0x73e   :  { %v5899_v1 = vmul.f32 %v8728_v14, %v5897_v53  ;;  %v5886_v20 = vsel %vm5885_vm10, %v8726_v2, %v5882_v0  ;;  %vm5904_vm12 = vweird.f32 %v8728_v14 }
 0x73f   :  { %v5891_v22 = vsel %vm5888_vm11, %v5890_v60, %v5886_v20  ;;  %vm5905_vm14 = vmor %vm5903_vm13, %vm5904_vm12 }
 0x740   :  { %v5900_v29 = vsub.f32 1.0, %v5899_v1  ;;  %v5913_v27 = vmul.f32 %v5891_v22, %v5870_v19 }
 0x742   :  { %v5901_v46 = vmul.f32 %v8728_v14, %v5900_v29  ;;  %v5914_v18 = vadd.f32 %v5913_v27, %v5668_v41 }
 0x744   :  { %v5902_v17 = vadd.f32 %v8728_v14, %v5901_v46  ;;  %8729 = vtanh.f32 %v5914_v18 }
 0x746   :  { %v5906_v61 = vsel %vm5905_vm14, %v8728_v14, %v5902_v17 }
 0x747   :  { %v5911_v50 = vsel %vm5908_vm15, %v5910_v13, %v5906_v61 }
 0x748   :  { %v5916_v56 = vsub.f32 1.0, %v5911_v50  ;;  %v5918_v7 = vmul.f32 %v5911_v50, %v10232_v3 }
 0x74a   :  { %v8730_v5 = vpop.eup %8729 }
 0x74b   :  { %v5917_v59 = vmul.f32 %v8730_v5, %v5916_v56 }
 0x74d   :  { %v5919_v23 = vadd.f32 %v5918_v7, %v5917_v59 }
 0x74f   :  { %v5920_v51 = vpack.c.bf16 %v5919_v23, %v5919_v23 }
 0x751   :  { %5994 = vmatmul.bf16.vlgmr.msra.gmra.mxu0 %v5920_v51 }
 0x7ce   :  { %v5995_v26 = vpop.f32.mrf.mxu0 }
 0x7cf   :  { %v5996_v28 = vadd.f32 %v5995_v26, %v5937_v16 }
 0x7d1   :  { %v5999_v36 = vmax.f32 %v5996_v28, 0.0 }
 0x7d3   :  { %v6000_v40 = vpack.c.bf16 %v5999_v36, %v5999_v36 }
 0x7d5   :  { %8164 = vmatmul.msk.bf16.vlgmr.msra.gmra.mxu1 %vm6034_vm0, %v6000_v40 }
 0x7d6   :  { %v5997_v12 = vpop.f32.mrf.mxu0 }
 0x852   :  { %v6047_v3 = vpop.f32.mrf.mxu1 }
 0x853   :  { %v6048_v33 = vadd.f32 %v6047_v3, %v6009_v15 }
 0x855   :  { %6052 = vst.msk [vmem:[#allocation29] sm:$0x1] %vm6051_vm1, %v6048_v33 }
 0x856   :  { %6063 = dma.vmem_to_hbm [thread:$0]  %s6059_s12, 16, %s6061_s25, [#allocation7]  }
 0x85a   :  { %v6049_v35 = vpop.f32.mrf.mxu1 }
 0x85b   :  { %9132 = dma.done.wait [#allocation7], 16  }
 0x85c   :  { %9133 = vsyncadd [#allocation7], 4294967280 }
 0x85d   :  { %6068 = vsyncpa [#allocation6], 1 }
 0x85e   :  { %6069 = vsyncpa [#allocation9], 1 }
 0x85f   :  { %6070 = vsyncpa [#allocation12], 1 }
 0x860   :  { %6071 = vsyncpa [#allocation15], 1 }
 0x861   :  { %6072 = vsyncpa [#allocation18], 1 }
 0x862   :  { %6073 = vsyncpa [#allocation21], 1 }
 0x863   :  { %6074 = vsyncpa [#allocation24], 1 }
 0x864   :  { %6075 = vsyncpa [#allocation27], 1 }
 0x865   :  { %6076 = vsyncpa [#allocation7], 1 }

</bundles_post_ra>
